<compile_context>
chip_gen: v7x
topology: tpu7x:2x2x1
jax: 0.10.0
libtpu: 0.0.40
codegen_flags: <defaults>
</compile_context>

<pallas_src>
import functools
import math

import jax
import jax.numpy as jnp
from jax import lax
from jax.experimental import pallas as pl
from jax.experimental.pallas import tpu as pltpu

EPS = 1e-5  # torch.nn.LayerNorm default


def _layernorm(x, gamma, beta):
    # Two-pass (x - mean) variance: numerically safe for the residual-grown
    # norm2 input (one-pass E[x^2] - E[x]^2 can cancel catastrophically).
    m = jnp.mean(x, axis=-1, keepdims=True)
    xc = x - m
    var = jnp.mean(xc * xc, axis=-1, keepdims=True)
    return xc * lax.rsqrt(var + EPS) * gamma + beta


def _gelu_exact(x):
    # torch.nn.GELU() default = exact (erf) GELU; kept exact to match the
    # PyTorch numerics.  (Switch to the tanh form only if a bundle dump shows
    # the VALU slot as the binding unit.)
    return 0.5 * x * (1.0 + lax.erf(x * (1.0 / math.sqrt(2.0))))


def encoder_block_kernel(num_head, dim_per_head, compute_dtype, approx_recip,
                         x_ref,
                         g1_ref, be1_ref,
                         wqkv_ref, bqkv_ref,
                         wp_ref, bp_ref,
                         g2_ref, be2_ref,
                         w1_ref, b1_ref, w2_ref, b2_ref,
                         out_ref,
                         hbuf_ref, ctx_ref):
    H, dph = num_head, dim_per_head
    cdt = compute_dtype

    x = x_ref[0]                                            # (S, D) f32

    # ---- norm1 ----
    xn = _layernorm(x, g1_ref[...], be1_ref[...])
    xn_c = xn.astype(cdt)

    # ---- fused Q/K/V projection: one (S, D) @ (D, 3D) MXU pass, f32 accum.
    # The softmax scale 1/sqrt(dph) is already folded into the q columns.
    qkv = jnp.dot(xn_c, wqkv_ref[...],
                  preferred_element_type=jnp.float32) + bqkv_ref[...]   # (S, 3D)

    # Head-major repack.  wqkv columns are interleaved per head as
    # [q_h | k_h | v_h], so one contiguous slice per head suffices
    # (H stores of width 3*dph instead of 3*H stores of width dph).
    for h in range(H):
        hbuf_ref[h] = qkv[:, h * 3 * dph:(h + 1) * 3 * dph].astype(cdt)
    qkv3 = hbuf_ref[...]                                    # (H, S, 3*dph)
    q3 = qkv3[:, :, 0 * dph:1 * dph]                        # (H, S, dph)
    k3 = qkv3[:, :, 1 * dph:2 * dph]
    v3 = qkv3[:, :, 2 * dph:3 * dph]

    # scores[h, i, j] = q3[h, i, :] . k3[h, j, :]
    # TODO(synk): for long S, tile over keys with an online softmax
    # (flash-style) instead of materializing the full (H, S, S) f32 scores.
    s = lax.dot_general(q3, k3, (((2,), (2,)), ((0,), (0,))),
                        preferred_element_type=jnp.float32)         # (H, S, S)
    s = s - jnp.max(s, axis=-1, keepdims=True)
    p = jnp.exp(s)                                          # unnormalized
    denom = jnp.sum(p, axis=-1, keepdims=True)              # (H, S, 1)

    # ctx[h, i, d] = sum_j p[h, i, j] * v3[h, j, d]; normalize AFTER the P@V
    # matmul (row-constant denominator), saving H*S*S VPU multiplies.
    ctx = lax.dot_general(p.astype(cdt), v3, (((2,), (1,)), ((0,), (0,))),
                          preferred_element_type=jnp.float32)       # (H, S, dph)
    ctx = ctx * pl.reciprocal(denom, approx=approx_recip)

    # Pack heads back to (S, D) so the output projection contracts over the
    # full D (MXU K-fill) instead of per-head dph: no (H, S, D) f32 temporary
    # and no H-way VALU head reduction.
    for h in range(H):
        ctx_ref[:, h * dph:(h + 1) * dph] = ctx[h].astype(cdt)
    proj = jnp.dot(ctx_ref[...], wp_ref[...],
                   preferred_element_type=jnp.float32) + bp_ref[...]  # (S, D)

    # ---- residual 1 ----
    res = x + proj

    # ---- MLP (Linear -> Dropout -> GELU -> Linear) ----
    def mlp(t):
        # TODO(synk): Dropout(p=0.5) is identity in eval mode; no in-kernel
        # PRNG masking is applied (training would need pltpu.prng_*).
        h1 = jnp.dot(t.astype(cdt), w1_ref[...],
                     preferred_element_type=jnp.float32) + b1_ref[...]
        h1 = _gelu_exact(h1)
        return jnp.dot(h1.astype(cdt), w2_ref[...],
                       preferred_element_type=jnp.float32) + b2_ref[...]

    # forward(): result = mlp(norm2(res)); output = mlp(result); res + output
    y = mlp(_layernorm(res, g2_ref[...], be2_ref[...]))
    y = mlp(y)

    out_ref[0] = (res + y).astype(out_ref.dtype)


PARAM_ORDER = ["g1", "be1", "wqkv", "bqkv", "wp", "bp",
               "g2", "be2", "w1", "b1", "w2", "b2"]


def _interleave_heads(q, k, v, num_head, dph):
    """Reorder packed q|k|v column blocks so that for each head h the columns
    [h*3*dph, (h+1)*3*dph) hold [q_h | k_h | v_h]."""
    lead = q.shape[:-1]
    stacked = jnp.stack([a.reshape(*lead, num_head, dph) for a in (q, k, v)],
                        axis=-2)                            # (..., H, 3, dph)
    return stacked.reshape(*lead, num_head * 3 * dph)


def _prepare_params(params, num_head, dph, cdt):
    """Host-side prep: fold the softmax scale into wq/bq, fuse Q/K/V into one
    head-interleaved (D, 3D) weight, cast MXU operands to the compute dtype
    (biases / LayerNorm params stay f32)."""
    scale = 1.0 / math.sqrt(dph)
    wqkv = _interleave_heads(params["wq"] * scale, params["wk"], params["wv"],
                             num_head, dph)
    bqkv = _interleave_heads(params["bq"] * scale, params["bk"], params["bv"],
                             num_head, dph)
    return {
        "g1": params["g1"], "be1": params["be1"],
        "wqkv": wqkv.astype(cdt), "bqkv": bqkv,
        "wp": params["wp"].astype(cdt), "bp": params["bp"],
        "g2": params["g2"], "be2": params["be2"],
        "w1": params["w1"].astype(cdt), "b1": params["b1"],
        "w2": params["w2"].astype(cdt), "b2": params["b2"],
    }


def _pick_vmem_limit():
    # Generation-aware scoped-VMEM cap: ~16 MiB headroom below the physical
    # capacity (v5e/v6e: 128 MiB -> 112 MiB; v7x: 64 MiB -> 48 MiB).
    try:
        cap = pltpu.get_tpu_info().vmem_capacity_bytes
    except Exception:
        cap = 64 * 1024 * 1024            # conservative (v7x-sized) fallback
    headroom = 16 * 1024 * 1024
    return int(max(32 * 1024 * 1024, min(cap - headroom, 112 * 1024 * 1024)))


def encoder_block(x, params, num_head, *, compute_dtype=jnp.bfloat16,
                  approx_reciprocal=False, single_buffer_weights=True):
    B, S, D = x.shape
    H = num_head
    assert D % H == 0, "dim_model must be divisible by num_head"
    dph = D // H
    cdt = jnp.dtype(compute_dtype)

    prepared = _prepare_params(params, H, dph, cdt)
    args = [x] + [prepared[name] for name in PARAM_ORDER]

    kernel = functools.partial(encoder_block_kernel, H, dph, cdt,
                               approx_reciprocal)

    # TODO(synk): for v7x / production shapes, split the MLP into a second
    # pallas_call gridded over (B, S//TS) (engages both TensorCores, shrinks
    # per-step VMEM) and/or keep w1/w2 in HBM with pltpu.emit_pipeline K-tiling.
    def build(single_buffer):
        def weight_spec(shape):
            nd = len(shape)
            index_map = lambda b: (0,) * nd
            if single_buffer:
                # Constant-index blocks never change -> no double buffering,
                # halving the resident weight footprint in VMEM.
                return pl.BlockSpec(shape, index_map,
                                    pipeline_mode=pl.Buffered(1))
            return pl.BlockSpec(shape, index_map)

        in_specs = [pl.BlockSpec((1, S, D), lambda b: (b, 0, 0))]
        in_specs += [weight_spec(prepared[name].shape) for name in PARAM_ORDER]

        return pl.pallas_call(
            kernel,
            out_shape=jax.ShapeDtypeStruct((B, S, D), x.dtype),
            grid=(B,),
            in_specs=in_specs,
            out_specs=pl.BlockSpec((1, S, D), lambda b: (b, 0, 0)),
            scratch_shapes=[pltpu.VMEM((H, S, 3 * dph), cdt),  # head-major q|k|v
                            pltpu.VMEM((S, D), cdt)],          # packed context
            compiler_params=pltpu.CompilerParams(
                dimension_semantics=("parallel",),
                vmem_limit_bytes=_pick_vmem_limit(),
            ),
        )

    if single_buffer_weights:
        try:
            return build(True)(*args)
        except Exception:
            # pipeline_mode=pl.Buffered(1) unsupported on this JAX build;
            # fall back to default double-buffered weight blocks.
            pass
    return build(False)(*args)


# ----------------------- parameter init + pure-JAX reference -----------------

def init_params(key, dim_model, mlp_dim, num_head):
    dph = dim_model // num_head
    keys = jax.random.split(key, 10)

    def lin(k, fan_in, fan_out):
        bound = 1.0 / math.sqrt(fan_in)
        kw, kb = jax.random.split(k)
        w = jax.random.uniform(kw, (fan_in, fan_out), jnp.float32, -bound, bound)
        b = jax.random.uniform(kb, (1, fan_out), jnp.float32, -bound, bound)
        return w, b

    # Per-head q/k/v Linears packed along the output dim (head h -> columns
    # [h*dph, (h+1)*dph)), matching torch.cat of head outputs on the last axis.
    def packed_qkv(k):
        ws, bs = [], []
        for kk in jax.random.split(k, num_head):
            w, b = lin(kk, dim_model, dph)
            ws.append(w)
            bs.append(b)
        return jnp.concatenate(ws, axis=1), jnp.concatenate(bs, axis=1)

    wq, bq = packed_qkv(keys[0])
    wk, bk = packed_qkv(keys[1])
    wv, bv = packed_qkv(keys[2])
    wp, bp = lin(keys[3], num_head * dph, dim_model)
    w1, b1 = lin(keys[4], dim_model, mlp_dim)
    w2, b2 = lin(keys[5], mlp_dim, dim_model)

    return {
        "g1": 1.0 + 0.1 * jax.random.normal(keys[6], (1, dim_model)),
        "be1": 0.1 * jax.random.normal(keys[7], (1, dim_model)),
        "wq": wq, "bq": bq, "wk": wk, "bk": bk, "wv": wv, "bv": bv,
        "wp": wp, "bp": bp,
        "g2": 1.0 + 0.1 * jax.random.normal(keys[8], (1, dim_model)),
        "be2": 0.1 * jax.random.normal(keys[9], (1, dim_model)),
        "w1": w1, "b1": b1, "w2": w2, "b2": b2,
    }


def encoder_block_ref(x, params, num_head, compute_dtype=jnp.float32):
    """Pure-JAX reference mirroring the PyTorch module.  compute_dtype mirrors
    the kernel's MXU-operand cast (accumulation stays f32 everywhere), so the
    bf16 kernel can be checked against numerically matched math as well as the
    exact f32 math."""
    cdt = jnp.dtype(compute_dtype)
    D = x.shape[-1]
    dph = D // num_head
    c = lambda t: t.astype(cdt)

    def ln(t, g, b):
        m = jnp.mean(t, axis=-1, keepdims=True)
        v = jnp.mean((t - m) ** 2, axis=-1, keepdims=True)
        return (t - m) / jnp.sqrt(v + EPS) * g + b

    def matmul(a, w):
        return jnp.einsum("bsd,de->bse", c(a), c(w),
                          preferred_element_type=jnp.float32)

    xn = ln(x, params["g1"], params["be1"])
    q = (matmul(xn, params["wq"]) + params["bq"]) * (1.0 / math.sqrt(dph))
    k = matmul(xn, params["wk"]) + params["bk"]
    v = matmul(xn, params["wv"]) + params["bv"]
    outs = []
    for h in range(num_head):
        sl = slice(h * dph, (h + 1) * dph)
        qh, kh, vh = q[..., sl], k[..., sl], v[..., sl]
        s = jnp.einsum("bsd,btd->bst", c(qh), c(kh),
                       preferred_element_type=jnp.float32)
        s = s - jnp.max(s, axis=-1, keepdims=True)
        p = jnp.exp(s)
        p = p / jnp.sum(p, axis=-1, keepdims=True)
        outs.append(jnp.einsum("bst,btd->bsd", c(p), c(vh),
                               preferred_element_type=jnp.float32))
    attn = jnp.concatenate(outs, axis=-1)
    proj = matmul(attn, params["wp"]) + params["bp"]
    res = x + proj

    def mlp(t):
        h1 = matmul(t, params["w1"]) + params["b1"]
        h1 = 0.5 * h1 * (1.0 + lax.erf(h1 / math.sqrt(2.0)))
        return matmul(h1, params["w2"]) + params["b2"]

    y = mlp(ln(res, params["g2"], params["be2"]))
    y = mlp(y)
    return res + y


if __name__ == "__main__":
    # TPU-friendly small shapes: D multiple of 128 (lane-dense stores),
    # S multiple of 8.
    B, S, D, MLP_DIM, NUM_HEAD = 2, 16, 128, 256, 8

    key = jax.random.PRNGKey(0)
    kx, kp = jax.random.split(key)
    x = jax.random.normal(kx, (B, S, D), jnp.float32)
    params = init_params(kp, D, MLP_DIM, NUM_HEAD)

    ref_f32 = encoder_block_ref(x, params, NUM_HEAD, compute_dtype=jnp.float32)

    # 1) f32 MXU-operand path: tight check against the exact f32 reference.
    out_f32 = jax.block_until_ready(
        encoder_block(x, params, NUM_HEAD, compute_dtype=jnp.float32))
    assert out_f32.shape == (B, S, D)
    err_f32 = jnp.max(jnp.abs(out_f32 - ref_f32))
    assert jnp.allclose(out_f32, ref_f32, rtol=1e-3, atol=1e-3), (
        f"f32 path: max abs err = {err_f32}")

    # 2) bf16 MXU-operand path (perf config): check against the numerically
    #    matched (bf16-operand / f32-accum) reference, plus a loose sanity
    #    check against the exact f32 reference.
    out_bf16 = jax.block_until_ready(
        encoder_block(x, params, NUM_HEAD, compute_dtype=jnp.bfloat16))
    ref_bf16 = encoder_block_ref(x, params, NUM_HEAD, compute_dtype=jnp.bfloat16)
    err_m = jnp.max(jnp.abs(out_bf16 - ref_bf16))
    assert jnp.allclose(out_bf16, ref_bf16, rtol=3e-2, atol=3e-2), (
        f"bf16 path vs matched ref: max abs err = {err_m}")
    err_x = jnp.max(jnp.abs(out_bf16 - ref_f32))
    assert jnp.allclose(out_bf16, ref_f32, rtol=1e-1, atol=1e-1), (
        f"bf16 path vs exact ref: max abs err = {err_x}")

    print("KERNEL_OK")
</pallas_src>

<mosaic_0001>
module attributes {stable_mosaic.version = 11 : i64} {
  func.func @encoder_block_kernel(%arg0: i32, %arg1: memref<1x16x128xf32, #tpu.memory_space<vmem>>, %arg2: memref<1x128xf32, #tpu.memory_space<vmem>>, %arg3: memref<1x128xf32, #tpu.memory_space<vmem>>, %arg4: memref<128x384xf32, #tpu.memory_space<vmem>>, %arg5: memref<1x384xf32, #tpu.memory_space<vmem>>, %arg6: memref<128x128xf32, #tpu.memory_space<vmem>>, %arg7: memref<1x128xf32, #tpu.memory_space<vmem>>, %arg8: memref<1x128xf32, #tpu.memory_space<vmem>>, %arg9: memref<1x128xf32, #tpu.memory_space<vmem>>, %arg10: memref<128x256xf32, #tpu.memory_space<vmem>>, %arg11: memref<1x256xf32, #tpu.memory_space<vmem>>, %arg12: memref<256x128xf32, #tpu.memory_space<vmem>>, %arg13: memref<1x128xf32, #tpu.memory_space<vmem>>, %arg14: memref<1x16x128xf32, #tpu.memory_space<vmem>>, %arg15: memref<8x16x48xf32, #tpu.memory_space<vmem>>, %arg16: memref<16x128xf32, #tpu.memory_space<vmem>>) attributes {dimension_semantics = [#tpu.dimension_semantics<parallel>], iteration_bounds = array<i64: 2>, scalar_prefetch = 0 : i64, scratch_operands = 2 : i64, tpu.core_type = #tpu.core_type<tc>, window_params = [{transform_indices = @transform_0, window_bounds = array<i64: 1, 16, 128>}, {pipeline_mode = #tpu.pipeline_mode<synchronous>, transform_indices = @transform_1, window_bounds = array<i64: 1, 128>}, {pipeline_mode = #tpu.pipeline_mode<synchronous>, transform_indices = @transform_2, window_bounds = array<i64: 1, 128>}, {pipeline_mode = #tpu.pipeline_mode<synchronous>, transform_indices = @transform_3, window_bounds = array<i64: 128, 384>}, {pipeline_mode = #tpu.pipeline_mode<synchronous>, transform_indices = @transform_4, window_bounds = array<i64: 1, 384>}, {pipeline_mode = #tpu.pipeline_mode<synchronous>, transform_indices = @transform_5, window_bounds = array<i64: 128, 128>}, {pipeline_mode = #tpu.pipeline_mode<synchronous>, transform_indices = @transform_6, window_bounds = array<i64: 1, 128>}, {pipeline_mode = #tpu.pipeline_mode<synchronous>, transform_indices = @transform_7, window_bounds = array<i64: 1, 128>}, {pipeline_mode = #tpu.pipeline_mode<synchronous>, transform_indices = @transform_8, window_bounds = array<i64: 1, 128>}, {pipeline_mode = #tpu.pipeline_mode<synchronous>, transform_indices = @transform_9, window_bounds = array<i64: 128, 256>}, {pipeline_mode = #tpu.pipeline_mode<synchronous>, transform_indices = @transform_10, window_bounds = array<i64: 1, 256>}, {pipeline_mode = #tpu.pipeline_mode<synchronous>, transform_indices = @transform_11, window_bounds = array<i64: 256, 128>}, {pipeline_mode = #tpu.pipeline_mode<synchronous>, transform_indices = @transform_12, window_bounds = array<i64: 1, 128>}, {transform_indices = @transform_13, window_bounds = array<i64: 1, 16, 128>}]} {
    %c0 = arith.constant 0 : index
    %c0_0 = arith.constant 0 : index
    %c0_1 = arith.constant 0 : index
    %0 = vector.load %arg1[%c0, %c0_0, %c0_1] : memref<1x16x128xf32, #tpu.memory_space<vmem>>, vector<1x16x128xf32>
    %1 = vector.shape_cast %0 : vector<1x16x128xf32> to vector<16x128xf32>
    %c0_2 = arith.constant 0 : index
    %c0_3 = arith.constant 0 : index
    %2 = vector.load %arg2[%c0_2, %c0_3] : memref<1x128xf32, #tpu.memory_space<vmem>>, vector<1x128xf32>
    %c0_4 = arith.constant 0 : index
    %c0_5 = arith.constant 0 : index
    %3 = vector.load %arg3[%c0_4, %c0_5] : memref<1x128xf32, #tpu.memory_space<vmem>>, vector<1x128xf32>
    %cst = arith.constant dense<0.000000e+00> : vector<16xf32>
    %4 = vector.multi_reduction <add>, %1, %cst [1] : vector<16x128xf32> to vector<16xf32>
    %5 = vector.shape_cast %4 : vector<16xf32> to vector<16x1xf32>
    %cst_6 = arith.constant 1.280000e+02 : f32
    %6 = vector.broadcast %cst_6 : f32 to vector<16x1xf32>
    %7 = arith.divf %5, %6 : vector<16x1xf32>
    %8 = vector.broadcast %7 : vector<16x1xf32> to vector<16x128xf32>
    %9 = arith.subf %1, %8 : vector<16x128xf32>
    %10 = arith.mulf %9, %9 : vector<16x128xf32>
    %cst_7 = arith.constant dense<0.000000e+00> : vector<16xf32>
    %11 = vector.multi_reduction <add>, %10, %cst_7 [1] : vector<16x128xf32> to vector<16xf32>
    %12 = vector.shape_cast %11 : vector<16xf32> to vector<16x1xf32>
    %cst_8 = arith.constant 1.280000e+02 : f32
    %13 = vector.broadcast %cst_8 : f32 to vector<16x1xf32>
    %14 = arith.divf %12, %13 : vector<16x1xf32>
    %cst_9 = arith.constant 9.99999974E-6 : f32
    %15 = vector.broadcast %cst_9 : f32 to vector<16x1xf32>
    %16 = arith.addf %14, %15 : vector<16x1xf32>
    %17 = math.rsqrt %16 : vector<16x1xf32>
    %18 = vector.broadcast %17 : vector<16x1xf32> to vector<16x128xf32>
    %19 = arith.mulf %9, %18 : vector<16x128xf32>
    %20 = vector.broadcast %2 : vector<1x128xf32> to vector<16x128xf32>
    %21 = arith.mulf %19, %20 : vector<16x128xf32>
    %22 = vector.broadcast %3 : vector<1x128xf32> to vector<16x128xf32>
    %23 = arith.addf %21, %22 : vector<16x128xf32>
    %c0_10 = arith.constant 0 : index
    %c0_11 = arith.constant 0 : index
    %24 = vector.load %arg4[%c0_10, %c0_11] : memref<128x384xf32, #tpu.memory_space<vmem>>, vector<128x384xf32>
    %cst_12 = arith.constant dense<0.000000e+00> : vector<16x384xf32>
    %25 = tpu.matmul %23, %24, %cst_12 {dimension_numbers = #tpu.dot_dimension_numbers<[1], [0], [0], [1], [0, 0, 1, 1], [], []>} : vector<16x128xf32>, vector<128x384xf32>, vector<16x384xf32> -> vector<16x384xf32>
    %c0_13 = arith.constant 0 : index
    %c0_14 = arith.constant 0 : index
    %26 = vector.load %arg5[%c0_13, %c0_14] : memref<1x384xf32, #tpu.memory_space<vmem>>, vector<1x384xf32>
    %27 = vector.broadcast %26 : vector<1x384xf32> to vector<16x384xf32>
    %28 = arith.addf %25, %27 : vector<16x384xf32>
    %29 = vector.extract_strided_slice %28 {offsets = [0, 0], sizes = [16, 48], strides = [1, 1]} : vector<16x384xf32> to vector<16x48xf32>
    %c0_15 = arith.constant 0 : index
    %c0_16 = arith.constant 0 : index
    %c0_17 = arith.constant 0 : index
    %30 = vector.load %arg15[%c0_15, %c0_16, %c0_17] : memref<8x16x48xf32, #tpu.memory_space<vmem>>, vector<1x16x48xf32>
    %31 = vector.shape_cast %30 : vector<1x16x48xf32> to vector<16x48xf32>
    %32 = vector.shape_cast %29 : vector<16x48xf32> to vector<1x16x48xf32>
    tpu.vector_store %arg15[%c0_15, %c0_16, %c0_17], %32 {strides = array<i32>} : memref<8x16x48xf32, #tpu.memory_space<vmem>>, vector<1x16x48xf32>,
    %33 = vector.extract_strided_slice %28 {offsets = [0, 48], sizes = [16, 48], strides = [1, 1]} : vector<16x384xf32> to vector<16x48xf32>
    %c1 = arith.constant 1 : index
    %c0_18 = arith.constant 0 : index
    %c0_19 = arith.constant 0 : index
    %34 = vector.load %arg15[%c1, %c0_18, %c0_19] : memref<8x16x48xf32, #tpu.memory_space<vmem>>, vector<1x16x48xf32>
    %35 = vector.shape_cast %34 : vector<1x16x48xf32> to vector<16x48xf32>
    %36 = vector.shape_cast %33 : vector<16x48xf32> to vector<1x16x48xf32>
    tpu.vector_store %arg15[%c1, %c0_18, %c0_19], %36 {strides = array<i32>} : memref<8x16x48xf32, #tpu.memory_space<vmem>>, vector<1x16x48xf32>,
    %37 = vector.extract_strided_slice %28 {offsets = [0, 96], sizes = [16, 48], strides = [1, 1]} : vector<16x384xf32> to vector<16x48xf32>
    %c2 = arith.constant 2 : index
    %c0_20 = arith.constant 0 : index
    %c0_21 = arith.constant 0 : index
    %38 = vector.load %arg15[%c2, %c0_20, %c0_21] : memref<8x16x48xf32, #tpu.memory_space<vmem>>, vector<1x16x48xf32>
    %39 = vector.shape_cast %38 : vector<1x16x48xf32> to vector<16x48xf32>
    %40 = vector.shape_cast %37 : vector<16x48xf32> to vector<1x16x48xf32>
    tpu.vector_store %arg15[%c2, %c0_20, %c0_21], %40 {strides = array<i32>} : memref<8x16x48xf32, #tpu.memory_space<vmem>>, vector<1x16x48xf32>,
    %41 = vector.extract_strided_slice %28 {offsets = [0, 144], sizes = [16, 48], strides = [1, 1]} : vector<16x384xf32> to vector<16x48xf32>
    %c3 = arith.constant 3 : index
    %c0_22 = arith.constant 0 : index
    %c0_23 = arith.constant 0 : index
    %42 = vector.load %arg15[%c3, %c0_22, %c0_23] : memref<8x16x48xf32, #tpu.memory_space<vmem>>, vector<1x16x48xf32>
    %43 = vector.shape_cast %42 : vector<1x16x48xf32> to vector<16x48xf32>
    %44 = vector.shape_cast %41 : vector<16x48xf32> to vector<1x16x48xf32>
    tpu.vector_store %arg15[%c3, %c0_22, %c0_23], %44 {strides = array<i32>} : memref<8x16x48xf32, #tpu.memory_space<vmem>>, vector<1x16x48xf32>,
    %45 = vector.extract_strided_slice %28 {offsets = [0, 192], sizes = [16, 48], strides = [1, 1]} : vector<16x384xf32> to vector<16x48xf32>
    %c4 = arith.constant 4 : index
    %c0_24 = arith.constant 0 : index
    %c0_25 = arith.constant 0 : index
    %46 = vector.load %arg15[%c4, %c0_24, %c0_25] : memref<8x16x48xf32, #tpu.memory_space<vmem>>, vector<1x16x48xf32>
    %47 = vector.shape_cast %46 : vector<1x16x48xf32> to vector<16x48xf32>
    %48 = vector.shape_cast %45 : vector<16x48xf32> to vector<1x16x48xf32>
    tpu.vector_store %arg15[%c4, %c0_24, %c0_25], %48 {strides = array<i32>} : memref<8x16x48xf32, #tpu.memory_space<vmem>>, vector<1x16x48xf32>,
    %49 = vector.extract_strided_slice %28 {offsets = [0, 240], sizes = [16, 48], strides = [1, 1]} : vector<16x384xf32> to vector<16x48xf32>
    %c5 = arith.constant 5 : index
    %c0_26 = arith.constant 0 : index
    %c0_27 = arith.constant 0 : index
    %50 = vector.load %arg15[%c5, %c0_26, %c0_27] : memref<8x16x48xf32, #tpu.memory_space<vmem>>, vector<1x16x48xf32>
    %51 = vector.shape_cast %50 : vector<1x16x48xf32> to vector<16x48xf32>
    %52 = vector.shape_cast %49 : vector<16x48xf32> to vector<1x16x48xf32>
    tpu.vector_store %arg15[%c5, %c0_26, %c0_27], %52 {strides = array<i32>} : memref<8x16x48xf32, #tpu.memory_space<vmem>>, vector<1x16x48xf32>,
    %53 = vector.extract_strided_slice %28 {offsets = [0, 288], sizes = [16, 48], strides = [1, 1]} : vector<16x384xf32> to vector<16x48xf32>
    %c6 = arith.constant 6 : index
    %c0_28 = arith.constant 0 : index
    %c0_29 = arith.constant 0 : index
    %54 = vector.load %arg15[%c6, %c0_28, %c0_29] : memref<8x16x48xf32, #tpu.memory_space<vmem>>, vector<1x16x48xf32>
    %55 = vector.shape_cast %54 : vector<1x16x48xf32> to vector<16x48xf32>
    %56 = vector.shape_cast %53 : vector<16x48xf32> to vector<1x16x48xf32>
    tpu.vector_store %arg15[%c6, %c0_28, %c0_29], %56 {strides = array<i32>} : memref<8x16x48xf32, #tpu.memory_space<vmem>>, vector<1x16x48xf32>,
    %57 = vector.extract_strided_slice %28 {offsets = [0, 336], sizes = [16, 48], strides = [1, 1]} : vector<16x384xf32> to vector<16x48xf32>
    %c7 = arith.constant 7 : index
    %c0_30 = arith.constant 0 : index
    %c0_31 = arith.constant 0 : index
    %58 = vector.load %arg15[%c7, %c0_30, %c0_31] : memref<8x16x48xf32, #tpu.memory_space<vmem>>, vector<1x16x48xf32>
    %59 = vector.shape_cast %58 : vector<1x16x48xf32> to vector<16x48xf32>
    %60 = vector.shape_cast %57 : vector<16x48xf32> to vector<1x16x48xf32>
    tpu.vector_store %arg15[%c7, %c0_30, %c0_31], %60 {strides = array<i32>} : memref<8x16x48xf32, #tpu.memory_space<vmem>>, vector<1x16x48xf32>,
    %c0_32 = arith.constant 0 : index
    %c0_33 = arith.constant 0 : index
    %c0_34 = arith.constant 0 : index
    %61 = vector.load %arg15[%c0_32, %c0_33, %c0_34] : memref<8x16x48xf32, #tpu.memory_space<vmem>>, vector<8x16x48xf32>
    %62 = vector.extract_strided_slice %61 {offsets = [0, 0, 0], sizes = [8, 16, 16], strides = [1, 1, 1]} : vector<8x16x48xf32> to vector<8x16x16xf32>
    %63 = vector.extract_strided_slice %61 {offsets = [0, 0, 16], sizes = [8, 16, 16], strides = [1, 1, 1]} : vector<8x16x48xf32> to vector<8x16x16xf32>
    %64 = vector.extract_strided_slice %61 {offsets = [0, 0, 32], sizes = [8, 16, 16], strides = [1, 1, 1]} : vector<8x16x48xf32> to vector<8x16x16xf32>
    %cst_35 = arith.constant dense<0.000000e+00> : vector<8x16x16xf32>
    %65 = tpu.matmul %62, %63, %cst_35 {dimension_numbers = #tpu.dot_dimension_numbers<[2], [2], [1], [1], [0, 0, 0, 1, 1, 1], [0], [0]>} : vector<8x16x16xf32>, vector<8x16x16xf32>, vector<8x16x16xf32> -> vector<8x16x16xf32>
    %cst_36 = arith.constant dense<0xFF800000> : vector<8x16xf32>
    %66 = vector.multi_reduction <maximumf>, %65, %cst_36 [2] : vector<8x16x16xf32> to vector<8x16xf32>
    %67 = vector.shape_cast %66 : vector<8x16xf32> to vector<8x16x1xf32>
    %68 = vector.broadcast %67 : vector<8x16x1xf32> to vector<8x16x16xf32>
    %69 = arith.subf %65, %68 : vector<8x16x16xf32>
    %70 = math.exp %69 : vector<8x16x16xf32>
    %cst_37 = arith.constant dense<0.000000e+00> : vector<8x16xf32>
    %71 = vector.multi_reduction <add>, %70, %cst_37 [2] : vector<8x16x16xf32> to vector<8x16xf32>
    %72 = vector.shape_cast %71 : vector<8x16xf32> to vector<8x16x1xf32>
    %cst_38 = arith.constant dense<0.000000e+00> : vector<8x16x16xf32>
    %73 = tpu.matmul %70, %64, %cst_38 {dimension_numbers = #tpu.dot_dimension_numbers<[2], [1], [1], [2], [0, 0, 0, 1, 1, 2], [0], [0]>} : vector<8x16x16xf32>, vector<8x16x16xf32>, vector<8x16x16xf32> -> vector<8x16x16xf32>
    %74 = tpu.reciprocal %72 : vector<8x16x1xf32> -> vector<8x16x1xf32>
    %75 = vector.broadcast %74 : vector<8x16x1xf32> to vector<8x16x16xf32>
    %76 = arith.mulf %73, %75 : vector<8x16x16xf32>
    %77 = vector.extract_strided_slice %76 {offsets = [0, 0, 0], sizes = [1, 16, 16], strides = [1, 1, 1]} : vector<8x16x16xf32> to vector<1x16x16xf32>
    %78 = vector.shape_cast %77 : vector<1x16x16xf32> to vector<16x16xf32>
    %c0_39 = arith.constant 0 : index
    %c0_40 = arith.constant 0 : index
    %79 = vector.load %arg16[%c0_39, %c0_40] : memref<16x128xf32, #tpu.memory_space<vmem>>, vector<16x16xf32>
    tpu.vector_store %arg16[%c0_39, %c0_40], %78 {strides = array<i32>} : memref<16x128xf32, #tpu.memory_space<vmem>>, vector<16x16xf32>,
    %80 = vector.extract_strided_slice %76 {offsets = [1, 0, 0], sizes = [1, 16, 16], strides = [1, 1, 1]} : vector<8x16x16xf32> to vector<1x16x16xf32>
    %81 = vector.shape_cast %80 : vector<1x16x16xf32> to vector<16x16xf32>
    %c0_41 = arith.constant 0 : index
    %c16 = arith.constant 16 : index
    %82 = vector.load %arg16[%c0_41, %c16] : memref<16x128xf32, #tpu.memory_space<vmem>>, vector<16x16xf32>
    tpu.vector_store %arg16[%c0_41, %c16], %81 {strides = array<i32>} : memref<16x128xf32, #tpu.memory_space<vmem>>, vector<16x16xf32>,
    %83 = vector.extract_strided_slice %76 {offsets = [2, 0, 0], sizes = [1, 16, 16], strides = [1, 1, 1]} : vector<8x16x16xf32> to vector<1x16x16xf32>
    %84 = vector.shape_cast %83 : vector<1x16x16xf32> to vector<16x16xf32>
    %c0_42 = arith.constant 0 : index
    %c32 = arith.constant 32 : index
    %85 = vector.load %arg16[%c0_42, %c32] : memref<16x128xf32, #tpu.memory_space<vmem>>, vector<16x16xf32>
    tpu.vector_store %arg16[%c0_42, %c32], %84 {strides = array<i32>} : memref<16x128xf32, #tpu.memory_space<vmem>>, vector<16x16xf32>,
    %86 = vector.extract_strided_slice %76 {offsets = [3, 0, 0], sizes = [1, 16, 16], strides = [1, 1, 1]} : vector<8x16x16xf32> to vector<1x16x16xf32>
    %87 = vector.shape_cast %86 : vector<1x16x16xf32> to vector<16x16xf32>
    %c0_43 = arith.constant 0 : index
    %c48 = arith.constant 48 : index
    %88 = vector.load %arg16[%c0_43, %c48] : memref<16x128xf32, #tpu.memory_space<vmem>>, vector<16x16xf32>
    tpu.vector_store %arg16[%c0_43, %c48], %87 {strides = array<i32>} : memref<16x128xf32, #tpu.memory_space<vmem>>, vector<16x16xf32>,
    %89 = vector.extract_strided_slice %76 {offsets = [4, 0, 0], sizes = [1, 16, 16], strides = [1, 1, 1]} : vector<8x16x16xf32> to vector<1x16x16xf32>
    %90 = vector.shape_cast %89 : vector<1x16x16xf32> to vector<16x16xf32>
    %c0_44 = arith.constant 0 : index
    %c64 = arith.constant 64 : index
    %91 = vector.load %arg16[%c0_44, %c64] : memref<16x128xf32, #tpu.memory_space<vmem>>, vector<16x16xf32>
    tpu.vector_store %arg16[%c0_44, %c64], %90 {strides = array<i32>} : memref<16x128xf32, #tpu.memory_space<vmem>>, vector<16x16xf32>,
    %92 = vector.extract_strided_slice %76 {offsets = [5, 0, 0], sizes = [1, 16, 16], strides = [1, 1, 1]} : vector<8x16x16xf32> to vector<1x16x16xf32>
    %93 = vector.shape_cast %92 : vector<1x16x16xf32> to vector<16x16xf32>
    %c0_45 = arith.constant 0 : index
    %c80 = arith.constant 80 : index
    %94 = vector.load %arg16[%c0_45, %c80] : memref<16x128xf32, #tpu.memory_space<vmem>>, vector<16x16xf32>
    tpu.vector_store %arg16[%c0_45, %c80], %93 {strides = array<i32>} : memref<16x128xf32, #tpu.memory_space<vmem>>, vector<16x16xf32>,
    %95 = vector.extract_strided_slice %76 {offsets = [6, 0, 0], sizes = [1, 16, 16], strides = [1, 1, 1]} : vector<8x16x16xf32> to vector<1x16x16xf32>
    %96 = vector.shape_cast %95 : vector<1x16x16xf32> to vector<16x16xf32>
    %c0_46 = arith.constant 0 : index
    %c96 = arith.constant 96 : index
    %97 = vector.load %arg16[%c0_46, %c96] : memref<16x128xf32, #tpu.memory_space<vmem>>, vector<16x16xf32>
    tpu.vector_store %arg16[%c0_46, %c96], %96 {strides = array<i32>} : memref<16x128xf32, #tpu.memory_space<vmem>>, vector<16x16xf32>,
    %98 = vector.extract_strided_slice %76 {offsets = [7, 0, 0], sizes = [1, 16, 16], strides = [1, 1, 1]} : vector<8x16x16xf32> to vector<1x16x16xf32>
    %99 = vector.shape_cast %98 : vector<1x16x16xf32> to vector<16x16xf32>
    %c0_47 = arith.constant 0 : index
    %c112 = arith.constant 112 : index
    %100 = vector.load %arg16[%c0_47, %c112] : memref<16x128xf32, #tpu.memory_space<vmem>>, vector<16x16xf32>
    tpu.vector_store %arg16[%c0_47, %c112], %99 {strides = array<i32>} : memref<16x128xf32, #tpu.memory_space<vmem>>, vector<16x16xf32>,
    %c0_48 = arith.constant 0 : index
    %c0_49 = arith.constant 0 : index
    %101 = vector.load %arg16[%c0_48, %c0_49] : memref<16x128xf32, #tpu.memory_space<vmem>>, vector<16x128xf32>
    %c0_50 = arith.constant 0 : index
    %c0_51 = arith.constant 0 : index
    %102 = vector.load %arg6[%c0_50, %c0_51] : memref<128x128xf32, #tpu.memory_space<vmem>>, vector<128x128xf32>
    %cst_52 = arith.constant dense<0.000000e+00> : vector<16x128xf32>
    %103 = tpu.matmul %101, %102, %cst_52 {dimension_numbers = #tpu.dot_dimension_numbers<[1], [0], [0], [1], [0, 0, 1, 1], [], []>} : vector<16x128xf32>, vector<128x128xf32>, vector<16x128xf32> -> vector<16x128xf32>
    %c0_53 = arith.constant 0 : index
    %c0_54 = arith.constant 0 : index
    %104 = vector.load %arg7[%c0_53, %c0_54] : memref<1x128xf32, #tpu.memory_space<vmem>>, vector<1x128xf32>
    %105 = vector.broadcast %104 : vector<1x128xf32> to vector<16x128xf32>
    %106 = arith.addf %103, %105 : vector<16x128xf32>
    %107 = arith.addf %1, %106 : vector<16x128xf32>
    %c0_55 = arith.constant 0 : index
    %c0_56 = arith.constant 0 : index
    %108 = vector.load %arg8[%c0_55, %c0_56] : memref<1x128xf32, #tpu.memory_space<vmem>>, vector<1x128xf32>
    %c0_57 = arith.constant 0 : index
    %c0_58 = arith.constant 0 : index
    %109 = vector.load %arg9[%c0_57, %c0_58] : memref<1x128xf32, #tpu.memory_space<vmem>>, vector<1x128xf32>
    %cst_59 = arith.constant dense<0.000000e+00> : vector<16xf32>
    %110 = vector.multi_reduction <add>, %107, %cst_59 [1] : vector<16x128xf32> to vector<16xf32>
    %111 = vector.shape_cast %110 : vector<16xf32> to vector<16x1xf32>
    %cst_60 = arith.constant 1.280000e+02 : f32
    %112 = vector.broadcast %cst_60 : f32 to vector<16x1xf32>
    %113 = arith.divf %111, %112 : vector<16x1xf32>
    %114 = vector.broadcast %113 : vector<16x1xf32> to vector<16x128xf32>
    %115 = arith.subf %107, %114 : vector<16x128xf32>
    %116 = arith.mulf %115, %115 : vector<16x128xf32>
    %cst_61 = arith.constant dense<0.000000e+00> : vector<16xf32>
    %117 = vector.multi_reduction <add>, %116, %cst_61 [1] : vector<16x128xf32> to vector<16xf32>
    %118 = vector.shape_cast %117 : vector<16xf32> to vector<16x1xf32>
    %cst_62 = arith.constant 1.280000e+02 : f32
    %119 = vector.broadcast %cst_62 : f32 to vector<16x1xf32>
    %120 = arith.divf %118, %119 : vector<16x1xf32>
    %cst_63 = arith.constant 9.99999974E-6 : f32
    %121 = vector.broadcast %cst_63 : f32 to vector<16x1xf32>
    %122 = arith.addf %120, %121 : vector<16x1xf32>
    %123 = math.rsqrt %122 : vector<16x1xf32>
    %124 = vector.broadcast %123 : vector<16x1xf32> to vector<16x128xf32>
    %125 = arith.mulf %115, %124 : vector<16x128xf32>
    %126 = vector.broadcast %108 : vector<1x128xf32> to vector<16x128xf32>
    %127 = arith.mulf %125, %126 : vector<16x128xf32>
    %128 = vector.broadcast %109 : vector<1x128xf32> to vector<16x128xf32>
    %129 = arith.addf %127, %128 : vector<16x128xf32>
    %c0_64 = arith.constant 0 : index
    %c0_65 = arith.constant 0 : index
    %130 = vector.load %arg10[%c0_64, %c0_65] : memref<128x256xf32, #tpu.memory_space<vmem>>, vector<128x256xf32>
    %cst_66 = arith.constant dense<0.000000e+00> : vector<16x256xf32>
    %131 = tpu.matmul %129, %130, %cst_66 {dimension_numbers = #tpu.dot_dimension_numbers<[1], [0], [0], [1], [0, 0, 1, 1], [], []>} : vector<16x128xf32>, vector<128x256xf32>, vector<16x256xf32> -> vector<16x256xf32>
    %c0_67 = arith.constant 0 : index
    %c0_68 = arith.constant 0 : index
    %132 = vector.load %arg11[%c0_67, %c0_68] : memref<1x256xf32, #tpu.memory_space<vmem>>, vector<1x256xf32>
    %133 = vector.broadcast %132 : vector<1x256xf32> to vector<16x256xf32>
    %134 = arith.addf %131, %133 : vector<16x256xf32>
    %cst_69 = arith.constant 5.000000e-01 : f32
    %135 = vector.broadcast %cst_69 : f32 to vector<16x256xf32>
    %136 = arith.mulf %135, %134 : vector<16x256xf32>
    %cst_70 = arith.constant 0.707106769 : f32
    %137 = vector.broadcast %cst_70 : f32 to vector<16x256xf32>
    %138 = arith.mulf %134, %137 : vector<16x256xf32>
    %139 = math.erf %138 : vector<16x256xf32>
    %cst_71 = arith.constant 1.000000e+00 : f32
    %140 = vector.broadcast %cst_71 : f32 to vector<16x256xf32>
    %141 = arith.addf %140, %139 : vector<16x256xf32>
    %142 = arith.mulf %136, %141 : vector<16x256xf32>
    %c0_72 = arith.constant 0 : index
    %c0_73 = arith.constant 0 : index
    %143 = vector.load %arg12[%c0_72, %c0_73] : memref<256x128xf32, #tpu.memory_space<vmem>>, vector<256x128xf32>
    %cst_74 = arith.constant dense<0.000000e+00> : vector<16x128xf32>
    %144 = tpu.matmul %142, %143, %cst_74 {dimension_numbers = #tpu.dot_dimension_numbers<[1], [0], [0], [1], [0, 0, 1, 1], [], []>} : vector<16x256xf32>, vector<256x128xf32>, vector<16x128xf32> -> vector<16x128xf32>
    %c0_75 = arith.constant 0 : index
    %c0_76 = arith.constant 0 : index
    %145 = vector.load %arg13[%c0_75, %c0_76] : memref<1x128xf32, #tpu.memory_space<vmem>>, vector<1x128xf32>
    %146 = vector.broadcast %145 : vector<1x128xf32> to vector<16x128xf32>
    %147 = arith.addf %144, %146 : vector<16x128xf32>
    %c0_77 = arith.constant 0 : index
    %c0_78 = arith.constant 0 : index
    %148 = vector.load %arg10[%c0_77, %c0_78] : memref<128x256xf32, #tpu.memory_space<vmem>>, vector<128x256xf32>
    %cst_79 = arith.constant dense<0.000000e+00> : vector<16x256xf32>
    %149 = tpu.matmul %147, %148, %cst_79 {dimension_numbers = #tpu.dot_dimension_numbers<[1], [0], [0], [1], [0, 0, 1, 1], [], []>} : vector<16x128xf32>, vector<128x256xf32>, vector<16x256xf32> -> vector<16x256xf32>
    %c0_80 = arith.constant 0 : index
    %c0_81 = arith.constant 0 : index
    %150 = vector.load %arg11[%c0_80, %c0_81] : memref<1x256xf32, #tpu.memory_space<vmem>>, vector<1x256xf32>
    %151 = vector.broadcast %150 : vector<1x256xf32> to vector<16x256xf32>
    %152 = arith.addf %149, %151 : vector<16x256xf32>
    %cst_82 = arith.constant 5.000000e-01 : f32
    %153 = vector.broadcast %cst_82 : f32 to vector<16x256xf32>
    %154 = arith.mulf %153, %152 : vector<16x256xf32>
    %cst_83 = arith.constant 0.707106769 : f32
    %155 = vector.broadcast %cst_83 : f32 to vector<16x256xf32>
    %156 = arith.mulf %152, %155 : vector<16x256xf32>
    %157 = math.erf %156 : vector<16x256xf32>
    %cst_84 = arith.constant 1.000000e+00 : f32
    %158 = vector.broadcast %cst_84 : f32 to vector<16x256xf32>
    %159 = arith.addf %158, %157 : vector<16x256xf32>
    %160 = arith.mulf %154, %159 : vector<16x256xf32>
    %c0_85 = arith.constant 0 : index
    %c0_86 = arith.constant 0 : index
    %161 = vector.load %arg12[%c0_85, %c0_86] : memref<256x128xf32, #tpu.memory_space<vmem>>, vector<256x128xf32>
    %cst_87 = arith.constant dense<0.000000e+00> : vector<16x128xf32>
    %162 = tpu.matmul %160, %161, %cst_87 {dimension_numbers = #tpu.dot_dimension_numbers<[1], [0], [0], [1], [0, 0, 1, 1], [], []>} : vector<16x256xf32>, vector<256x128xf32>, vector<16x128xf32> -> vector<16x128xf32>
    %c0_88 = arith.constant 0 : index
    %c0_89 = arith.constant 0 : index
    %163 = vector.load %arg13[%c0_88, %c0_89] : memref<1x128xf32, #tpu.memory_space<vmem>>, vector<1x128xf32>
    %164 = vector.broadcast %163 : vector<1x128xf32> to vector<16x128xf32>
    %165 = arith.addf %162, %164 : vector<16x128xf32>
    %166 = arith.addf %107, %165 : vector<16x128xf32>
    %c0_90 = arith.constant 0 : index
    %c0_91 = arith.constant 0 : index
    %c0_92 = arith.constant 0 : index
    %167 = vector.load %arg14[%c0_90, %c0_91, %c0_92] : memref<1x16x128xf32, #tpu.memory_space<vmem>>, vector<1x16x128xf32>
    %168 = vector.shape_cast %167 : vector<1x16x128xf32> to vector<16x128xf32>
    %169 = vector.shape_cast %166 : vector<16x128xf32> to vector<1x16x128xf32>
    tpu.vector_store %arg14[%c0_90, %c0_91, %c0_92], %169 {strides = array<i32>} : memref<1x16x128xf32, #tpu.memory_space<vmem>>, vector<1x16x128xf32>,
    return
  }
  func.func @transform_0(%arg0: i32) -> (i32, i32, i32) {
    %c0_i32 = arith.constant 0 : i32
    %c0_i32_0 = arith.constant 0 : i32
    %c0_i32_1 = arith.constant 0 : i32
    return %arg0, %c0_i32, %c0_i32_0 : i32, i32, i32
  }
  func.func @transform_1(%arg0: i32) -> (i32, i32) {
    %c0_i32 = arith.constant 0 : i32
    %c0_i32_0 = arith.constant 0 : i32
    %c0_i32_1 = arith.constant 0 : i32
    return %c0_i32, %c0_i32_0 : i32, i32
  }
  func.func @transform_2(%arg0: i32) -> (i32, i32) {
    %c0_i32 = arith.constant 0 : i32
    %c0_i32_0 = arith.constant 0 : i32
    %c0_i32_1 = arith.constant 0 : i32
    return %c0_i32, %c0_i32_0 : i32, i32
  }
  func.func @transform_3(%arg0: i32) -> (i32, i32) {
    %c0_i32 = arith.constant 0 : i32
    %c0_i32_0 = arith.constant 0 : i32
    %c0_i32_1 = arith.constant 0 : i32
    return %c0_i32, %c0_i32_0 : i32, i32
  }
  func.func @transform_4(%arg0: i32) -> (i32, i32) {
    %c0_i32 = arith.constant 0 : i32
    %c0_i32_0 = arith.constant 0 : i32
    %c0_i32_1 = arith.constant 0 : i32
    return %c0_i32, %c0_i32_0 : i32, i32
  }
  func.func @transform_5(%arg0: i32) -> (i32, i32) {
    %c0_i32 = arith.constant 0 : i32
    %c0_i32_0 = arith.constant 0 : i32
    %c0_i32_1 = arith.constant 0 : i32
    return %c0_i32, %c0_i32_0 : i32, i32
  }
  func.func @transform_6(%arg0: i32) -> (i32, i32) {
    %c0_i32 = arith.constant 0 : i32
    %c0_i32_0 = arith.constant 0 : i32
    %c0_i32_1 = arith.constant 0 : i32
    return %c0_i32, %c0_i32_0 : i32, i32
  }
  func.func @transform_7(%arg0: i32) -> (i32, i32) {
    %c0_i32 = arith.constant 0 : i32
    %c0_i32_0 = arith.constant 0 : i32
    %c0_i32_1 = arith.constant 0 : i32
    return %c0_i32, %c0_i32_0 : i32, i32
  }
  func.func @transform_8(%arg0: i32) -> (i32, i32) {
    %c0_i32 = arith.constant 0 : i32
    %c0_i32_0 = arith.constant 0 : i32
    %c0_i32_1 = arith.constant 0 : i32
    return %c0_i32, %c0_i32_0 : i32, i32
  }
  func.func @transform_9(%arg0: i32) -> (i32, i32) {
    %c0_i32 = arith.constant 0 : i32
    %c0_i32_0 = arith.constant 0 : i32
    %c0_i32_1 = arith.constant 0 : i32
    return %c0_i32, %c0_i32_0 : i32, i32
  }
  func.func @transform_10(%arg0: i32) -> (i32, i32) {
    %c0_i32 = arith.constant 0 : i32
    %c0_i32_0 = arith.constant 0 : i32
    %c0_i32_1 = arith.constant 0 : i32
    return %c0_i32, %c0_i32_0 : i32, i32
  }
  func.func @transform_11(%arg0: i32) -> (i32, i32) {
    %c0_i32 = arith.constant 0 : i32
    %c0_i32_0 = arith.constant 0 : i32
    %c0_i32_1 = arith.constant 0 : i32
    return %c0_i32, %c0_i32_0 : i32, i32
  }
  func.func @transform_12(%arg0: i32) -> (i32, i32) {
    %c0_i32 = arith.constant 0 : i32
    %c0_i32_0 = arith.constant 0 : i32
    %c0_i32_1 = arith.constant 0 : i32
    return %c0_i32, %c0_i32_0 : i32, i32
  }
  func.func @transform_13(%arg0: i32) -> (i32, i32, i32) {
    %c0_i32 = arith.constant 0 : i32
    %c0_i32_0 = arith.constant 0 : i32
    %c0_i32_1 = arith.constant 0 : i32
    return %arg0, %c0_i32, %c0_i32_0 : i32, i32, i32
  }
}

module attributes {stable_mosaic.version = 11 : i64} {
  func.func @encoder_block_kernel(%arg0: i32, %arg1: memref<1x16x128xf32, #tpu.memory_space<vmem>>, %arg2: memref<1x128xf32, #tpu.memory_space<vmem>>, %arg3: memref<1x128xf32, #tpu.memory_space<vmem>>, %arg4: memref<128x384xf32, #tpu.memory_space<vmem>>, %arg5: memref<1x384xf32, #tpu.memory_space<vmem>>, %arg6: memref<128x128xf32, #tpu.memory_space<vmem>>, %arg7: memref<1x128xf32, #tpu.memory_space<vmem>>, %arg8: memref<1x128xf32, #tpu.memory_space<vmem>>, %arg9: memref<1x128xf32, #tpu.memory_space<vmem>>, %arg10: memref<128x256xf32, #tpu.memory_space<vmem>>, %arg11: memref<1x256xf32, #tpu.memory_space<vmem>>, %arg12: memref<256x128xf32, #tpu.memory_space<vmem>>, %arg13: memref<1x128xf32, #tpu.memory_space<vmem>>, %arg14: memref<1x16x128xf32, #tpu.memory_space<vmem>>, %arg15: memref<8x16x48xf32, #tpu.memory_space<vmem>>, %arg16: memref<16x128xf32, #tpu.memory_space<vmem>>) attributes {dimension_semantics = [#tpu.dimension_semantics<parallel>], iteration_bounds = array<i64: 2>, scalar_prefetch = 0 : i64, scratch_operands = 2 : i64, tpu.core_type = #tpu.core_type<tc>, window_params = [{transform_indices = @transform_0, window_bounds = array<i64: 1, 16, 128>}, {pipeline_mode = #tpu.pipeline_mode<synchronous>, transform_indices = @transform_1, window_bounds = array<i64: 1, 128>}, {pipeline_mode = #tpu.pipeline_mode<synchronous>, transform_indices = @transform_2, window_bounds = array<i64: 1, 128>}, {pipeline_mode = #tpu.pipeline_mode<synchronous>, transform_indices = @transform_3, window_bounds = array<i64: 128, 384>}, {pipeline_mode = #tpu.pipeline_mode<synchronous>, transform_indices = @transform_4, window_bounds = array<i64: 1, 384>}, {pipeline_mode = #tpu.pipeline_mode<synchronous>, transform_indices = @transform_5, window_bounds = array<i64: 128, 128>}, {pipeline_mode = #tpu.pipeline_mode<synchronous>, transform_indices = @transform_6, window_bounds = array<i64: 1, 128>}, {pipeline_mode = #tpu.pipeline_mode<synchronous>, transform_indices = @transform_7, window_bounds = array<i64: 1, 128>}, {pipeline_mode = #tpu.pipeline_mode<synchronous>, transform_indices = @transform_8, window_bounds = array<i64: 1, 128>}, {pipeline_mode = #tpu.pipeline_mode<synchronous>, transform_indices = @transform_9, window_bounds = array<i64: 128, 256>}, {pipeline_mode = #tpu.pipeline_mode<synchronous>, transform_indices = @transform_10, window_bounds = array<i64: 1, 256>}, {pipeline_mode = #tpu.pipeline_mode<synchronous>, transform_indices = @transform_11, window_bounds = array<i64: 256, 128>}, {pipeline_mode = #tpu.pipeline_mode<synchronous>, transform_indices = @transform_12, window_bounds = array<i64: 1, 128>}, {transform_indices = @transform_13, window_bounds = array<i64: 1, 16, 128>}]} {
    %c0 = arith.constant 0 : index
    %c0_0 = arith.constant 0 : index
    %c0_1 = arith.constant 0 : index
    %0 = vector.load %arg1[%c0, %c0_0, %c0_1] : memref<1x16x128xf32, #tpu.memory_space<vmem>>, vector<1x16x128xf32>
    %1 = vector.shape_cast %0 : vector<1x16x128xf32> to vector<16x128xf32>
    %c0_2 = arith.constant 0 : index
    %c0_3 = arith.constant 0 : index
    %2 = vector.load %arg2[%c0_2, %c0_3] : memref<1x128xf32, #tpu.memory_space<vmem>>, vector<1x128xf32>
    %c0_4 = arith.constant 0 : index
    %c0_5 = arith.constant 0 : index
    %3 = vector.load %arg3[%c0_4, %c0_5] : memref<1x128xf32, #tpu.memory_space<vmem>>, vector<1x128xf32>
    %cst = arith.constant dense<0.000000e+00> : vector<16xf32>
    %4 = vector.multi_reduction <add>, %1, %cst [1] : vector<16x128xf32> to vector<16xf32>
    %5 = vector.shape_cast %4 : vector<16xf32> to vector<16x1xf32>
    %cst_6 = arith.constant 1.280000e+02 : f32
    %6 = vector.broadcast %cst_6 : f32 to vector<16x1xf32>
    %7 = arith.divf %5, %6 : vector<16x1xf32>
    %8 = vector.broadcast %7 : vector<16x1xf32> to vector<16x128xf32>
    %9 = arith.subf %1, %8 : vector<16x128xf32>
    %10 = arith.mulf %9, %9 : vector<16x128xf32>
    %cst_7 = arith.constant dense<0.000000e+00> : vector<16xf32>
    %11 = vector.multi_reduction <add>, %10, %cst_7 [1] : vector<16x128xf32> to vector<16xf32>
    %12 = vector.shape_cast %11 : vector<16xf32> to vector<16x1xf32>
    %cst_8 = arith.constant 1.280000e+02 : f32
    %13 = vector.broadcast %cst_8 : f32 to vector<16x1xf32>
    %14 = arith.divf %12, %13 : vector<16x1xf32>
    %cst_9 = arith.constant 9.99999974E-6 : f32
    %15 = vector.broadcast %cst_9 : f32 to vector<16x1xf32>
    %16 = arith.addf %14, %15 : vector<16x1xf32>
    %17 = math.rsqrt %16 : vector<16x1xf32>
    %18 = vector.broadcast %17 : vector<16x1xf32> to vector<16x128xf32>
    %19 = arith.mulf %9, %18 : vector<16x128xf32>
    %20 = vector.broadcast %2 : vector<1x128xf32> to vector<16x128xf32>
    %21 = arith.mulf %19, %20 : vector<16x128xf32>
    %22 = vector.broadcast %3 : vector<1x128xf32> to vector<16x128xf32>
    %23 = arith.addf %21, %22 : vector<16x128xf32>
    %c0_10 = arith.constant 0 : index
    %c0_11 = arith.constant 0 : index
    %24 = vector.load %arg4[%c0_10, %c0_11] : memref<128x384xf32, #tpu.memory_space<vmem>>, vector<128x384xf32>
    %cst_12 = arith.constant dense<0.000000e+00> : vector<16x384xf32>
    %25 = tpu.matmul %23, %24, %cst_12 {dimension_numbers = #tpu.dot_dimension_numbers<[1], [0], [0], [1], [0, 0, 1, 1], [], []>} : vector<16x128xf32>, vector<128x384xf32>, vector<16x384xf32> -> vector<16x384xf32>
    %c0_13 = arith.constant 0 : index
    %c0_14 = arith.constant 0 : index
    %26 = vector.load %arg5[%c0_13, %c0_14] : memref<1x384xf32, #tpu.memory_space<vmem>>, vector<1x384xf32>
    %27 = vector.broadcast %26 : vector<1x384xf32> to vector<16x384xf32>
    %28 = arith.addf %25, %27 : vector<16x384xf32>
    %29 = vector.extract_strided_slice %28 {offsets = [0, 0], sizes = [16, 48], strides = [1, 1]} : vector<16x384xf32> to vector<16x48xf32>
    %c0_15 = arith.constant 0 : index
    %c0_16 = arith.constant 0 : index
    %c0_17 = arith.constant 0 : index
    %30 = vector.load %arg15[%c0_15, %c0_16, %c0_17] : memref<8x16x48xf32, #tpu.memory_space<vmem>>, vector<1x16x48xf32>
    %31 = vector.shape_cast %30 : vector<1x16x48xf32> to vector<16x48xf32>
    %32 = vector.shape_cast %29 : vector<16x48xf32> to vector<1x16x48xf32>
    tpu.vector_store %arg15[%c0_15, %c0_16, %c0_17], %32 {strides = array<i32>} : memref<8x16x48xf32, #tpu.memory_space<vmem>>, vector<1x16x48xf32>,
    %33 = vector.extract_strided_slice %28 {offsets = [0, 48], sizes = [16, 48], strides = [1, 1]} : vector<16x384xf32> to vector<16x48xf32>
    %c1 = arith.constant 1 : index
    %c0_18 = arith.constant 0 : index
    %c0_19 = arith.constant 0 : index
    %34 = vector.load %arg15[%c1, %c0_18, %c0_19] : memref<8x16x48xf32, #tpu.memory_space<vmem>>, vector<1x16x48xf32>
    %35 = vector.shape_cast %34 : vector<1x16x48xf32> to vector<16x48xf32>
    %36 = vector.shape_cast %33 : vector<16x48xf32> to vector<1x16x48xf32>
    tpu.vector_store %arg15[%c1, %c0_18, %c0_19], %36 {strides = array<i32>} : memref<8x16x48xf32, #tpu.memory_space<vmem>>, vector<1x16x48xf32>,
    %37 = vector.extract_strided_slice %28 {offsets = [0, 96], sizes = [16, 48], strides = [1, 1]} : vector<16x384xf32> to vector<16x48xf32>
    %c2 = arith.constant 2 : index
    %c0_20 = arith.constant 0 : index
    %c0_21 = arith.constant 0 : index
    %38 = vector.load %arg15[%c2, %c0_20, %c0_21] : memref<8x16x48xf32, #tpu.memory_space<vmem>>, vector<1x16x48xf32>
    %39 = vector.shape_cast %38 : vector<1x16x48xf32> to vector<16x48xf32>
    %40 = vector.shape_cast %37 : vector<16x48xf32> to vector<1x16x48xf32>
    tpu.vector_store %arg15[%c2, %c0_20, %c0_21], %40 {strides = array<i32>} : memref<8x16x48xf32, #tpu.memory_space<vmem>>, vector<1x16x48xf32>,
    %41 = vector.extract_strided_slice %28 {offsets = [0, 144], sizes = [16, 48], strides = [1, 1]} : vector<16x384xf32> to vector<16x48xf32>
    %c3 = arith.constant 3 : index
    %c0_22 = arith.constant 0 : index
    %c0_23 = arith.constant 0 : index
    %42 = vector.load %arg15[%c3, %c0_22, %c0_23] : memref<8x16x48xf32, #tpu.memory_space<vmem>>, vector<1x16x48xf32>
    %43 = vector.shape_cast %42 : vector<1x16x48xf32> to vector<16x48xf32>
    %44 = vector.shape_cast %41 : vector<16x48xf32> to vector<1x16x48xf32>
    tpu.vector_store %arg15[%c3, %c0_22, %c0_23], %44 {strides = array<i32>} : memref<8x16x48xf32, #tpu.memory_space<vmem>>, vector<1x16x48xf32>,
    %45 = vector.extract_strided_slice %28 {offsets = [0, 192], sizes = [16, 48], strides = [1, 1]} : vector<16x384xf32> to vector<16x48xf32>
    %c4 = arith.constant 4 : index
    %c0_24 = arith.constant 0 : index
    %c0_25 = arith.constant 0 : index
    %46 = vector.load %arg15[%c4, %c0_24, %c0_25] : memref<8x16x48xf32, #tpu.memory_space<vmem>>, vector<1x16x48xf32>
    %47 = vector.shape_cast %46 : vector<1x16x48xf32> to vector<16x48xf32>
    %48 = vector.shape_cast %45 : vector<16x48xf32> to vector<1x16x48xf32>
    tpu.vector_store %arg15[%c4, %c0_24, %c0_25], %48 {strides = array<i32>} : memref<8x16x48xf32, #tpu.memory_space<vmem>>, vector<1x16x48xf32>,
    %49 = vector.extract_strided_slice %28 {offsets = [0, 240], sizes = [16, 48], strides = [1, 1]} : vector<16x384xf32> to vector<16x48xf32>
    %c5 = arith.constant 5 : index
    %c0_26 = arith.constant 0 : index
    %c0_27 = arith.constant 0 : index
    %50 = vector.load %arg15[%c5, %c0_26, %c0_27] : memref<8x16x48xf32, #tpu.memory_space<vmem>>, vector<1x16x48xf32>
    %51 = vector.shape_cast %50 : vector<1x16x48xf32> to vector<16x48xf32>
    %52 = vector.shape_cast %49 : vector<16x48xf32> to vector<1x16x48xf32>
    tpu.vector_store %arg15[%c5, %c0_26, %c0_27], %52 {strides = array<i32>} : memref<8x16x48xf32, #tpu.memory_space<vmem>>, vector<1x16x48xf32>,
    %53 = vector.extract_strided_slice %28 {offsets = [0, 288], sizes = [16, 48], strides = [1, 1]} : vector<16x384xf32> to vector<16x48xf32>
    %c6 = arith.constant 6 : index
    %c0_28 = arith.constant 0 : index
    %c0_29 = arith.constant 0 : index
    %54 = vector.load %arg15[%c6, %c0_28, %c0_29] : memref<8x16x48xf32, #tpu.memory_space<vmem>>, vector<1x16x48xf32>
    %55 = vector.shape_cast %54 : vector<1x16x48xf32> to vector<16x48xf32>
    %56 = vector.shape_cast %53 : vector<16x48xf32> to vector<1x16x48xf32>
    tpu.vector_store %arg15[%c6, %c0_28, %c0_29], %56 {strides = array<i32>} : memref<8x16x48xf32, #tpu.memory_space<vmem>>, vector<1x16x48xf32>,
    %57 = vector.extract_strided_slice %28 {offsets = [0, 336], sizes = [16, 48], strides = [1, 1]} : vector<16x384xf32> to vector<16x48xf32>
    %c7 = arith.constant 7 : index
    %c0_30 = arith.constant 0 : index
    %c0_31 = arith.constant 0 : index
    %58 = vector.load %arg15[%c7, %c0_30, %c0_31] : memref<8x16x48xf32, #tpu.memory_space<vmem>>, vector<1x16x48xf32>
    %59 = vector.shape_cast %58 : vector<1x16x48xf32> to vector<16x48xf32>
    %60 = vector.shape_cast %57 : vector<16x48xf32> to vector<1x16x48xf32>
    tpu.vector_store %arg15[%c7, %c0_30, %c0_31], %60 {strides = array<i32>} : memref<8x16x48xf32, #tpu.memory_space<vmem>>, vector<1x16x48xf32>,
    %c0_32 = arith.constant 0 : index
    %c0_33 = arith.constant 0 : index
    %c0_34 = arith.constant 0 : index
    %61 = vector.load %arg15[%c0_32, %c0_33, %c0_34] : memref<8x16x48xf32, #tpu.memory_space<vmem>>, vector<8x16x48xf32>
    %62 = vector.extract_strided_slice %61 {offsets = [0, 0, 0], sizes = [8, 16, 16], strides = [1, 1, 1]} : vector<8x16x48xf32> to vector<8x16x16xf32>
    %63 = vector.extract_strided_slice %61 {offsets = [0, 0, 16], sizes = [8, 16, 16], strides = [1, 1, 1]} : vector<8x16x48xf32> to vector<8x16x16xf32>
    %64 = vector.extract_strided_slice %61 {offsets = [0, 0, 32], sizes = [8, 16, 16], strides = [1, 1, 1]} : vector<8x16x48xf32> to vector<8x16x16xf32>
    %cst_35 = arith.constant dense<0.000000e+00> : vector<8x16x16xf32>
    %65 = tpu.matmul %62, %63, %cst_35 {dimension_numbers = #tpu.dot_dimension_numbers<[2], [2], [1], [1], [0, 0, 0, 1, 1, 1], [0], [0]>} : vector<8x16x16xf32>, vector<8x16x16xf32>, vector<8x16x16xf32> -> vector<8x16x16xf32>
    %cst_36 = arith.constant dense<0xFF800000> : vector<8x16xf32>
    %66 = vector.multi_reduction <maximumf>, %65, %cst_36 [2] : vector<8x16x16xf32> to vector<8x16xf32>
    %67 = vector.shape_cast %66 : vector<8x16xf32> to vector<8x16x1xf32>
    %68 = vector.broadcast %67 : vector<8x16x1xf32> to vector<8x16x16xf32>
    %69 = arith.subf %65, %68 : vector<8x16x16xf32>
    %70 = math.exp %69 : vector<8x16x16xf32>
    %cst_37 = arith.constant dense<0.000000e+00> : vector<8x16xf32>
    %71 = vector.multi_reduction <add>, %70, %cst_37 [2] : vector<8x16x16xf32> to vector<8x16xf32>
    %72 = vector.shape_cast %71 : vector<8x16xf32> to vector<8x16x1xf32>
    %cst_38 = arith.constant dense<0.000000e+00> : vector<8x16x16xf32>
    %73 = tpu.matmul %70, %64, %cst_38 {dimension_numbers = #tpu.dot_dimension_numbers<[2], [1], [1], [2], [0, 0, 0, 1, 1, 2], [0], [0]>} : vector<8x16x16xf32>, vector<8x16x16xf32>, vector<8x16x16xf32> -> vector<8x16x16xf32>
    %74 = tpu.reciprocal %72 : vector<8x16x1xf32> -> vector<8x16x1xf32>
    %75 = vector.broadcast %74 : vector<8x16x1xf32> to vector<8x16x16xf32>
    %76 = arith.mulf %73, %75 : vector<8x16x16xf32>
    %77 = vector.extract_strided_slice %76 {offsets = [0, 0, 0], sizes = [1, 16, 16], strides = [1, 1, 1]} : vector<8x16x16xf32> to vector<1x16x16xf32>
    %78 = vector.shape_cast %77 : vector<1x16x16xf32> to vector<16x16xf32>
    %c0_39 = arith.constant 0 : index
    %c0_40 = arith.constant 0 : index
    %79 = vector.load %arg16[%c0_39, %c0_40] : memref<16x128xf32, #tpu.memory_space<vmem>>, vector<16x16xf32>
    tpu.vector_store %arg16[%c0_39, %c0_40], %78 {strides = array<i32>} : memref<16x128xf32, #tpu.memory_space<vmem>>, vector<16x16xf32>,
    %80 = vector.extract_strided_slice %76 {offsets = [1, 0, 0], sizes = [1, 16, 16], strides = [1, 1, 1]} : vector<8x16x16xf32> to vector<1x16x16xf32>
    %81 = vector.shape_cast %80 : vector<1x16x16xf32> to vector<16x16xf32>
    %c0_41 = arith.constant 0 : index
    %c16 = arith.constant 16 : index
    %82 = vector.load %arg16[%c0_41, %c16] : memref<16x128xf32, #tpu.memory_space<vmem>>, vector<16x16xf32>
    tpu.vector_store %arg16[%c0_41, %c16], %81 {strides = array<i32>} : memref<16x128xf32, #tpu.memory_space<vmem>>, vector<16x16xf32>,
    %83 = vector.extract_strided_slice %76 {offsets = [2, 0, 0], sizes = [1, 16, 16], strides = [1, 1, 1]} : vector<8x16x16xf32> to vector<1x16x16xf32>
    %84 = vector.shape_cast %83 : vector<1x16x16xf32> to vector<16x16xf32>
    %c0_42 = arith.constant 0 : index
    %c32 = arith.constant 32 : index
    %85 = vector.load %arg16[%c0_42, %c32] : memref<16x128xf32, #tpu.memory_space<vmem>>, vector<16x16xf32>
    tpu.vector_store %arg16[%c0_42, %c32], %84 {strides = array<i32>} : memref<16x128xf32, #tpu.memory_space<vmem>>, vector<16x16xf32>,
    %86 = vector.extract_strided_slice %76 {offsets = [3, 0, 0], sizes = [1, 16, 16], strides = [1, 1, 1]} : vector<8x16x16xf32> to vector<1x16x16xf32>
    %87 = vector.shape_cast %86 : vector<1x16x16xf32> to vector<16x16xf32>
    %c0_43 = arith.constant 0 : index
    %c48 = arith.constant 48 : index
    %88 = vector.load %arg16[%c0_43, %c48] : memref<16x128xf32, #tpu.memory_space<vmem>>, vector<16x16xf32>
    tpu.vector_store %arg16[%c0_43, %c48], %87 {strides = array<i32>} : memref<16x128xf32, #tpu.memory_space<vmem>>, vector<16x16xf32>,
    %89 = vector.extract_strided_slice %76 {offsets = [4, 0, 0], sizes = [1, 16, 16], strides = [1, 1, 1]} : vector<8x16x16xf32> to vector<1x16x16xf32>
    %90 = vector.shape_cast %89 : vector<1x16x16xf32> to vector<16x16xf32>
    %c0_44 = arith.constant 0 : index
    %c64 = arith.constant 64 : index
    %91 = vector.load %arg16[%c0_44, %c64] : memref<16x128xf32, #tpu.memory_space<vmem>>, vector<16x16xf32>
    tpu.vector_store %arg16[%c0_44, %c64], %90 {strides = array<i32>} : memref<16x128xf32, #tpu.memory_space<vmem>>, vector<16x16xf32>,
    %92 = vector.extract_strided_slice %76 {offsets = [5, 0, 0], sizes = [1, 16, 16], strides = [1, 1, 1]} : vector<8x16x16xf32> to vector<1x16x16xf32>
    %93 = vector.shape_cast %92 : vector<1x16x16xf32> to vector<16x16xf32>
    %c0_45 = arith.constant 0 : index
    %c80 = arith.constant 80 : index
    %94 = vector.load %arg16[%c0_45, %c80] : memref<16x128xf32, #tpu.memory_space<vmem>>, vector<16x16xf32>
    tpu.vector_store %arg16[%c0_45, %c80], %93 {strides = array<i32>} : memref<16x128xf32, #tpu.memory_space<vmem>>, vector<16x16xf32>,
    %95 = vector.extract_strided_slice %76 {offsets = [6, 0, 0], sizes = [1, 16, 16], strides = [1, 1, 1]} : vector<8x16x16xf32> to vector<1x16x16xf32>
    %96 = vector.shape_cast %95 : vector<1x16x16xf32> to vector<16x16xf32>
    %c0_46 = arith.constant 0 : index
    %c96 = arith.constant 96 : index
    %97 = vector.load %arg16[%c0_46, %c96] : memref<16x128xf32, #tpu.memory_space<vmem>>, vector<16x16xf32>
    tpu.vector_store %arg16[%c0_46, %c96], %96 {strides = array<i32>} : memref<16x128xf32, #tpu.memory_space<vmem>>, vector<16x16xf32>,
    %98 = vector.extract_strided_slice %76 {offsets = [7, 0, 0], sizes = [1, 16, 16], strides = [1, 1, 1]} : vector<8x16x16xf32> to vector<1x16x16xf32>
    %99 = vector.shape_cast %98 : vector<1x16x16xf32> to vector<16x16xf32>
    %c0_47 = arith.constant 0 : index
    %c112 = arith.constant 112 : index
    %100 = vector.load %arg16[%c0_47, %c112] : memref<16x128xf32, #tpu.memory_space<vmem>>, vector<16x16xf32>
    tpu.vector_store %arg16[%c0_47, %c112], %99 {strides = array<i32>} : memref<16x128xf32, #tpu.memory_space<vmem>>, vector<16x16xf32>,
    %c0_48 = arith.constant 0 : index
    %c0_49 = arith.constant 0 : index
    %101 = vector.load %arg16[%c0_48, %c0_49] : memref<16x128xf32, #tpu.memory_space<vmem>>, vector<16x128xf32>
    %c0_50 = arith.constant 0 : index
    %c0_51 = arith.constant 0 : index
    %102 = vector.load %arg6[%c0_50, %c0_51] : memref<128x128xf32, #tpu.memory_space<vmem>>, vector<128x128xf32>
    %cst_52 = arith.constant dense<0.000000e+00> : vector<16x128xf32>
    %103 = tpu.matmul %101, %102, %cst_52 {dimension_numbers = #tpu.dot_dimension_numbers<[1], [0], [0], [1], [0, 0, 1, 1], [], []>} : vector<16x128xf32>, vector<128x128xf32>, vector<16x128xf32> -> vector<16x128xf32>
    %c0_53 = arith.constant 0 : index
    %c0_54 = arith.constant 0 : index
    %104 = vector.load %arg7[%c0_53, %c0_54] : memref<1x128xf32, #tpu.memory_space<vmem>>, vector<1x128xf32>
    %105 = vector.broadcast %104 : vector<1x128xf32> to vector<16x128xf32>
    %106 = arith.addf %103, %105 : vector<16x128xf32>
    %107 = arith.addf %1, %106 : vector<16x128xf32>
    %c0_55 = arith.constant 0 : index
    %c0_56 = arith.constant 0 : index
    %108 = vector.load %arg8[%c0_55, %c0_56] : memref<1x128xf32, #tpu.memory_space<vmem>>, vector<1x128xf32>
    %c0_57 = arith.constant 0 : index
    %c0_58 = arith.constant 0 : index
    %109 = vector.load %arg9[%c0_57, %c0_58] : memref<1x128xf32, #tpu.memory_space<vmem>>, vector<1x128xf32>
    %cst_59 = arith.constant dense<0.000000e+00> : vector<16xf32>
    %110 = vector.multi_reduction <add>, %107, %cst_59 [1] : vector<16x128xf32> to vector<16xf32>
    %111 = vector.shape_cast %110 : vector<16xf32> to vector<16x1xf32>
    %cst_60 = arith.constant 1.280000e+02 : f32
    %112 = vector.broadcast %cst_60 : f32 to vector<16x1xf32>
    %113 = arith.divf %111, %112 : vector<16x1xf32>
    %114 = vector.broadcast %113 : vector<16x1xf32> to vector<16x128xf32>
    %115 = arith.subf %107, %114 : vector<16x128xf32>
    %116 = arith.mulf %115, %115 : vector<16x128xf32>
    %cst_61 = arith.constant dense<0.000000e+00> : vector<16xf32>
    %117 = vector.multi_reduction <add>, %116, %cst_61 [1] : vector<16x128xf32> to vector<16xf32>
    %118 = vector.shape_cast %117 : vector<16xf32> to vector<16x1xf32>
    %cst_62 = arith.constant 1.280000e+02 : f32
    %119 = vector.broadcast %cst_62 : f32 to vector<16x1xf32>
    %120 = arith.divf %118, %119 : vector<16x1xf32>
    %cst_63 = arith.constant 9.99999974E-6 : f32
    %121 = vector.broadcast %cst_63 : f32 to vector<16x1xf32>
    %122 = arith.addf %120, %121 : vector<16x1xf32>
    %123 = math.rsqrt %122 : vector<16x1xf32>
    %124 = vector.broadcast %123 : vector<16x1xf32> to vector<16x128xf32>
    %125 = arith.mulf %115, %124 : vector<16x128xf32>
    %126 = vector.broadcast %108 : vector<1x128xf32> to vector<16x128xf32>
    %127 = arith.mulf %125, %126 : vector<16x128xf32>
    %128 = vector.broadcast %109 : vector<1x128xf32> to vector<16x128xf32>
    %129 = arith.addf %127, %128 : vector<16x128xf32>
    %c0_64 = arith.constant 0 : index
    %c0_65 = arith.constant 0 : index
    %130 = vector.load %arg10[%c0_64, %c0_65] : memref<128x256xf32, #tpu.memory_space<vmem>>, vector<128x256xf32>
    %cst_66 = arith.constant dense<0.000000e+00> : vector<16x256xf32>
    %131 = tpu.matmul %129, %130, %cst_66 {dimension_numbers = #tpu.dot_dimension_numbers<[1], [0], [0], [1], [0, 0, 1, 1], [], []>} : vector<16x128xf32>, vector<128x256xf32>, vector<16x256xf32> -> vector<16x256xf32>
    %c0_67 = arith.constant 0 : index
    %c0_68 = arith.constant 0 : index
    %132 = vector.load %arg11[%c0_67, %c0_68] : memref<1x256xf32, #tpu.memory_space<vmem>>, vector<1x256xf32>
    %133 = vector.broadcast %132 : vector<1x256xf32> to vector<16x256xf32>
    %134 = arith.addf %131, %133 : vector<16x256xf32>
    %cst_69 = arith.constant 5.000000e-01 : f32
    %135 = vector.broadcast %cst_69 : f32 to vector<16x256xf32>
    %136 = arith.mulf %135, %134 : vector<16x256xf32>
    %cst_70 = arith.constant 0.707106769 : f32
    %137 = vector.broadcast %cst_70 : f32 to vector<16x256xf32>
    %138 = arith.mulf %134, %137 : vector<16x256xf32>
    %139 = math.erf %138 : vector<16x256xf32>
    %cst_71 = arith.constant 1.000000e+00 : f32
    %140 = vector.broadcast %cst_71 : f32 to vector<16x256xf32>
    %141 = arith.addf %140, %139 : vector<16x256xf32>
    %142 = arith.mulf %136, %141 : vector<16x256xf32>
    %c0_72 = arith.constant 0 : index
    %c0_73 = arith.constant 0 : index
    %143 = vector.load %arg12[%c0_72, %c0_73] : memref<256x128xf32, #tpu.memory_space<vmem>>, vector<256x128xf32>
    %cst_74 = arith.constant dense<0.000000e+00> : vector<16x128xf32>
    %144 = tpu.matmul %142, %143, %cst_74 {dimension_numbers = #tpu.dot_dimension_numbers<[1], [0], [0], [1], [0, 0, 1, 1], [], []>} : vector<16x256xf32>, vector<256x128xf32>, vector<16x128xf32> -> vector<16x128xf32>
    %c0_75 = arith.constant 0 : index
    %c0_76 = arith.constant 0 : index
    %145 = vector.load %arg13[%c0_75, %c0_76] : memref<1x128xf32, #tpu.memory_space<vmem>>, vector<1x128xf32>
    %146 = vector.broadcast %145 : vector<1x128xf32> to vector<16x128xf32>
    %147 = arith.addf %144, %146 : vector<16x128xf32>
    %c0_77 = arith.constant 0 : index
    %c0_78 = arith.constant 0 : index
    %148 = vector.load %arg10[%c0_77, %c0_78] : memref<128x256xf32, #tpu.memory_space<vmem>>, vector<128x256xf32>
    %cst_79 = arith.constant dense<0.000000e+00> : vector<16x256xf32>
    %149 = tpu.matmul %147, %148, %cst_79 {dimension_numbers = #tpu.dot_dimension_numbers<[1], [0], [0], [1], [0, 0, 1, 1], [], []>} : vector<16x128xf32>, vector<128x256xf32>, vector<16x256xf32> -> vector<16x256xf32>
    %c0_80 = arith.constant 0 : index
    %c0_81 = arith.constant 0 : index
    %150 = vector.load %arg11[%c0_80, %c0_81] : memref<1x256xf32, #tpu.memory_space<vmem>>, vector<1x256xf32>
    %151 = vector.broadcast %150 : vector<1x256xf32> to vector<16x256xf32>
    %152 = arith.addf %149, %151 : vector<16x256xf32>
    %cst_82 = arith.constant 5.000000e-01 : f32
    %153 = vector.broadcast %cst_82 : f32 to vector<16x256xf32>
    %154 = arith.mulf %153, %152 : vector<16x256xf32>
    %cst_83 = arith.constant 0.707106769 : f32
    %155 = vector.broadcast %cst_83 : f32 to vector<16x256xf32>
    %156 = arith.mulf %152, %155 : vector<16x256xf32>
    %157 = math.erf %156 : vector<16x256xf32>
    %cst_84 = arith.constant 1.000000e+00 : f32
    %158 = vector.broadcast %cst_84 : f32 to vector<16x256xf32>
    %159 = arith.addf %158, %157 : vector<16x256xf32>
    %160 = arith.mulf %154, %159 : vector<16x256xf32>
    %c0_85 = arith.constant 0 : index
    %c0_86 = arith.constant 0 : index
    %161 = vector.load %arg12[%c0_85, %c0_86] : memref<256x128xf32, #tpu.memory_space<vmem>>, vector<256x128xf32>
    %cst_87 = arith.constant dense<0.000000e+00> : vector<16x128xf32>
    %162 = tpu.matmul %160, %161, %cst_87 {dimension_numbers = #tpu.dot_dimension_numbers<[1], [0], [0], [1], [0, 0, 1, 1], [], []>} : vector<16x256xf32>, vector<256x128xf32>, vector<16x128xf32> -> vector<16x128xf32>
    %c0_88 = arith.constant 0 : index
    %c0_89 = arith.constant 0 : index
    %163 = vector.load %arg13[%c0_88, %c0_89] : memref<1x128xf32, #tpu.memory_space<vmem>>, vector<1x128xf32>
    %164 = vector.broadcast %163 : vector<1x128xf32> to vector<16x128xf32>
    %165 = arith.addf %162, %164 : vector<16x128xf32>
    %166 = arith.addf %107, %165 : vector<16x128xf32>
    %c0_90 = arith.constant 0 : index
    %c0_91 = arith.constant 0 : index
    %c0_92 = arith.constant 0 : index
    %167 = vector.load %arg14[%c0_90, %c0_91, %c0_92] : memref<1x16x128xf32, #tpu.memory_space<vmem>>, vector<1x16x128xf32>
    %168 = vector.shape_cast %167 : vector<1x16x128xf32> to vector<16x128xf32>
    %169 = vector.shape_cast %166 : vector<16x128xf32> to vector<1x16x128xf32>
    tpu.vector_store %arg14[%c0_90, %c0_91, %c0_92], %169 {strides = array<i32>} : memref<1x16x128xf32, #tpu.memory_space<vmem>>, vector<1x16x128xf32>,
    return
  }
  func.func @transform_0(%arg0: i32) -> (i32, i32, i32) {
    %c0_i32 = arith.constant 0 : i32
    %c0_i32_0 = arith.constant 0 : i32
    %c0_i32_1 = arith.constant 0 : i32
    return %arg0, %c0_i32, %c0_i32_0 : i32, i32, i32
  }
  func.func @transform_1(%arg0: i32) -> (i32, i32) {
    %c0_i32 = arith.constant 0 : i32
    %c0_i32_0 = arith.constant 0 : i32
    %c0_i32_1 = arith.constant 0 : i32
    return %c0_i32, %c0_i32_0 : i32, i32
  }
  func.func @transform_2(%arg0: i32) -> (i32, i32) {
    %c0_i32 = arith.constant 0 : i32
    %c0_i32_0 = arith.constant 0 : i32
    %c0_i32_1 = arith.constant 0 : i32
    return %c0_i32, %c0_i32_0 : i32, i32
  }
  func.func @transform_3(%arg0: i32) -> (i32, i32) {
    %c0_i32 = arith.constant 0 : i32
    %c0_i32_0 = arith.constant 0 : i32
    %c0_i32_1 = arith.constant 0 : i32
    return %c0_i32, %c0_i32_0 : i32, i32
  }
  func.func @transform_4(%arg0: i32) -> (i32, i32) {
    %c0_i32 = arith.constant 0 : i32
    %c0_i32_0 = arith.constant 0 : i32
    %c0_i32_1 = arith.constant 0 : i32
    return %c0_i32, %c0_i32_0 : i32, i32
  }
  func.func @transform_5(%arg0: i32) -> (i32, i32) {
    %c0_i32 = arith.constant 0 : i32
    %c0_i32_0 = arith.constant 0 : i32
    %c0_i32_1 = arith.constant 0 : i32
    return %c0_i32, %c0_i32_0 : i32, i32
  }
  func.func @transform_6(%arg0: i32) -> (i32, i32) {
    %c0_i32 = arith.constant 0 : i32
    %c0_i32_0 = arith.constant 0 : i32
    %c0_i32_1 = arith.constant 0 : i32
    return %c0_i32, %c0_i32_0 : i32, i32
  }
  func.func @transform_7(%arg0: i32) -> (i32, i32) {
    %c0_i32 = arith.constant 0 : i32
    %c0_i32_0 = arith.constant 0 : i32
    %c0_i32_1 = arith.constant 0 : i32
    return %c0_i32, %c0_i32_0 : i32, i32
  }
  func.func @transform_8(%arg0: i32) -> (i32, i32) {
    %c0_i32 = arith.constant 0 : i32
    %c0_i32_0 = arith.constant 0 : i32
    %c0_i32_1 = arith.constant 0 : i32
    return %c0_i32, %c0_i32_0 : i32, i32
  }
  func.func @transform_9(%arg0: i32) -> (i32, i32) {
    %c0_i32 = arith.constant 0 : i32
    %c0_i32_0 = arith.constant 0 : i32
    %c0_i32_1 = arith.constant 0 : i32
    return %c0_i32, %c0_i32_0 : i32, i32
  }
  func.func @transform_10(%arg0: i32) -> (i32, i32) {
    %c0_i32 = arith.constant 0 : i32
    %c0_i32_0 = arith.constant 0 : i32
    %c0_i32_1 = arith.constant 0 : i32
    return %c0_i32, %c0_i32_0 : i32, i32
  }
  func.func @transform_11(%arg0: i32) -> (i32, i32) {
    %c0_i32 = arith.constant 0 : i32
    %c0_i32_0 = arith.constant 0 : i32
    %c0_i32_1 = arith.constant 0 : i32
    return %c0_i32, %c0_i32_0 : i32, i32
  }
  func.func @transform_12(%arg0: i32) -> (i32, i32) {
    %c0_i32 = arith.constant 0 : i32
    %c0_i32_0 = arith.constant 0 : i32
    %c0_i32_1 = arith.constant 0 : i32
    return %c0_i32, %c0_i32_0 : i32, i32
  }
  func.func @transform_13(%arg0: i32) -> (i32, i32, i32) {
    %c0_i32 = arith.constant 0 : i32
    %c0_i32_0 = arith.constant 0 : i32
    %c0_i32_1 = arith.constant 0 : i32
    return %arg0, %c0_i32, %c0_i32_0 : i32, i32, i32
  }
}

</mosaic_0001>

<bundles_post_ra>
// kernel: tpu_custom_call.1
= control target key start
LH: loop header
LB: loop body
LE: loop exit
PB: predicated region body
PF: predicated region fallthrough
CT: control target
= control target key end

     0   :  { %s5372_s0 = inlined_call_operand.hbm [shape: f32[2,16,128], index: 0, kind: input, shape index: {}]   ;;  %s5373_s1 = inlined_call_operand.vmem [shape: f32[1,128], index: 1, kind: input, shape index: {}]   ;;  %s5374_s2 = inlined_call_operand.vmem [shape: f32[1,128], index: 2, kind: input, shape index: {}]   ;;  %s5375_s3 = inlined_call_operand.hbm [shape: f32[128,384], index: 3, kind: input, shape index: {}]   ;;  %s5376_s4 = inlined_call_operand.vmem [shape: f32[1,384], index: 4, kind: input, shape index: {}]   ;;  %s5377_s5 = inlined_call_operand.hbm [shape: f32[128,128], index: 5, kind: input, shape index: {}]   ;;  %s5378_s6 = inlined_call_operand.vmem [shape: f32[1,128], index: 6, kind: input, shape index: {}]   ;;  %s5379_s7 = inlined_call_operand.vmem [shape: f32[1,128], index: 7, kind: input, shape index: {}]   ;;  %s5380_s8 = inlined_call_operand.vmem [shape: f32[1,128], index: 8, kind: input, shape index: {}]   ;;  %s5381_s9 = inlined_call_operand.hbm [shape: f32[128,256], index: 9, kind: input, shape index: {}]   ;;  %s5382_s10 = inlined_call_operand.vmem [shape: f32[1,256], index: 10, kind: input, shape index: {}]   ;;  %s5383_s11 = inlined_call_operand.hbm [shape: f32[256,128], index: 11, kind: input, shape index: {}]   ;;  %s5384_s12 = inlined_call_operand.vmem [shape: f32[1,128], index: 12, kind: input, shape index: {}]   ;;  %s5385_s13 = inlined_call_operand.hbm [shape: f32[2,16,128], index: 13, kind: output, shape index: {}]  }
   0x1   :  { %5392 = sst [smem:[#allocation20_spill]] %s5375_s3 }
   0x2   :  { %5393 = sst [smem:[#allocation21_spill]] %s5380_s8 }
   0x3   :  { %5394 = sst [smem:[#allocation22_spill]] %s5382_s10 }
   0x4   :  { %5395 = sst [smem:[#allocation23_spill]] %s5384_s12 }
   0x5   :  { %5396 = sst [smem:[#allocation24_spill]] %s5385_s13 }
   0x6   :  { %18 = vsyncpa [#allocation5], 0 }
   0x7   :  { %20 = vsyncpa [#allocation5 + $0x1], 0 }
   0x8   :  { %21 = vsyncpa [#allocation8], 0 }
   0x9   :  { %22 = vsyncpa [#allocation11], 0 }
   0xa   :  { %23 = vsyncpa [#allocation6], 0 }
   0xb   :  { %25 = vsyncpa [#allocation6 + $0x1], 0  ;;  %s4563_s25 = smov 0   ;;  %s4565_s26 = smov 0  }
   0xc   :  { %s4567_s27 = smov 0   ;;  %s4569_s28 = smov 0  }
   0xd LB: > { %5397 = sst [smem:[#allocation18_spill]] %s4457_s25  ;;  %s4584_s29 = sadd.s32 4294967295, %s4469_s28   ;;  %s4469_s28 = sphi %s4569_s28, %s5427_s28   ;;  %s4465_s27 = sphi %s4567_s27, %s5426_s27   ;;  %s4461_s26 = sphi %s4565_s26, %s5425_s26   ;;  %s4457_s25 = sphi %s4563_s25, %s5424_s25  }
   0xe   : > { %s3240_s30 = sadd.s32 4294967294, %s4469_s28   ;;  %p51_p0 = scmp.ne.s32.totalorder %s4461_s26, %s4457_s25 }
   0xf   : > { %p5388_p1 = scmp.eq.s32.totalorder %s4584_s29, 0  ;;  %p333_p3 = scmp.eq.s32.totalorder %s3240_s30, 1 }
  0x10   : > { %p3241_p5 = scmp.ge.s32.totalorder %s4469_s28, 1  ;;  %p340_p7 = scmp.lt.s32.totalorder %s4469_s28, 3 }
  0x11   : > { %p4593_p4 = por %p5388_p1, %p51_p0  ;;  %p4598_p6 = por %p333_p3, %p51_p0 }
  0x12   : > { %p4603_p8 = pnand %p3241_p5, %p340_p7  ;;  %s4471_s17 = smov [#allocation7]  }
  0x13   : > { %s5398_s14 = scalar_select %p4593_p4, 1, 0 }
  0x14   : > { %s5399_s15 = scalar_select %p4598_p6, 1, 0 }
  0x15   : > { %s5401_s16 = scalar_select %p4603_p8, 1, 0 }
  0x16   : > { %5400 = sst [smem:[#allocation19_spill]] %s5399_s15  ;;  %s358_s18 = sshll.u32 %s4471_s17, 4  ;;  %s4607_s18 = int_to_ptr.vmem [resolvable:$true] %s358_s18 }
  0x17   : > { %p4000_p9 = pneg %p4603_p8  ;;  %s4472_s20 = smov [#allocation10]  }
  0x18   : > { %s396_s21 = sshll.u32 %s4472_s20, 4  ;;  %s5403_s3 = sld [smem:[#allocation20_spill]]  ;;  %s4618_s21 = int_to_ptr.vmem [resolvable:$true] %s396_s21 }
  0x19   : > { %p4614_p11 = pnand %p4000_p9, %p5388_p1 }
  0x1b   : > { %p4628_p13 = pneg %p4614_p11 }
  0x1e   : > { %s4253_s24 = scalar_lea.hbm %s5403_s3, 6144 }
  0x1f   : > { %p4254_p12 = scmp.ne.s32.totalorder %s5403_s3, %s4253_s24  ;;  %p4260_p5 = scmp.lt.u32.totalorder %s4253_s24, %s5403_s3 }
  0x21   : > { %p4256_p0 = pnand %p4628_p13, %p4254_p12 }
  0x23   : > { %p4257_p3 = pneg %p4256_p0 }
  0x25   : > { %p4262_p7 = pnand %p4260_p5, %p4257_p3 }
  0x27   : > { %4265 = shalt.err (!%p4262_p7)
}
  0x28   : > { %s4266_s22 = scalar_lea.vmem %s4607_s18, 6144  ;;  %p4274_p2 = scmp.lt.s32.totalorder %s4607_s18, %s4607_s18 }
  0x29   : > { %p4267_p9 = scmp.ne.s32.totalorder %s4607_s18, %s4266_s22  ;;  %p4275_p6 = scmp.lt.s32.totalorder %s4266_s22, %s4266_s22 }
  0x2b   : > { %p4269_p10 = pnand %p4267_p9, %p4628_p13  ;;  %p4276_p12 = por %p4275_p6, %p4274_p2 }
  0x2d   : > { %p4270_p1 = pneg %p4269_p10 }
  0x2f   : > { %p4277_p0 = pnand %p4276_p12, %p4270_p1 }
  0x31   : > { %4280 = shalt.err (!%p4277_p0)
}
  0x32   : > { %s4473_s23 = smov 384   ;;  %s4474_s25 = smov 24  }
  0x33   : > { %4003 = dma.hbm_to_vmem [thread:$0]  (!%p4614_p11), %s5403_s3, 6144, %s4607_s18, [#allocation8], %s4473_s23, %s4473_s23, %s4474_s25  }
  0x34   : > { %s4281_s13 = scalar_lea.hbm %s5381_s9, 4096 }
  0x35   : > { %p4282_p2 = scmp.ne.s32.totalorder %s5381_s9, %s4281_s13  ;;  %p4288_p10 = scmp.lt.u32.totalorder %s4281_s13, %s5381_s9 }
  0x37   : > { %p4284_p1 = pnand %p4282_p2, %p4628_p13 }
  0x39   : > { %p4285_p6 = pneg %p4284_p1 }
  0x3b   : > { %p4290_p3 = pnand %p4288_p10, %p4285_p6 }
  0x3d   : > { %4293 = shalt.err (!%p4290_p3)
}
  0x3e   : > { %s4294_s18 = scalar_lea.vmem %s4618_s21, 4096  ;;  %p4302_p12 = scmp.lt.s32.totalorder %s4618_s21, %s4618_s21 }
  0x3f   : > { %p4295_p5 = scmp.ne.s32.totalorder %s4618_s21, %s4294_s18  ;;  %p4303_p0 = scmp.lt.s32.totalorder %s4294_s18, %s4294_s18 }
  0x41   : > { %p4297_p7 = pnand %p4295_p5, %p4628_p13  ;;  %p4304_p2 = por %p4303_p0, %p4302_p12 }
  0x43   : > { %p4298_p9 = pneg %p4297_p7 }
  0x45   : > { %p4305_p1 = pnand %p4304_p2, %p4298_p9 }
  0x47   : > { %4308 = shalt.err (!%p4305_p1)
}
  0x48   : > { %s4475_s10 = smov 256   ;;  %s4476_s8 = smov 16  }
  0x49   : > { %4009 = dma.hbm_to_vmem [thread:$0]  (!%p4614_p11), %s5381_s9, 4096, %s4618_s21, [#allocation11], %s4475_s10, %s4475_s10, %s4476_s8  }
  0x4a   : > { %s4477_s23 = smov [#allocation9]   ;;  %s4309_s17 = scalar_lea.hbm %s5377_s5, 2048 }
  0x4b   : > { %s374_s25 = sshll.u32 %s4477_s23, 4  ;;  %p4310_p6 = scmp.ne.s32.totalorder %s5377_s5, %s4309_s17  ;;  %s375_s25 = int_to_ptr.vmem [resolvable:$true] %s374_s25 }
  0x4c   : > { %p4316_p5 = scmp.lt.u32.totalorder %s4309_s17, %s5377_s5 }
  0x4d   : > { %p4312_p10 = pnand %p4310_p6, %p4628_p13 }
  0x4f   : > { %p4313_p3 = pneg %p4312_p10 }
  0x51   : > { %p4318_p7 = pnand %p4316_p5, %p4313_p3 }
  0x53   : > { %4321 = shalt.err (!%p4318_p7)
}
  0x54   : > { %s4322_s21 = scalar_lea.vmem %s375_s25, 2048  ;;  %p4330_p2 = scmp.lt.s32.totalorder %s375_s25, %s375_s25 }
  0x55   : > { %p4323_p9 = scmp.ne.s32.totalorder %s375_s25, %s4322_s21  ;;  %p4331_p1 = scmp.lt.s32.totalorder %s4322_s21, %s4322_s21 }
  0x57   : > { %p4325_p12 = pnand %p4323_p9, %p4628_p13  ;;  %p4332_p4 = por %p4331_p1, %p4330_p2 }
  0x59   : > { %p4326_p0 = pneg %p4325_p12 }
  0x5b   : > { %p4333_p8 = pnand %p4332_p4, %p4326_p0 }
  0x5d   : > { %4336 = shalt.err (!%p4333_p8)
}
  0x5e   : > { %s4478_s10 = smov 128   ;;  %s4479_s8 = smov 8  }
  0x5f   : > { %4006 = dma.hbm_to_vmem [thread:$0]  (!%p4614_p11), %s5377_s5, 2048, %s375_s25, [#allocation8], %s4478_s10, %s4478_s10, %s4479_s8  }
  0x60   : > { %s4480_s13 = smov [#allocation12]   ;;  %s4337_s17 = scalar_lea.hbm %s5383_s11, 4096 }
  0x61   : > { %s412_s23 = sshll.u32 %s4480_s13, 4  ;;  %p4338_p4 = scmp.ne.s32.totalorder %s5383_s11, %s4337_s17  ;;  %s413_s23 = int_to_ptr.vmem [resolvable:$true] %s412_s23 }
  0x62   : > { %p4344_p10 = scmp.lt.u32.totalorder %s4337_s17, %s5383_s11 }
  0x63   : > { %p4340_p8 = pnand %p4338_p4, %p4628_p13 }
  0x65   : > { %p4341_p6 = pneg %p4340_p8 }
  0x67   : > { %p4346_p3 = pnand %p4344_p10, %p4341_p6 }
  0x69   : > { %4349 = shalt.err (!%p4346_p3)
}
  0x6a   : > { %s4350_s25 = scalar_lea.vmem %s413_s23, 4096  ;;  %p4358_p12 = scmp.lt.s32.totalorder %s413_s23, %s413_s23 }
  0x6b   : > { %p4351_p5 = scmp.ne.s32.totalorder %s413_s23, %s4350_s25  ;;  %p4359_p0 = scmp.lt.s32.totalorder %s4350_s25, %s4350_s25 }
  0x6d   : > { %p4353_p7 = pnand %p4351_p5, %p4628_p13  ;;  %p4360_p2 = por %p4359_p0, %p4358_p12 }
  0x6f   : > { %p4354_p9 = pneg %p4353_p7 }
  0x71   : > { %p4361_p1 = pnand %p4360_p2, %p4354_p9 }
  0x73   : > { %4364 = shalt.err (!%p4361_p1)
}
  0x74   : > { %4012 = dma.hbm_to_vmem [thread:$0]  (!%p4614_p11), %s5383_s11, 4096, %s413_s23, [#allocation11], %s4478_s10, %s4478_s10, %s4479_s8  }
  0x75   : > { %s4715_s15 = sadd.s32 1, %s4469_s28   ;;  %s38_s19 = sadd.s32 1, %s4465_s27 }
  0x76   : > { %s35_s13 = ssub.s32 %s4469_s28, %s4715_s15  ;;  %p45_p13 = scmp.ne.s32.totalorder %s4465_s27, %s4461_s26 }
  0x77   : > { %p36_p4 = scmp.eq.s32.totalorder %s35_s13, 0  ;;  %p46_p8 = scmp.eq.s32.totalorder %s4469_s28, 0 }
  0x78   : > { %p5405_p6 = scmp.eq.s32.totalorder %s4584_s29, 1  ;;  %p4025_p3 = scmp.lt.s32.totalorder %s4469_s28, 2 }
  0x79   : > { %s4731_s30 = scalar_select %p36_p4, %s4465_s27, %s38_s19  }
  0x7a   : > { %p4725_p10 = por %p5405_p6, %p45_p13  ;;  %p47_p5 = por %p46_p8, %p45_p13 }
  0x7b   : > { %s429_s17 = sand.u32 1, %s4465_s27   ;;  %s3316_s23 = sshll.u32 %s4469_s28, 8 }
  0x7c   : > { %s3247_s20 = sshll.u32 %s429_s17, 4  ;;  %s4738_s21 = scalar_lea.hbm %s5372_s0, %s3316_s23 }
  0x7d   : > { %s433_s25 = scalar_lea.vmem [#allocation4], %s3247_s20  ;;  %p4742_p11 = pnand %p4025_p3, %p47_p5 }
  0x7e   : > { %s440_s3 = sshll.u32 %s433_s25, 4  ;;  %s4746_s19 = scalar_lea.sflag [#allocation5], %s429_s17  ;;  %s4740_s3 = int_to_ptr.vmem [resolvable:$true] %s440_s3 }
  0x7f   : > { %s4365_s13 = scalar_lea.hbm %s4738_s21, 256  ;;  %p4367_p9 = pneg %p4742_p11 }
  0x80   : > { %p4366_p7 = scmp.ne.s32.totalorder %s4738_s21, %s4365_s13  ;;  %s4370_s22 = scalar_lea.hbm %s5372_s0, 512 }
  0x81   : > { %p4371_p2 = scmp.lt.u32.totalorder %s4738_s21, %s5372_s0  ;;  %p4372_p1 = scmp.lt.u32.totalorder %s4370_s22, %s4365_s13 }
  0x82   : > { %p4368_p12 = pnand %p4367_p9, %p4366_p7  ;;  %p4374_p4 = scmp.lt.u32.totalorder %s4365_s13, %s4738_s21 }
  0x83   : > { %p4373_p13 = por %p4372_p1, %p4371_p2 }
  0x84   : > { %p4369_p0 = pneg %p4368_p12 }
  0x85   : > { %p4375_p8 = por %p4374_p4, %p4373_p13 }
  0x87   : > { %p4376_p6 = pnand %p4375_p8, %p4369_p0 }
  0x89   : > { %4379 = shalt.err (!%p4376_p6)
}
  0x8a   : > { %s4380_s17 = scalar_lea.vmem %s4740_s3, 256  ;;  %s4481_s20 = smov [#allocation4]  }
  0x8b   : > { %p4381_p3 = scmp.ne.s32.totalorder %s4740_s3, %s4380_s17  ;;  %s4385_s23 = sshll.u32 %s4481_s20, 4  ;;  %s4386_s23 = int_to_ptr.vmem [resolvable:$false] %s4385_s23 }
  0x8c   : > { %s4387_s18 = scalar_lea.vmem %s4386_s23, 512  ;;  %p4388_p12 = scmp.lt.s32.totalorder %s4740_s3, %s4386_s23 }
  0x8d   : > { %p4383_p5 = pnand %p4381_p3, %p4367_p9  ;;  %p4389_p2 = scmp.lt.s32.totalorder %s4387_s18, %s4380_s17 }
  0x8f   : > { %p4384_p7 = pneg %p4383_p5  ;;  %p4390_p1 = por %p4389_p2, %p4388_p12 }
  0x91   : > { %p4391_p13 = pnand %p4390_p1, %p4384_p7 }
  0x93   : > { %4394 = shalt.err (!%p4391_p13)
}
  0x94   : > { %4016 = dma.hbm_to_vmem [thread:$0]  (!%p4742_p11), %s4738_s21, 256, %s4740_s3, %s4746_s19, %s4478_s10, %s4478_s10, %s4479_s8  }
  0x95   : > { %p5408_p9 = scmp.ne.s32.totalorder %s5401_s16, 0 }
  0x96   : > { %s4780_s13 = sand.u32 (!%p5408_p9), 1, %s4461_s26   ;;  %p5409_p0 = scmp.ne.s32.totalorder (!%p5408_p9), %s5398_s14, 0 }
  0x97   : > { %452 = sbr.rel (%p5408_p9) target bundleno = 3155 (0xc53), region = 72  ;;  %s3251_s22 = sshll.u32 (!%p5408_p9), %s4780_s13, 4 }
  0x98   : > { %s455_s25 = scalar_lea.sflag (!%p5408_p9), [#allocation5], %s4780_s13  ;;  %s4786_s12 = scalar_lea.vmem (!%p5408_p9), [#allocation4], %s3251_s22 }
  0x9e   : > { %4440 = dma.done.wait (%p5409_p0), %s455_s25, 256  }
  0x9f   : > { %4442 = vsyncadd (%p5409_p0), %s455_s25, 4294967040  ;;  %p5410_p11 = scmp.eq.s32.totalorder %s4584_s29, 0 }
  0xa1   : > { %4444 = dma.done.wait (%p5410_p11), [#allocation8], 8192   ;;  %p5411_p4 = pmov %p5410_p11 }
  0xa3   : > { %4446 = vsyncadd (%p5411_p4), [#allocation8], 4294959104  ;;  %p5412_p8 = pmov %p5411_p4 }
  0xa4   : > { %p5413_p6 = pmov %p5411_p4 }
  0xa5   : > { %4448 = dma.done.wait (%p5412_p8), [#allocation11], 8192  }
  0xa6   : > { %4450 = vsyncadd (%p5413_p6), [#allocation11], 4294959104  ;;  %v517_v0 = vld [vmem:[%s4786_s12] sm:$0xff]  ;;  %v518_v1 = vld [vmem:[%s4786_s12 + $0x8] sm:$0xff]  ;;  %vm777_vm0 = vcmask 392192   ;;  %s4483_s19 = smov 80  }
  0xa7   : > { %521 = vadd.xlane.f32.xlu0 %v517_v0  ;;  %v561_v2 = vld [vmem:[#allocation7 + $0x8] sm:$0xff]  ;;  %v564_v3 = vld [vmem:[#allocation7 + $0x20] sm:$0xff]  ;;  %v563_v6 = vld [vmem:[#allocation7 + $0x18] sm:$0xff]  ;;  %s4484_s17 = smov 32   ;;  %vm837_vm1 = vcmask 130048   ;;  %s4485_s20 = smov 112  }
  0xa8   : > { %v560_v4 = vld [vmem:[#allocation7] sm:$0xff]  ;;  %v3676_v5 = vpack.c.bf16 %v564_v3, %v561_v2  ;;  %v567_v7 = vld [vmem:[#allocation7 + $0x38] sm:$0xff]  ;;  %v570_v8 = vld [vmem:[#allocation7 + $0x50] sm:$0xff]  ;;  %s4486_s23 = smov 64   ;;  %s4487_s18 = smov 16   ;;  %vm801_vm2 = vcmask 261120  }
  0xa9   : > { %v3678_v9 = vpack.c.bf16 %v563_v6, %v560_v4  ;;  %v3680_v10 = vpack.c.bf16 %v570_v8, %v567_v7  ;;  %v562_v11 = vld [vmem:[#allocation7 + $0x10] sm:$0xff]  ;;  %v565_v12 = vld [vmem:[#allocation7 + $0x28] sm:$0xff]  ;;  %v576_v17 = vld [vmem:[#allocation7 + $0x80] sm:$0xff]  ;;  %v4482_v4 = vmov 0.0   ;;  %s4488_s25 = smov 96   ;;  %s4489_s14 = smov 48  }
  0xaa   : > { %v566_v13 = vld [vmem:[#allocation7 + $0x30] sm:$0xff]  ;;  %3677 = vmatprep.subr.bf16.mxu0 %v3676_v5  ;;  %v3708_v14 = vpack.c.bf16 %v565_v12, %v562_v11  ;;  %v569_v15 = vld [vmem:[#allocation7 + $0x48] sm:$0xff]  ;;  %v568_v19 = vld [vmem:[#allocation7 + $0x40] sm:$0xff]  ;;  %689 = vmatprep.mubr.f32.mxu0 %v4482_v4  ;;  %vm2473_vm4 = vcmask 261248   ;;  %vm2484_vm5 = vcmask 392448   ;;  %vm2495_vm6 = vcmask 523648  }
  0xab   : > { %523 = vadd.xlane.f32.xlu0 %v518_v1  ;;  %v573_v16 = vld [vmem:[#allocation7 + $0x68] sm:$0xff]  ;;  %3679 = vmatpush1.bf16.msra.mxu0 %v3678_v9  ;;  %v3682_v18 = vpack.c.bf16 %v569_v15, %v566_v13  ;;  %v571_v20 = vld [vmem:[#allocation7 + $0x58] sm:$0xff]  ;;  %v572_v23 = vld [vmem:[#allocation7 + $0x60] sm:$0xff]  ;;  %vm2506_vm7 = vcmask 654848   ;;  %vm2517_vm8 = vcmask 786048   ;;  %vm2528_vm9 = vcmask 917248  }
  0xac   : > { %3681 = vmatprep.subr.bf16.mxu0 %v3680_v10  ;;  %3709 = vmatprep.subr.bf16.mxu1 %v3708_v14  ;;  %v3684_v21 = vpack.c.bf16 %v576_v17, %v573_v16  ;;  %v3712_v22 = vpack.c.bf16 %v571_v20, %v568_v19  ;;  %v575_v24 = vld [vmem:[#allocation7 + $0x78] sm:$0xff]  ;;  %v582_v35 = vld [vmem:[#allocation7 + $0xb0] sm:$0xff]  ;;  %v577_v38 = vld [vmem:[#allocation7 + $0x88] sm:$0xff]  ;;  %vm2539_vm10 = vcmask 1048448   ;;  %s516_s16 = scalar_lea.vmem [#allocation13], %s3251_s22  ;;  %s5419_s3 = sld [smem:[#allocation24_spill]] }
  0xad   : > { %3711 = vmatpush3.bf16.msra.mxu1 %v3708_v14  ;;  %v3686_v25 = vpack.c.bf16 %v575_v24, %v572_v23  ;;  %v579_v34 = vld [vmem:[#allocation7 + $0x98] sm:$0xff]  ;;  %v574_v36 = vld [vmem:[#allocation7 + $0x70] sm:$0xff]  ;;  %v581_v40 = vld [vmem:[#allocation7 + $0xa8] sm:$0xff]  ;;  %s3129_s10 = sshll.u32 %s516_s16, 4  ;;  %s3116_s22 = scalar_lea.sflag [#allocation6], %s4780_s13  ;;  %s5322_s10 = int_to_ptr.vmem [resolvable:$true] %s3129_s10 }
  0xae   : > { %3713 = vmatprep.subr.bf16.mxu1 %v3712_v22  ;;  %v3688_v37 = vpack.c.bf16 %v582_v35, %v579_v34  ;;  %v578_v39 = vld [vmem:[#allocation7 + $0x90] sm:$0xff]  ;;  %v3716_v41 = vpack.c.bf16 %v577_v38, %v574_v36  ;;  %v585_v43 = vld [vmem:[#allocation7 + $0xc8] sm:$0xff]  ;;  %v588_v44 = vld [vmem:[#allocation7 + $0xe0] sm:$0xff] }
  0xaf   : > { %3683 = vmatpush1.bf16.msra.mxu0 %v3682_v18  ;;  %v3690_v42 = vpack.c.bf16 %v581_v40, %v578_v39  ;;  %v580_v45 = vld [vmem:[#allocation7 + $0xa0] sm:$0xff]  ;;  %v3692_v46 = vpack.c.bf16 %v588_v44, %v585_v43  ;;  %v583_v47 = vld [vmem:[#allocation7 + $0xb8] sm:$0xff]  ;;  %v594_v53 = vld [vmem:[#allocation7 + $0x110] sm:$0xff] }
  0xb0   : > { %3685 = vmatprep.subr.bf16.mxu0 %v3684_v21  ;;  %v584_v48 = vld [vmem:[#allocation7 + $0xc0] sm:$0xff]  ;;  %v587_v49 = vld [vmem:[#allocation7 + $0xd8] sm:$0xff]  ;;  %v3720_v50 = vpack.c.bf16 %v583_v47, %v580_v45  ;;  %v586_v54 = vld [vmem:[#allocation7 + $0xd0] sm:$0xff] }
  0xb1   : > { %3715 = vmatpush3.bf16.msra.mxu1 %v3712_v22  ;;  %v3694_v51 = vpack.c.bf16 %v587_v49, %v584_v48  ;;  %v591_v52 = vld [vmem:[#allocation7 + $0xf8] sm:$0xff]  ;;  %v589_v56 = vld [vmem:[#allocation7 + $0xe8] sm:$0xff]  ;;  %v590_v57 = vld [vmem:[#allocation7 + $0xf0] sm:$0xff] }
  0xb2   : > { %3717 = vmatprep.subr.bf16.mxu1 %v3716_v41  ;;  %v3696_v55 = vpack.c.bf16 %v594_v53, %v591_v52  ;;  %v593_v58 = vld [vmem:[#allocation7 + $0x108] sm:$0xff]  ;;  %v3724_v59 = vpack.c.bf16 %v589_v56, %v586_v54  ;;  %v600_v62 = vld [vmem:[#allocation7 + $0x140] sm:$0xff]  ;;  %v599_v3 = vld [vmem:[#allocation7 + $0x138] sm:$0xff] }
  0xb3   : > { %3687 = vmatpush1.bf16.msra.mxu0 %v3686_v25  ;;  %v3698_v60 = vpack.c.bf16 %v593_v58, %v590_v57  ;;  %v597_v61 = vld [vmem:[#allocation7 + $0x128] sm:$0xff]  ;;  %v592_v63 = vld [vmem:[#allocation7 + $0x100] sm:$0xff]  ;;  %v603_v7 = vld [vmem:[#allocation7 + $0x158] sm:$0xff] }
  0xb4   : > { %3689 = vmatprep.subr.bf16.mxu0 %v3688_v37  ;;  %v596_v2 = vld [vmem:[#allocation7 + $0x120] sm:$0xff]  ;;  %v606_v8 = vld [vmem:[#allocation7 + $0x170] sm:$0xff]  ;;  %v601_v11 = vld [vmem:[#allocation7 + $0x148] sm:$0xff]  ;;  %v610_v37 = vlaneseq }
  0xb5   : > { %3719 = vmatpush3.bf16.msra.mxu1 %v3716_v41  ;;  %v3702_v6 = vpack.c.bf16 %v599_v3, %v596_v2  ;;  %v598_v9 = vld [vmem:[#allocation7 + $0x130] sm:$0xff]  ;;  %v3704_v10 = vpack.c.bf16 %v606_v8, %v603_v7  ;;  %v605_v13 = vld [vmem:[#allocation7 + $0x168] sm:$0xff]  ;;  %v604_v16 = vld [vmem:[#allocation7 + $0x160] sm:$0xff] }
  0xb6   : > { %3721 = vmatprep.subr.bf16.mxu1 %v3720_v50  ;;  %v602_v12 = vld [vmem:[#allocation7 + $0x150] sm:$0xff]  ;;  %v3732_v14 = vpack.c.bf16 %v601_v11, %v598_v9  ;;  %v607_v17 = vld [vmem:[#allocation7 + $0x178] sm:$0xff]  ;;  %v4820_v38 = vshrl.u32 %v610_v37, 7  ;;  %vm4896_vm3 = vmpackc.low %vm837_vm1, %vm837_vm1 }
  0xb7   : > { %3691 = vmatpush1.bf16.msra.mxu0 %v3690_v42  ;;  %v3706_v15 = vpack.c.bf16 %v605_v13, %v602_v12  ;;  %v3736_v18 = vpack.c.bf16 %v607_v17, %v604_v16  ;;  %v608_v39 = vld [vmem:[%s5376_s4] sm:$0x7] }
  0xb8   : > { %3693 = vmatprep.subr.bf16.mxu0 %v3692_v46  ;;  %v616_v42 = vsub.s32 1, %v4820_v38 }
  0xb9   : > { %3723 = vmatpush3.bf16.msra.mxu1 %v3720_v50 }
  0xba   : > { %3725 = vmatprep.subr.bf16.mxu1 %v3724_v59  ;;  %v617_v46 = vrot.slane %v608_v39, %v616_v42 }
  0xbb   : > { %3695 = vmatpush1.bf16.msra.mxu0 %v3694_v51  ;;  %v620_v51 = vsub.s32 2, %v4820_v38 }
  0xbc   : > { %3697 = vmatprep.subr.bf16.mxu0 %v3696_v55 }
  0xbd   : > { %3727 = vmatpush3.bf16.msra.mxu1 %v3724_v59  ;;  %v621_v53 = vrot.slane %v608_v39, %v620_v51 }
  0xbf   : > { %3699 = vmatpush1.bf16.msra.mxu0 %v3698_v60 }
 0x134   : > { %v522_v26 = vpop.xlane.xlu0 %521 }
 0x135   : > { %v526_v27 = vmul.f32 0.0078125, %v522_v26  ;;  %v3257_v26 = vld [vmem:[%s5373_s1] ss:$0 sm:$0xff] }
 0x137   : > { %v4802_v28 = vsub.f32 %v517_v0, %v526_v27  ;;  %v3700_v0 = vpack.c.bf16 %v600_v62, %v597_v61 }
 0x138   : > { %v524_v29 = vpop.xlane.xlu0 %523 }
 0x139   : > { %v527_v30 = vmul.f32 0.0078125, %v524_v29  ;;  %v530_v31 = vmul.f32 %v4802_v28, %v4802_v28  ;;  %3701 = vmatprep.subr.bf16.mxu0 %v3700_v0  ;;  %v3258_v29 = vld [vmem:[%s5374_s2] ss:$0 sm:$0xff] }
 0x13a   : > { %3703 = vmatpush1.bf16.msra.mxu0 %v3702_v6 }
 0x13b   : > { %v4806_v32 = vsub.f32 %v518_v1, %v527_v30  ;;  %532 = vadd.xlane.f32.xlu1 %v530_v31  ;;  %v595_v1 = vld [vmem:[#allocation7 + $0x118] sm:$0xff]  ;;  %3705 = vmatprep.subr.bf16.mxu0 %v3704_v10 }
 0x13c   : > { %v3728_v5 = vpack.c.bf16 %v595_v1, %v592_v63 }
 0x13d   : > { %v531_v33 = vmul.f32 %v4806_v32, %v4806_v32 }
 0x13e   : > { %3729 = vmatprep.subr.bf16.mxu1 %v3728_v5  ;;  %3707 = vmatpush1.bf16.msra.mxu0 %v3706_v15 }
 0x13f   : > { %534 = vadd.xlane.f32.xlu1 %v531_v33  ;;  %3731 = vmatpush3.bf16.msra.mxu1 %v3728_v5 }
 0x140   : > { %3733 = vmatprep.subr.bf16.mxu1 %v3732_v14 }
 0x143   : > { %3735 = vmatpush3.bf16.msra.mxu1 %v3732_v14 }
 0x144   : > { %3737 = vmatprep.subr.bf16.mxu1 %v3736_v18 }
 0x147   : > { %3739 = vmatpush3.bf16.msra.mxu1 %v3736_v18 }
 0x1c8   : > { %v533_v19 = vpop.xlane.xlu1 %532 }
 0x1c9   : > { %v536_v20 = vmul.f32 0.0078125, %v533_v19 }
 0x1cb   : > { %v538_v21 = vadd.f32 1e-05, %v536_v20 }
 0x1cc   : > { %v535_v22 = vpop.xlane.xlu1 %534 }
 0x1cd   : > { %4163 = vrsqrt.f32 %v538_v21  ;;  %v537_v23 = vmul.f32 0.0078125, %v535_v22 }
 0x1cf   : > { %v539_v24 = vadd.f32 1e-05, %v537_v23 }
 0x1d1   : > { %4165 = vrsqrt.f32 %v539_v24 }
 0x1d7   : > { %v4164_v25 = vpop.eup %4163 }
 0x1d8   : > { %v542_v27 = vmul.f32 %v4164_v25, %v4802_v28  ;;  %v612_v28 = vsub.s32 0, %v4820_v38 }
 0x1da   : > { %v550_v30 = vmul.f32 %v3257_v26, %v542_v27 }
 0x1db   : > { %v4166_v31 = vpop.eup %4165 }
 0x1dc   : > { %v558_v33 = vadd.f32 %v3258_v29, %v550_v30  ;;  %v543_v34 = vmul.f32 %v4166_v31, %v4806_v32  ;;  %v613_v32 = vrot.slane %v608_v39, %v612_v28 }
 0x1de   : > { %690 = vmatmul.mubr.f32.vlgmr.msra.gmra.mrb[0].mxu0 %v558_v33  ;;  %3526 = vmatprep.mubr.f32.mxu1 %v558_v33  ;;  %v551_v35 = vmul.f32 %v3257_v26, %v543_v34 }
 0x1df   : > { %695 = vmatprep.mubr.f32.mxu0 %v4482_v4 }
 0x1e0   : > { %v559_v36 = vadd.f32 %v3258_v29, %v551_v35 }
 0x1e2   : > { %696 = vmatmul.mubr.f32.gmra.mrb[2].mxu0 %v559_v36  ;;  %3527 = vmatmul.mubr.f32.vlgmr.msra.gmra.mrb[0].mxu1 %v559_v36 }
 0x2b1   : > { %v691_v40 = vpop.f32.mrb[0].mxu0 }
 0x2b2   : > { %v692_v41 = vadd.f32 %v691_v40, %v613_v32  ;;  %v693_v43 = vpop.f32.mrb[1].mxu0 }
 0x2b3   : > { %v694_v50 = vadd.f32 %v693_v43, %v617_v46 }
 0x2b4   : > { %778 = vst.msk [vmem:[#allocation2] sm:$0xff] %vm777_vm0, %v692_v41  ;;  %782 = vrot.lane.b32.xlu0 %v692_v41, %s4483_s19  ;;  %793 = vrot.lane.b32.xlu1 %v692_v41, %s4484_s17 }
 0x2b5   : > { %v697_v44 = vpop.f32.mrb[2].mxu0  ;;  %v3528_v45 = vpop.f32.mrb[0].mxu1 }
 0x2b6   : > { %v698_v47 = vadd.f32 %v697_v44, %v613_v32  ;;  %v699_v48 = vpop.f32.mrb[3].mxu0  ;;  %v768_v49 = vpop.f32.mrb[1].mxu1  ;;  %v774_v56 = vadd.f32 %v3528_v45, %v621_v53 }
 0x2b7   : > { %v700_v54 = vadd.f32 %v699_v48, %v617_v46  ;;  %v769_v55 = vadd.f32 %v768_v49, %v621_v53 }
 0x2b8   : > { %779 = vst.msk [vmem:[#allocation2 + $0x8] sm:$0xff] %vm777_vm0, %v698_v47  ;;  %797 = vrot.lane.b32.xlu0 %v698_v47, %s4484_s17  ;;  %784 = vrot.lane.b32.xlu1 %v698_v47, %s4483_s19 }
 0x2bb   : > { %v863_v52 = vld [vmem:[#allocation2] sm:$0xff] }
 0x2bc   : > { %3533 = vmatprep.mubr.msk.f32.mxu1 %vm837_vm1, %v863_v52  ;;  %809 = vrot.lane.b32.xlu0 %v694_v50, %s4485_s20 }
 0x2bd   : > { %795 = vrot.lane.b32.xlu1 %v694_v50, %s4484_s17 }
 0x2bf   : > { %v4849_v57 = vld [vmem:[#allocation2 + $0x8] sm:$0xff] }
 0x2c0   : > { %818 = vrot.lane.b32.xlu0 %v694_v50, %s4486_s23  ;;  %v4854_v58 = vpack.i.bf16 %v4849_v57, %v863_v52 }
 0x2c1   : > { %799 = vrot.lane.b32.xlu1 %v700_v54, %s4484_s17 }
 0x2c4   : > { %829 = vrot.lane.b32.xlu0 %v694_v50, %s4487_s18 }
 0x2c5   : > { %831 = vrot.lane.b32.xlu1 %v769_v55, %s4487_s18 }
 0x2c8   : > { %833 = vrot.lane.b32.xlu0 %v700_v54, %s4487_s18 }
 0x2c9   : > { %811 = vrot.lane.b32.xlu1 %v700_v54, %s4485_s20 }
 0x2cc   : > { %845 = vrot.lane.b32.xlu0 %v769_v55, %s4488_s25 }
 0x2cd   : > { %820 = vrot.lane.b32.xlu1 %v700_v54, %s4486_s23 }
 0x2d0   : > { %854 = vrot.lane.b32.xlu0 %v769_v55, %s4489_s14 }
 0x2d1   : > { %835 = vrot.lane.b32.xlu1 %v774_v56, %s4487_s18 }
 0x2d4   : > { %4084 = vrot.lane.b32.xlu0 %v4854_v58, %s4485_s20 }
 0x2d5   : > { %847 = vrot.lane.b32.xlu1 %v774_v56, %s4488_s25 }
 0x2d9   : > { %856 = vrot.lane.b32.xlu1 %v774_v56, %s4489_s14 }
 0x326   : > { %v794_v59 = vpop.permute.xlu1 %793  ;;  %v783_v60 = vpop.permute.xlu0 %782 }
 0x327   : > { %789 = vst.msk [vmem:[#allocation2 + $0x10] sm:$0xff] %vm777_vm0, %v783_v60 }
 0x32a   : > { %v785_v61 = vpop.permute.xlu1 %784  ;;  %v798_v62 = vpop.permute.xlu0 %797 }
 0x32b   : > { %790 = vst.msk [vmem:[#allocation2 + $0x18] sm:$0xff] %vm777_vm0, %v785_v61 }
 0x32e   : > { %v810_v63 = vpop.permute.xlu0 %809  ;;  %v865_v3 = vld [vmem:[#allocation2 + $0x10] sm:$0xff] }
 0x32f   : > { %v796_v0 = vpop.permute.xlu1 %795  ;;  %816 = vst.msk [vmem:[#allocation2 + $0x30] sm:$0xff] %vm777_vm0, %v810_v63 }
 0x330   : > { %v802_v1 = vsel %vm801_vm2, %v794_v59, %v796_v0 }
 0x331   : > { %807 = vst.msk [vmem:[#allocation2 + $0x20] sm:$0xff] %vm777_vm0, %v802_v1 }
 0x332   : > { %v819_v2 = vpop.permute.xlu0 %818  ;;  %v4864_v5 = vld [vmem:[#allocation2 + $0x18] sm:$0xff] }
 0x333   : > { %v800_v6 = vpop.permute.xlu1 %799  ;;  %825 = vst.msk [vmem:[#allocation2 + $0x40] sm:$0xff] %vm777_vm0, %v819_v2  ;;  %v4088_v7 = vpack.i.bf16 %v4864_v5, %v865_v3 }
 0x334   : > { %v803_v8 = vsel %vm801_vm2, %v798_v62, %v800_v6 }
 0x335   : > { %808 = vst.msk [vmem:[#allocation2 + $0x28] sm:$0xff] %vm777_vm0, %v803_v8  ;;  %4089 = vrot.lane.b32.xlu1 %v4088_v7, %s4485_s20 }
 0x336   : > { %v830_v9 = vpop.permute.xlu0 %829  ;;  %v4881_v22 = vld [vmem:[#allocation2 + $0x30] sm:$0xff] }
 0x337   : > { %v832_v10 = vpop.permute.xlu1 %831 }
 0x338   : > { %v838_v11 = vsel %vm837_vm1, %v830_v9, %v832_v10  ;;  %v867_v15 = vld [vmem:[#allocation2 + $0x20] sm:$0xff] }
 0x339   : > { %843 = vst.msk [vmem:[#allocation2 + $0x50] sm:$0xff] %vm777_vm0, %v838_v11 }
 0x33a   : > { %v834_v12 = vpop.permute.xlu0 %833  ;;  %v871_v13 = vld [vmem:[#allocation2 + $0x40] sm:$0xff] }
 0x33b   : > { %v812_v14 = vpop.permute.xlu1 %811  ;;  %3561 = vmatprep.mubr.msk.f32.mxu0 %vm837_vm1, %v871_v13 }
 0x33c   : > { %817 = vst.msk [vmem:[#allocation2 + $0x38] sm:$0xff] %vm777_vm0, %v812_v14  ;;  %v4874_v16 = vld [vmem:[#allocation2 + $0x28] sm:$0xff] }
 0x33d   : > { %v4093_v17 = vpack.i.bf16 %v4874_v16, %v867_v15 }
 0x33e   : > { %v846_v18 = vpop.permute.xlu0 %845 }
 0x33f   : > { %v821_v19 = vpop.permute.xlu1 %820  ;;  %4094 = vrot.lane.b32.xlu0 %v4093_v17, %s4485_s20  ;;  %852 = vst.msk [vmem:[#allocation2 + $0x60] sm:$0xff] %vm777_vm0, %v846_v18 }
 0x340   : > { %826 = vst.msk [vmem:[#allocation2 + $0x48] sm:$0xff] %vm777_vm0, %v821_v19  ;;  %v873_v37 = vld [vmem:[#allocation2 + $0x50] sm:$0xff] }
 0x342   : > { %v855_v20 = vpop.permute.xlu0 %854 }
 0x343   : > { %v836_v21 = vpop.permute.xlu1 %835  ;;  %861 = vst.msk [vmem:[#allocation2 + $0x70] sm:$0xff] %vm777_vm0, %v855_v20  ;;  %v4883_v23 = vld [vmem:[#allocation2 + $0x38] sm:$0xff] }
 0x344   : > { %v839_v24 = vsel %vm837_vm1, %v834_v12, %v836_v21  ;;  %v4098_v25 = vpack.i.bf16 %v4883_v23, %v4881_v22 }
 0x345   : > { %844 = vst.msk [vmem:[#allocation2 + $0x58] sm:$0xff] %vm777_vm0, %v839_v24 }
 0x346   : > { %4099 = vrot.lane.b32.xlu1 %v4098_v25, %s4485_s20  ;;  %v4085_v26 = vpop.permute.xlu0 %4084  ;;  %v4910_v40 = vld [vmem:[#allocation2 + $0x60] sm:$0xff] }
 0x347   : > { %v848_v27 = vpop.permute.xlu1 %847  ;;  %v4087_v29 = vunpack.i.h.bf16 %v4085_v26  ;;  %v4086_v30 = vunpack.i.l.bf16 %v4085_v26  ;;  %v4890_v31 = vld [vmem:[#allocation2 + $0x48] sm:$0xff] }
 0x348   : > { %853 = vst.msk [vmem:[#allocation2 + $0x68] sm:$0xff] %vm777_vm0, %v848_v27  ;;  %v4103_v33 = vpack.i.bf16 %v4890_v31, %v871_v13 }
 0x349   : > { %v3740_v35 = vpack.c.bf16 %v4087_v29, %v4086_v30 }
 0x34a   : > { %4104 = vrot.lane.b32.xlu0 %v4103_v33, %s4485_s20  ;;  %v4922_v44 = vld [vmem:[#allocation2 + $0x70] sm:$0xff] }
 0x34b   : > { %v857_v36 = vpop.permute.xlu1 %856  ;;  %3742 = vmatprep.subr.msk.bf16.mxu1 %vm4896_vm3, %v3740_v35 }
 0x34c   : > { %862 = vst.msk [vmem:[#allocation2 + $0x78] sm:$0xff] %vm777_vm0, %v857_v36  ;;  %3745 = vmatpush3.bf16.xpose.msk.msra.mxu1 %vm4896_vm3, %v3740_v35  ;;  %v4906_v39 = vld [vmem:[#allocation2 + $0x58] sm:$0xff] }
 0x34d   : > { %v4108_v32 = vpack.i.bf16 %v4906_v39, %v873_v37 }
 0x34f   : > { %4109 = vrot.lane.b32.xlu1 %v4108_v32, %s4485_s20  ;;  %v4912_v41 = vld [vmem:[#allocation2 + $0x68] sm:$0xff] }
 0x350   : > { %v4916_v43 = vpack.i.bf16 %v4912_v41, %v4910_v40 }
 0x352   : > { %4114 = vrot.lane.b32.xlu0 %v4916_v43, %s4485_s20 }
 0x353   : > { %3534 = vmatmul.mubr.msk.f32.vlgmr.msra.gmra.mrb[2].mxu1 %vm837_vm1, %v4849_v57  ;;  %v4924_v45 = vld [vmem:[#allocation2 + $0x78] sm:$0xff] }
 0x354   : > { %3540 = vmatprep.mubr.msk.f32.mxu1 %vm837_vm1, %v865_v3  ;;  %v4929_v46 = vpack.i.bf16 %v4924_v45, %v4922_v44 }
 0x356   : > { %4124 = vrot.lane.b32.xlu0 %v4854_v58, %s4488_s25  ;;  %4119 = vrot.lane.b32.xlu1 %v4929_v46, %s4485_s20 }
 0x35a   : > { %4139 = vrot.lane.b32.xlu0 %v4103_v33, %s4488_s25  ;;  %4129 = vrot.lane.b32.xlu1 %v4088_v7, %s4488_s25 }
 0x35e   : > { %4134 = vrot.lane.b32.xlu1 %v4098_v25, %s4488_s25 }
 0x362   : > { %4144 = vrot.lane.b32.xlu1 %v4093_v17, %s4488_s25 }
 0x366   : > { %4149 = vrot.lane.b32.xlu1 %v4108_v32, %s4488_s25 }
 0x3a7   : > { %v4090_v47 = vpop.permute.xlu1 %4089 }
 0x3a8   : > { %v4092_v48 = vunpack.i.h.bf16 %v4090_v47  ;;  %v4091_v49 = vunpack.i.l.bf16 %v4090_v47 }
 0x3aa   : > { %v3746_v50 = vpack.c.bf16 %v4092_v48, %v4091_v49 }
 0x3ac   : > { %3748 = vmatprep.subr.msk.bf16.mxu1 %vm4896_vm3, %v3746_v50 }
 0x3ad   : > { %3751 = vmatpush3.bf16.xpose.msk.msra.mxu1 %vm4896_vm3, %v3746_v50 }
 0x3b1   : > { %v4095_v51 = vpop.permute.xlu0 %4094 }
 0x3b2   : > { %v4097_v52 = vunpack.i.h.bf16 %v4095_v51  ;;  %v4096_v53 = vunpack.i.l.bf16 %v4095_v51 }
 0x3b4   : > { %v3752_v54 = vpack.c.bf16 %v4097_v52, %v4096_v53  ;;  %3541 = vmatmul.mubr.msk.f32.vlgmr.msra.gmra.mrb[4].mxu1 %vm837_vm1, %v4864_v5 }
 0x3b5   : > { %3547 = vmatprep.mubr.msk.f32.mxu1 %vm837_vm1, %v867_v15 }
 0x3b6   : > { %3754 = vmatprep.subr.msk.bf16.mxu1 %vm4896_vm3, %v3752_v54 }
 0x3b7   : > { %3757 = vmatpush3.bf16.xpose.msk.msra.mxu1 %vm4896_vm3, %v3752_v54 }
 0x3b8   : > { %v4100_v55 = vpop.permute.xlu1 %4099 }
 0x3b9   : > { %v4102_v56 = vunpack.i.h.bf16 %v4100_v55  ;;  %v4101_v57 = vunpack.i.l.bf16 %v4100_v55 }
 0x3bb   : > { %v3758_v58 = vpack.c.bf16 %v4102_v56, %v4101_v57 }
 0x3bc   : > { %v4105_v59 = vpop.permute.xlu0 %4104 }
 0x3bd   : > { %v4107_v60 = vunpack.i.h.bf16 %v4105_v59  ;;  %v4106_v61 = vunpack.i.l.bf16 %v4105_v59  ;;  %3760 = vmatprep.subr.msk.bf16.mxu1 %vm4896_vm3, %v3758_v58 }
 0x3be   : > { %3548 = vmatmul.mubr.msk.f32.vlgmr.msra.gmra.mrb[6].mxu1 %vm837_vm1, %v4874_v16 }
 0x3bf   : > { %v3764_v62 = vpack.c.bf16 %v4107_v60, %v4106_v61  ;;  %3763 = vmatpush3.bf16.xpose.msk.msra.mxu1 %vm4896_vm3, %v3758_v58  ;;  %3554 = vmatprep.mubr.msk.f32.mxu1 %vm837_vm1, %v4881_v22 }
 0x3c1   : > { %v4110_v63 = vpop.permute.xlu1 %4109  ;;  %3766 = vmatprep.subr.msk.bf16.mxu0 %vm4896_vm3, %v3764_v62 }
 0x3c2   : > { %v4112_v0 = vunpack.i.h.bf16 %v4110_v63  ;;  %v4111_v1 = vunpack.i.l.bf16 %v4110_v63  ;;  %3769 = vmatpush3.bf16.xpose.msk.msra.mxu0 %vm4896_vm3, %v3764_v62 }
 0x3c4   : > { %v3770_v2 = vpack.c.bf16 %v4112_v0, %v4111_v1  ;;  %v4115_v3 = vpop.permute.xlu0 %4114 }
 0x3c5   : > { %v4117_v5 = vunpack.i.h.bf16 %v4115_v3  ;;  %v4116_v6 = vunpack.i.l.bf16 %v4115_v3 }
 0x3c6   : > { %3555 = vmatmul.mubr.msk.f32.vlgmr.msra.gmra.mrb[8].mxu1 %vm837_vm1, %v4883_v23  ;;  %3772 = vmatprep.subr.msk.bf16.mxu1 %vm4896_vm3, %v3770_v2 }
 0x3c7   : > { %v3776_v7 = vpack.c.bf16 %v4117_v5, %v4116_v6  ;;  %3775 = vmatpush3.bf16.xpose.msk.msra.mxu1 %vm4896_vm3, %v3770_v2  ;;  %3568 = vmatprep.mubr.msk.f32.mxu1 %vm837_vm1, %v873_v37 }
 0x3c8   : > { %v4120_v8 = vpop.permute.xlu1 %4119  ;;  %v4125_v9 = vpop.permute.xlu0 %4124 }
 0x3c9   : > { %v4122_v10 = vunpack.i.h.bf16 %v4120_v8  ;;  %v4121_v11 = vunpack.i.l.bf16 %v4120_v8  ;;  %v4127_v12 = vunpack.i.h.bf16 %v4125_v9  ;;  %v4126_v13 = vunpack.i.l.bf16 %v4125_v9  ;;  %3562 = vmatmul.mubr.msk.f32.vlgmr.msra.gmra.mrb[4].mxu0 %vm837_vm1, %v4890_v31  ;;  %3778 = vmatprep.subr.msk.bf16.mxu0 %vm4896_vm3, %v3776_v7 }
 0x3ca   : > { %3781 = vmatpush3.bf16.xpose.msk.msra.mxu0 %vm4896_vm3, %v3776_v7  ;;  %3575 = vmatprep.mubr.msk.f32.mxu0 %vm837_vm1, %v4910_v40 }
 0x3cb   : > { %v3782_v14 = vpack.c.bf16 %v4122_v10, %v4121_v11  ;;  %v3788_v15 = vpack.c.bf16 %v4127_v12, %v4126_v13 }
 0x3cc   : > { %v4130_v16 = vpop.permute.xlu1 %4129  ;;  %v4140_v1 = vpop.permute.xlu0 %4139 }
 0x3cd   : > { %v4132_v17 = vunpack.i.h.bf16 %v4130_v16  ;;  %v4131_v18 = vunpack.i.l.bf16 %v4130_v16  ;;  %3784 = vmatprep.subr.msk.bf16.mxu1 %vm4896_vm3, %v3782_v14  ;;  %3789 = vmatprep.subr.bf16.mxu0 %v3788_v15  ;;  %v4142_v10 = vunpack.i.h.bf16 %v4140_v1  ;;  %v4141_v11 = vunpack.i.l.bf16 %v4140_v1 }
 0x3ce   : > { %3569 = vmatmul.mubr.msk.f32.vlgmr.msra.gmra.mrb[10].mxu1 %vm837_vm1, %v4906_v39 }
 0x3cf   : > { %v3792_v19 = vpack.c.bf16 %v4132_v17, %v4131_v18  ;;  %3787 = vmatpush3.bf16.xpose.msk.msra.mxu1 %vm4896_vm3, %v3782_v14  ;;  %3582 = vmatprep.mubr.msk.f32.mxu1 %vm837_vm1, %v4922_v44  ;;  %v5062_v14 = vpack.c.bf16 %v4142_v10, %v4141_v11 }
 0x3d0   : > { %v4135_v20 = vpop.permute.xlu1 %4134 }
 0x3d1   : > { %3576 = vmatmul.mubr.msk.f32.vlgmr.msra.gmra.mrb[6].mxu0 %vm837_vm1, %v4912_v41  ;;  %3793 = vmatprep.subr.bf16.mxu1 %v3792_v19  ;;  %v4137_v21 = vunpack.i.h.bf16 %v4135_v20  ;;  %v4136_v22 = vunpack.i.l.bf16 %v4135_v20 }
 0x3d2   : > { %3791 = vmatpush3.bf16.msra.mxu0 %v3788_v15 }
 0x3d3   : > { %v4988_v26 = vpack.c.bf16 %v4137_v21, %v4136_v22 }
 0x3d4   : > { %v4145_v23 = vpop.permute.xlu1 %4144 }
 0x3d5   : > { %v4147_v24 = vunpack.i.h.bf16 %v4145_v23  ;;  %v4146_v25 = vunpack.i.l.bf16 %v4145_v23 }
 0x3d6   : > { %3583 = vmatmul.mubr.msk.f32.vlgmr.msra.gmra.mrb[12].mxu1 %vm837_vm1, %v4924_v45 }
 0x3d7   : > { %v4992_v27 = vpack.c.bf16 %v4147_v24, %v4146_v25  ;;  %3795 = vmatpush3.bf16.msra.mxu1 %v3792_v19 }
 0x3d8   : > { %3801 = vmatprep.subr.bf16.mxu1 %v4988_v26  ;;  %v4150_v63 = vpop.permute.xlu1 %4149 }
 0x3d9   : > { %3797 = vmatprep.subr.bf16.mxu0 %v4992_v27  ;;  %v4152_v22 = vunpack.i.h.bf16 %v4150_v63  ;;  %v4151_v23 = vunpack.i.l.bf16 %v4150_v63 }
 0x3db   : > { %v5075_v25 = vpack.c.bf16 %v4152_v22, %v4151_v23 }
 0x426   : > { %v3535_v29 = vpop.f32.mrb[2].mxu1 }
 0x427   : > { %v959_v30 = vpop.f32.mrb[3].mxu1  ;;  %v1594_v31 = vsel %vm837_vm1, %v3535_v29, -inf }
 0x428   : > { %1595 = vmax.xlane.f32.xlu1 %v1594_v31  ;;  %v1591_v33 = vsel %vm837_vm1, %v959_v30, -inf }
 0x429   : > { %1592 = vmax.xlane.f32.xlu0 %v1591_v33 }
 0x487   : > { %v4998_v34 = vpop.f32.mrb[4].mxu1 }
 0x488   : > { %v5000_v35 = vpop.f32.mrb[5].mxu1  ;;  %v1600_v36 = vsel %vm837_vm1, %v4998_v34, -inf }
 0x489   : > { %1601 = vmax.xlane.f32.xlu0 %v1600_v36  ;;  %v1597_v37 = vsel %vm837_vm1, %v5000_v35, -inf }
 0x48d   : > { %1598 = vmax.xlane.f32.xlu0 %v1597_v37 }
 0x491   : > { %v5006_v39 = vpop.f32.mrb[6].mxu1 }
 0x492   : > { %v5008_v32 = vpop.f32.mrb[7].mxu1  ;;  %v1606_v50 = vsel %vm837_vm1, %v5006_v39, -inf }
 0x493   : > { %v1603_v52 = vsel %vm837_vm1, %v5008_v32, -inf }
 0x499   : > { %v5010_v40 = vpop.f32.mrb[8].mxu1 }
 0x49a   : > { %v5012_v41 = vpop.f32.mrb[9].mxu1  ;;  %v1612_v58 = vsel %vm837_vm1, %v5010_v40, -inf }
 0x49b   : > { %v1609_v60 = vsel %vm837_vm1, %v5012_v41, -inf }
 0x49c   : > { %v5014_v44 = vpop.f32.mrb[4].mxu0 }
 0x49d   : > { %v5016_v45 = vpop.f32.mrb[5].mxu0  ;;  %v1618_v47 = vsel %vm837_vm1, %v5014_v44, -inf }
 0x49e   : > { %1619 = vmax.xlane.f32.xlu1 %v1618_v47  ;;  %v1615_v48 = vsel %vm837_vm1, %v5016_v45, -inf }
 0x49f   : > { %1616 = vmax.xlane.f32.xlu0 %v1615_v48 }
 0x4a1   : > { %v5022_v49 = vpop.f32.mrb[10].mxu1 }
 0x4a2   : > { %1607 = vmax.xlane.f32.xlu1 %v1606_v50  ;;  %v5026_v51 = vpop.f32.mrb[11].mxu1  ;;  %v1624_v61 = vsel %vm837_vm1, %v5022_v49, -inf }
 0x4a3   : > { %1604 = vmax.xlane.f32.xlu0 %v1603_v52  ;;  %v1621_v62 = vsel %vm837_vm1, %v5026_v51, -inf }
 0x4a4   : > { %v5030_v53 = vpop.f32.mrb[6].mxu0 }
 0x4a5   : > { %v5032_v54 = vpop.f32.mrb[7].mxu0  ;;  %v1630_v55 = vsel %vm837_vm1, %v5030_v53, -inf }
 0x4a6   : > { %1631 = vmax.xlane.f32.xlu1 %v1630_v55  ;;  %v1627_v56 = vsel %vm837_vm1, %v5032_v54, -inf }
 0x4a7   : > { %1628 = vmax.xlane.f32.xlu0 %v1627_v56 }
 0x4a9   : > { %v5038_v57 = vpop.f32.mrb[12].mxu1 }
 0x4aa   : > { %1613 = vmax.xlane.f32.xlu1 %v1612_v58  ;;  %v5042_v59 = vpop.f32.mrb[13].mxu1  ;;  %v1636_v0 = vsel %vm837_vm1, %v5038_v57, -inf }
 0x4ab   : > { %1610 = vmax.xlane.f32.xlu0 %v1609_v60  ;;  %v1633_v2 = vsel %vm837_vm1, %v5042_v59, -inf }
 0x4ae   : > { %1625 = vmax.xlane.f32.xlu1 %v1624_v61 }
 0x4af   : > { %1622 = vmax.xlane.f32.xlu0 %v1621_v62 }
 0x4b2   : > { %1637 = vmax.xlane.f32.xlu1 %v1636_v0 }
 0x4b3   : > { %1634 = vmax.xlane.f32.xlu0 %v1633_v2 }
 0x4b5   : > { %v1596_v3 = vpop.xlane.xlu1 %1595 }
 0x4b6   : > { %v1640_v5 = vsub.f32 %v3535_v29, %v1596_v3  ;;  %v1593_v6 = vpop.xlane.xlu0 %1592 }
 0x4b7   : > { %v1639_v7 = vsub.f32 %v959_v30, %v1593_v6 }
 0x4b8   : > { %v1657_v8 = vmul.f32 1.442695, %v1640_v5 }
 0x4b9   : > { %v1655_v9 = vmul.f32 1.442695, %v1639_v7 }
 0x4bb   : > { %4167 = vpow2.f32 %v1655_v9 }
 0x4bc   : > { %4169 = vpow2.f32 %v1657_v8 }
 0x4c3   : > { %4159 = vrot.lane.b32.xlu1 %v4929_v46, %s4488_s25 }
 0x4c5   : > { %v5056_v12 = vpop.eup %4167 }
 0x4c6   : > { %v5058_v13 = vpop.eup %4169  ;;  %3589 = vmatprep.mubr.msk.f32.mxu0 %vm837_vm1, %v5056_v12 }
 0x4c7   : > { %3590 = vmatmul.mubr.msk.f32.vlgmr.msra.gmra.mrb[8].mxu0 %vm837_vm1, %v5058_v13 }
 0x4c8   : > { %3799 = vmatpush3.bf16.msra.mxu0 %v4992_v27 }
 0x4c9   : > { %3805 = vmatprep.subr.bf16.mxu0 %v5062_v14  ;;  %4154 = vrot.lane.b32.xlu0 %v4916_v43, %s4488_s25 }
 0x516   : > { %v1602_v46 = vpop.xlane.xlu0 %1601 }
 0x517   : > { %v1642_v15 = vsub.f32 %v4998_v34, %v1602_v46 }
 0x519   : > { %v1661_v16 = vmul.f32 1.442695, %v1642_v15 }
 0x51a   : > { %v1599_v17 = vpop.xlane.xlu0 %1598 }
 0x51b   : > { %4171 = vpow2.f32 %v1661_v16  ;;  %v1641_v18 = vsub.f32 %v5000_v35, %v1599_v17 }
 0x51d   : > { %v1659_v19 = vmul.f32 1.442695, %v1641_v18 }
 0x51f   : > { %4173 = vpow2.f32 %v1659_v19 }
 0x525   : > { %v4172_v20 = vpop.eup %4171 }
 0x526   : > { %v1696_v21 = vsel %vm837_vm1, %v4172_v20, 0.0 }
 0x527   : > { %1697 = vadd.xlane.f32.xlu1 %v1696_v21 }
 0x529   : > { %v4174_v24 = vpop.eup %4173 }
 0x52a   : > { %3596 = vmatprep.mubr.msk.f32.mxu1 %vm837_vm1, %v4174_v24  ;;  %v1693_v43 = vsel %vm837_vm1, %v4174_v24, 0.0 }
 0x52b   : > { %v1620_v27 = vpop.xlane.xlu1 %1619  ;;  %3597 = vmatmul.mubr.msk.f32.vlgmr.msra.gmra.mrb[14].mxu1 %vm837_vm1, %v4172_v20  ;;  %1694 = vadd.xlane.f32.xlu0 %v1693_v43 }
 0x52c   : > { %v1648_v29 = vsub.f32 %v5014_v44, %v1620_v27  ;;  %3803 = vmatpush3.bf16.msra.mxu1 %v4988_v26  ;;  %v1617_v30 = vpop.xlane.xlu0 %1616 }
 0x52d   : > { %v1647_v31 = vsub.f32 %v5016_v45, %v1617_v30  ;;  %3809 = vmatprep.subr.bf16.mxu1 %v5075_v25 }
 0x52e   : > { %v1673_v33 = vmul.f32 1.442695, %v1648_v29 }
 0x52f   : > { %v1671_v34 = vmul.f32 1.442695, %v1647_v31  ;;  %v1608_v35 = vpop.xlane.xlu1 %1607 }
 0x530   : > { %4175 = vpow2.f32 %v1673_v33  ;;  %v1644_v36 = vsub.f32 %v5006_v39, %v1608_v35  ;;  %v1605_v37 = vpop.xlane.xlu0 %1604 }
 0x531   : > { %4177 = vpow2.f32 %v1671_v34  ;;  %v1643_v47 = vsub.f32 %v5008_v32, %v1605_v37 }
 0x532   : > { %v1665_v48 = vmul.f32 1.442695, %v1644_v36 }
 0x533   : > { %v1663_v50 = vmul.f32 1.442695, %v1643_v47  ;;  %v1632_v44 = vpop.xlane.xlu1 %1631  ;;  %v1690_v47 = vsel %vm837_vm1, %v5058_v13, 0.0 }
 0x534   : > { %4179 = vpow2.f32 %v1665_v48  ;;  %v1652_v26 = vsub.f32 %v5030_v53, %v1632_v44  ;;  %v1629_v52 = vpop.xlane.xlu0 %1628 }
 0x535   : > { %4181 = vpow2.f32 %v1663_v50  ;;  %v1651_v45 = vsub.f32 %v5032_v54, %v1629_v52  ;;  %v1687_v50 = vsel %vm837_vm1, %v5056_v12, 0.0 }
 0x536   : > { %v1681_v55 = vmul.f32 1.442695, %v1652_v26 }
 0x537   : > { %v1679_v56 = vmul.f32 1.442695, %v1651_v45  ;;  %v1614_v58 = vpop.xlane.xlu1 %1613 }
 0x538   : > { %4183 = vpow2.f32 %v1681_v55  ;;  %v1646_v39 = vsub.f32 %v5010_v40, %v1614_v58  ;;  %v1611_v60 = vpop.xlane.xlu0 %1610 }
 0x539   : > { %v1645_v61 = vsub.f32 %v5012_v41, %v1611_v60  ;;  %4185 = vpow2.f32 %v1679_v56 }
 0x53a   : > { %v4176_v32 = vpop.eup %4175  ;;  %v1669_v62 = vmul.f32 1.442695, %v1646_v39 }
 0x53b   : > { %v4178_v63 = vpop.eup %4177  ;;  %v1667_v0 = vmul.f32 1.442695, %v1645_v61  ;;  %v1626_v1 = vpop.xlane.xlu1 %1625  ;;  %v1714_v53 = vsel %vm837_vm1, %v4176_v32, 0.0 }
 0x53c   : > { %4187 = vpow2.f32 %v1669_v62  ;;  %v1650_v54 = vsub.f32 %v5022_v49, %v1626_v1  ;;  %v1623_v2 = vpop.xlane.xlu0 %1622  ;;  %1715 = vadd.xlane.f32.xlu1 %v1714_v53  ;;  %v1711_v3 = vsel %vm837_vm1, %v4178_v63, 0.0 }
 0x53d   : > { %4189 = vpow2.f32 %v1667_v0  ;;  %v1649_v40 = vsub.f32 %v5026_v51, %v1623_v2  ;;  %1712 = vadd.xlane.f32.xlu0 %v1711_v3 }
 0x53e   : > { %v4180_v41 = vpop.eup %4179  ;;  %v1677_v5 = vmul.f32 1.442695, %v1650_v54 }
 0x53f   : > { %v4182_v6 = vpop.eup %4181  ;;  %v1675_v7 = vmul.f32 1.442695, %v1649_v40  ;;  %v1638_v8 = vpop.xlane.xlu1 %1637  ;;  %v1702_v9 = vsel %vm837_vm1, %v4180_v41, 0.0 }
 0x540   : > { %4191 = vpow2.f32 %v1677_v5  ;;  %v1654_v10 = vsub.f32 %v5038_v57, %v1638_v8  ;;  %3603 = vmatprep.mubr.msk.f32.mxu0 %vm837_vm1, %v4182_v6  ;;  %v1635_v49 = vpop.xlane.xlu0 %1634  ;;  %v1699_v19 = vsel %vm837_vm1, %v4182_v6, 0.0 }
 0x541   : > { %4193 = vpow2.f32 %v1675_v7  ;;  %v1653_v11 = vsub.f32 %v5042_v59, %v1635_v49  ;;  %3604 = vmatmul.mubr.msk.f32.vlgmr.msra.gmra.mrb[10].mxu0 %vm837_vm1, %v4180_v41  ;;  %1703 = vadd.xlane.f32.xlu0 %v1702_v9  ;;  %v2545_v49 = vld [vmem:[#allocation9 + $0x8] sm:$0xff] }
 0x542   : > { %v4184_v51 = vpop.eup %4183  ;;  %v1685_v46 = vmul.f32 1.442695, %v1654_v10  ;;  %3807 = vmatpush3.bf16.msra.mxu0 %v5062_v14  ;;  %3617 = vmatprep.mubr.msk.f32.mxu0 %vm837_vm1, %v4178_v63  ;;  %v2544_v10 = vld [vmem:[#allocation9] sm:$0xff] }
 0x543   : > { %v1683_v15 = vmul.f32 1.442695, %v1653_v11  ;;  %v4160_v16 = vpop.permute.xlu1 %4159  ;;  %v1726_v17 = vsel %vm837_vm1, %v4184_v51, 0.0  ;;  %v4186_v59 = vpop.eup %4185  ;;  %v3820_v11 = vpack.c.bf16 %v2545_v49, %v2544_v10 }
 0x544   : > { %4195 = vpow2.f32 %v1685_v46  ;;  %v4162_v57 = vunpack.i.h.bf16 %v4160_v16  ;;  %1727 = vadd.xlane.f32.xlu1 %v1726_v17  ;;  %v4155_v18 = vpop.permute.xlu0 %4154  ;;  %v4161_v20 = vunpack.i.l.bf16 %v4160_v16  ;;  %v1723_v27 = vsel %vm837_vm1, %v4186_v59, 0.0  ;;  %v2547_v46 = vld [vmem:[#allocation9 + $0x18] sm:$0xff]  ;;  %v2548_v16 = vld [vmem:[#allocation9 + $0x20] sm:$0xff]  ;;  %v2549_v17 = vld [vmem:[#allocation9 + $0x28] sm:$0xff] }
 0x545   : > { %4197 = vpow2.f32 %v1683_v15  ;;  %v4157_v21 = vunpack.i.h.bf16 %v4155_v18  ;;  %v4156_v22 = vunpack.i.l.bf16 %v4155_v18  ;;  %3618 = vmatmul.mubr.msk.f32.vlgmr.msra.gmra.mrb[12].mxu0 %vm837_vm1, %v4176_v32  ;;  %1700 = vadd.xlane.f32.xlu0 %v1699_v19 }
 0x546   : > { %v4188_v14 = vpop.eup %4187  ;;  %3631 = vmatprep.mubr.msk.f32.mxu0 %vm837_vm1, %v4186_v59  ;;  %v3816_v29 = vpack.c.bf16 %v4162_v57, %v4161_v20  ;;  %v3828_v57 = vpack.c.bf16 %v2549_v17, %v2548_v16  ;;  %v2550_v59 = vld [vmem:[#allocation9 + $0x30] sm:$0xff]  ;;  %v2551_v20 = vld [vmem:[#allocation9 + $0x38] sm:$0xff] }
 0x547   : > { %v4190_v23 = vpop.eup %4189  ;;  %v3812_v24 = vpack.c.bf16 %v4157_v21, %v4156_v22  ;;  %v1708_v43 = vsel %vm837_vm1, %v4188_v14, 0.0 }
 0x548   : > { %3610 = vmatprep.mubr.msk.f32.mxu1 %vm837_vm1, %v4190_v23  ;;  %1709 = vadd.xlane.f32.xlu1 %v1708_v43  ;;  %v1705_v34 = vsel %vm837_vm1, %v4190_v23, 0.0 }
 0x549   : > { %3611 = vmatmul.mubr.msk.f32.vlgmr.msra.gmra.mrb[16].mxu1 %vm837_vm1, %v4188_v14  ;;  %1724 = vadd.xlane.f32.xlu0 %v1723_v27  ;;  %v3832_v14 = vpack.c.bf16 %v2551_v20, %v2550_v59  ;;  %v2552_v27 = vld [vmem:[#allocation9 + $0x40] sm:$0xff] }
 0x54a   : > { %v4192_v30 = vpop.eup %4191  ;;  %3811 = vmatpush3.bf16.msra.mxu1 %v5075_v25  ;;  %3813 = vmatprep.subr.bf16.mxu0 %v3812_v24 }
 0x54b   : > { %v4194_v31 = vpop.eup %4193  ;;  %3815 = vmatpush3.bf16.msra.mxu0 %v3812_v24  ;;  %3817 = vmatprep.subr.bf16.mxu1 %v3816_v29  ;;  %v1720_v33 = vsel %vm837_vm1, %v4192_v30, 0.0 }
 0x54c   : > { %3624 = vmatprep.mubr.msk.f32.mxu1 %vm837_vm1, %v4194_v31  ;;  %1721 = vadd.xlane.f32.xlu1 %v1720_v33  ;;  %v1717_v37 = vsel %vm837_vm1, %v4194_v31, 0.0 }
 0x54d   : > { %3625 = vmatmul.mubr.msk.f32.vlgmr.msra.gmra.mrb[18].mxu1 %vm837_vm1, %v4192_v30  ;;  %1706 = vadd.xlane.f32.xlu0 %v1705_v34 }
 0x54e   : > { %v4196_v35 = vpop.eup %4195  ;;  %3819 = vmatpush3.bf16.msra.mxu1 %v3816_v29  ;;  %3632 = vmatmul.mubr.msk.f32.vlgmr.msra.gmra.mrb[14].mxu0 %vm837_vm1, %v4184_v51  ;;  %v2546_v51 = vld [vmem:[#allocation9 + $0x10] sm:$0xff]  ;;  %v2553_v29 = vld [vmem:[#allocation9 + $0x48] sm:$0xff] }
 0x54f   : > { %v4198_v36 = vpop.eup %4197  ;;  %v1732_v25 = vsel %vm837_vm1, %v4196_v35, 0.0  ;;  %3821 = vmatprep.subr.bf16.mxu0 %v3820_v11  ;;  %v3824_v15 = vpack.c.bf16 %v2547_v46, %v2546_v51 }
 0x550   : > { %1733 = vadd.xlane.f32.xlu1 %v1732_v25  ;;  %3638 = vmatprep.mubr.msk.f32.mxu1 %vm837_vm1, %v4198_v36  ;;  %v1729_v48 = vsel %vm837_vm1, %v4198_v36, 0.0 }
 0x551   : > { %1718 = vadd.xlane.f32.xlu0 %v1717_v37  ;;  %3639 = vmatmul.mubr.msk.f32.vlgmr.msra.gmra.mrb[20].mxu1 %vm837_vm1, %v4196_v35  ;;  %v3836_v35 = vpack.c.bf16 %v2553_v29, %v2552_v27 }
 0x552   : > { %2792 = vmatprep.mubr.f32.mxu1 %v4482_v4  ;;  %3823 = vmatpush3.bf16.msra.mxu0 %v3820_v11 }
 0x553   : > { %3825 = vmatprep.subr.bf16.mxu0 %v3824_v15 }
 0x554   : > { %1691 = vadd.xlane.f32.xlu1 %v1690_v47  ;;  %v2554_v47 = vld [vmem:[#allocation9 + $0x50] sm:$0xff] }
 0x555   : > { %1730 = vadd.xlane.f32.xlu0 %v1729_v48  ;;  %v2555_v48 = vld [vmem:[#allocation9 + $0x58] sm:$0xff] }
 0x556   : > { %3827 = vmatpush3.bf16.msra.mxu0 %v3824_v15 }
 0x557   : > { %3829 = vmatprep.subr.bf16.mxu0 %v3828_v57 }
 0x559   : > { %1688 = vadd.xlane.f32.xlu0 %v1687_v50 }
 0x55a   : > { %3831 = vmatpush3.bf16.msra.mxu0 %v3828_v57 }
 0x55b   : > { %3833 = vmatprep.subr.bf16.mxu0 %v3832_v14 }
 0x55e   : > { %3835 = vmatpush3.bf16.msra.mxu0 %v3832_v14 }
 0x55f   : > { %3837 = vmatprep.subr.bf16.mxu0 %v3836_v35 }
 0x562   : > { %3839 = vmatpush3.bf16.msra.mxu0 %v3836_v35  ;;  %v2685_v35 = vld [vmem:[#allocation10 + $0x8] sm:$0xff] }
 0x59a   : > { %v3591_v44 = vpop.f32.mrb[8].mxu0 }
 0x59b   : > { %v1813_v26 = vpop.f32.mrb[9].mxu0 }
 0x5b4   : > { %v1698_v45 = vpop.xlane.xlu1 %1697 }
 0x5b8   : > { %v1695_v52 = vpop.xlane.xlu0 %1694 }
 0x5c9   : > { %v1716_v56 = vpop.xlane.xlu1 %1715 }
 0x5ca   : > { %v1713_v55 = vpop.xlane.xlu0 %1712 }
 0x5ce   : > { %v1704_v58 = vpop.xlane.xlu0 %1703 }
 0x5d1   : > { %v1728_v39 = vpop.xlane.xlu1 %1727 }
 0x5d2   : > { %v1701_v60 = vpop.xlane.xlu0 %1700 }
 0x5d5   : > { %v1710_v61 = vpop.xlane.xlu1 %1709 }
 0x5d6   : > { %v1725_v32 = vpop.xlane.xlu0 %1724 }
 0x5d9   : > { %v1722_v13 = vpop.xlane.xlu1 %1721 }
 0x5da   : > { %v1707_v62 = vpop.xlane.xlu0 %1706 }
 0x5dd   : > { %v5123_v63 = vpop.xlane.xlu1 %1733 }
 0x5de   : > { %v5125_v0 = vpop.xlane.xlu0 %1718 }
 0x5e1   : > { %v1692_v1 = vpop.xlane.xlu1 %1691 }
 0x5e2   : > { %4199 = vrcp.f32 %v1692_v1  ;;  %v5127_v12 = vpop.xlane.xlu0 %1730 }
 0x5e6   : > { %v1689_v53 = vpop.xlane.xlu0 %1688 }
 0x5e7   : > { %4201 = vrcp.f32 %v1689_v53  ;;  %v2558_v53 = vld [vmem:[#allocation9 + $0x70] sm:$0xff] }
 0x5e8   : > { %4203 = vrcp.f32 %v1698_v45 }
 0x5e9   : > { %4205 = vrcp.f32 %v1695_v52  ;;  %v3840_v52 = vpack.c.bf16 %v2555_v48, %v2554_v47  ;;  %v2686_v47 = vld [vmem:[#allocation10 + $0x10] sm:$0xff]  ;;  %v2689_v48 = vld [vmem:[#allocation10 + $0x28] sm:$0xff] }
 0x5ea   : > { %4207 = vrcp.f32 %v1704_v58  ;;  %v2556_v58 = vld [vmem:[#allocation9 + $0x60] sm:$0xff] }
 0x5eb   : > { %4209 = vrcp.f32 %v1716_v56  ;;  %3841 = vmatprep.subr.bf16.mxu0 %v3840_v52 }
 0x5ec   : > { %v4200_v54 = vpop.eup %4199  ;;  %4211 = vrcp.f32 %v1701_v60  ;;  %3843 = vmatpush3.bf16.msra.mxu0 %v3840_v52  ;;  %v2688_v52 = vld [vmem:[#allocation10 + $0x20] sm:$0xff] }
 0x5ed   : > { %v2448_v2 = vmul.f32 %v4200_v54, %v3591_v44  ;;  %4213 = vrcp.f32 %v1713_v55  ;;  %v2559_v54 = vld [vmem:[#allocation9 + $0x78] sm:$0xff] }
 0x5ee   : > { %4215 = vrcp.f32 %v1710_v61 }
 0x5ef   : > { %2464 = vst.msk [vmem:[#allocation3 + $0x8] sm:$0xff] %vm837_vm1, %v2448_v2  ;;  %4217 = vrcp.f32 %v1707_v62 }
 0x5f0   : > { %4219 = vrcp.f32 %v1722_v13 }
 0x5f1   : > { %v4202_v3 = vpop.eup %4201  ;;  %4221 = vrcp.f32 %v1728_v39  ;;  %v2557_v39 = vld [vmem:[#allocation9 + $0x68] sm:$0xff] }
 0x5f2   : > { %v2447_v40 = vmul.f32 %v4202_v3, %v1813_v26  ;;  %v4204_v41 = vpop.eup %4203  ;;  %4223 = vrcp.f32 %v1725_v32  ;;  %v3844_v62 = vpack.c.bf16 %v2557_v39, %v2556_v58 }
 0x5f3   : > { %v4206_v6 = vpop.eup %4205  ;;  %4225 = vrcp.f32 %v5123_v63 }
 0x5f4   : > { %2463 = vst.msk [vmem:[#allocation3] sm:$0xff] %vm837_vm1, %v2447_v40  ;;  %v4208_v18 = vpop.eup %4207  ;;  %4227 = vrcp.f32 %v5125_v0  ;;  %3845 = vmatprep.subr.bf16.mxu0 %v3844_v62 }
 0x5f5   : > { %v4210_v23 = vpop.eup %4209  ;;  %4229 = vrcp.f32 %v5127_v12  ;;  %v3848_v12 = vpack.c.bf16 %v2559_v54, %v2558_v53  ;;  %3847 = vmatpush3.bf16.msra.mxu0 %v3844_v62 }
 0x5f6   : > { %v4212_v24 = vpop.eup %4211 }
 0x5f7   : > { %v4214_v30 = vpop.eup %4213  ;;  %3849 = vmatprep.subr.bf16.mxu0 %v3848_v12 }
 0x5f8   : > { %v4216_v25 = vpop.eup %4215 }
 0x5f9   : > { %v4218_v50 = vpop.eup %4217  ;;  %3851 = vmatpush3.bf16.msra.mxu0 %v3848_v12  ;;  %v2697_v12 = vld [vmem:[#allocation10 + $0x68] sm:$0xff] }
 0x5fa   : > { %v4220_v55 = vpop.eup %4219 }
 0x5fb   : > { %v4222_v60 = vpop.eup %4221 }
 0x5fc   : > { %v4224_v63 = vpop.eup %4223 }
 0x5fd   : > { %v4226_v3 = vpop.eup %4225 }
 0x5fe   : > { %v3598_v5 = vpop.f32.mrb[14].mxu1 }
 0x5ff   : > { %v2450_v7 = vmul.f32 %v4204_v41, %v3598_v5  ;;  %v1900_v8 = vpop.f32.mrb[15].mxu1 }
 0x600   : > { %v2449_v9 = vmul.f32 %v4206_v6, %v1900_v8  ;;  %v4228_v6 = vpop.eup %4227 }
 0x601   : > { %2469 = vrot.lane.b32.xlu1 %v2450_v7, %s4487_s18  ;;  %v4230_v8 = vpop.eup %4229 }
 0x602   : > { %2467 = vrot.lane.b32.xlu0 %v2449_v9, %s4487_s18 }
 0x614   : > { %v3605_v19 = vpop.f32.mrb[10].mxu0 }
 0x615   : > { %v2452_v21 = vmul.f32 %v4208_v18, %v3605_v19  ;;  %v1987_v22 = vpop.f32.mrb[11].mxu0 }
 0x616   : > { %v2451_v31 = vmul.f32 %v4212_v24, %v1987_v22 }
 0x617   : > { %2480 = vrot.lane.b32.xlu1 %v2452_v21, %s4484_s17 }
 0x618   : > { %v3619_v43 = vpop.f32.mrb[12].mxu0 }
 0x619   : > { %v2456_v33 = vmul.f32 %v4210_v23, %v3619_v43  ;;  %v2161_v34 = vpop.f32.mrb[13].mxu0  ;;  %v3307_v23 = vld [vmem:[%s5378_s6] ss:$0 sm:$0xff] }
 0x61a   : > { %v2455_v36 = vmul.f32 %v4214_v30, %v2161_v34  ;;  %v4251_v30 = vld [vmem:[%s4786_s12 + $0x8] sm:$0xff] }
 0x61b   : > { %2478 = vrot.lane.b32.xlu1 %v2451_v31, %s4484_s17  ;;  %s4395_s17 = scalar_lea.vmem %s5322_s10, 256 }
 0x61c   : > { %v3612_v37 = vpop.f32.mrb[16].mxu1  ;;  %2500 = vrot.lane.b32.xlu0 %v2455_v36, %s4486_s23  ;;  %v2687_v36 = vld [vmem:[#allocation10 + $0x18] sm:$0xff]  ;;  %p4396_p3 = scmp.ne.s32.totalorder %s5322_s10, %s4395_s17 }
 0x61d   : > { %v2454_v44 = vmul.f32 %v4216_v25, %v3612_v37  ;;  %v2074_v26 = vpop.f32.mrb[17].mxu1  ;;  %v2684_v25 = vld [vmem:[#allocation10] sm:$0xff]  ;;  %v5159_v37 = vpack.c.bf16 %v2687_v36, %v2685_v35 }
 0x61e   : > { %v2453_v45 = vmul.f32 %v4218_v50, %v2074_v26  ;;  %v2691_v50 = vld [vmem:[#allocation10 + $0x38] sm:$0xff]  ;;  %v2825_v35 = vld [vmem:[#allocation12] sm:$0xff]  ;;  %p4397_p5 = pnand %p4396_p3, %p4725_p10 }
 0x61f   : > { %2502 = vrot.lane.b32.xlu1 %v2456_v33, %s4486_s23  ;;  %v4252_v33 = vld [vmem:[%s4786_s12] sm:$0xff]  ;;  %v5163_v26 = vpack.c.bf16 %v2691_v50, %v2689_v48  ;;  %3853 = vmatprep.subr.bf16.mxu1 %v5159_v37  ;;  %v2844_v48 = vld [vmem:[#allocation12 + $0x98] sm:$0xff]  ;;  %s5417_s23 = sld [smem:[#allocation22_spill]]  ;;  %s3317_s12 = sshll.u32 %s4584_s29, 8 }
 0x620   : > { %v3626_v56 = vpop.f32.mrb[18].mxu1  ;;  %2489 = vrot.lane.b32.xlu0 %v2453_v45, %s4489_s14  ;;  %v2690_v45 = vld [vmem:[#allocation10 + $0x30] sm:$0xff]  ;;  %p4398_p7 = pneg %p4397_p5  ;;  %s4490_s29 = smov [#allocation13]  }
 0x621   : > { %v2458_v61 = vmul.f32 %v4220_v55, %v3626_v56  ;;  %v3633_v32 = vpop.f32.mrb[14].mxu0  ;;  %v2248_v13 = vpop.f32.mrb[19].mxu1  ;;  %v2693_v55 = vld [vmem:[#allocation10 + $0x48] sm:$0xff]  ;;  %v2695_v56 = vld [vmem:[#allocation10 + $0x58] sm:$0xff]  ;;  %v5167_v58 = vpack.c.bf16 %v2690_v45, %v2688_v52  ;;  %v2827_v45 = vld [vmem:[#allocation12 + $0x10] sm:$0xff] }
 0x622   : > { %v2460_v0 = vmul.f32 %v4222_v60, %v3633_v32  ;;  %v2335_v1 = vpop.f32.mrb[15].mxu0  ;;  %v2457_v7 = vmul.f32 %v4228_v6, %v2248_v13  ;;  %v5170_v39 = vpack.c.bf16 %v2695_v56, %v2693_v55  ;;  %v2692_v60 = vld [vmem:[#allocation10 + $0x40] sm:$0xff]  ;;  %v2828_v55 = vld [vmem:[#allocation12 + $0x18] sm:$0xff] }
 0x623   : > { %v2459_v2 = vmul.f32 %v4224_v63, %v2335_v1  ;;  %2491 = vrot.lane.b32.xlu1 %v2454_v44, %s4489_s14  ;;  %v5161_v44 = vpack.c.bf16 %v2686_v47, %v2684_v25  ;;  %v2826_v25 = vld [vmem:[#allocation12 + $0x8] sm:$0xff]  ;;  %v2843_v47 = vld [vmem:[#allocation12 + $0x90] sm:$0xff]  ;;  %v2845_v56 = vld [vmem:[#allocation12 + $0xa0] sm:$0xff]  ;;  %s5418_s14 = sld [smem:[#allocation23_spill]] }
 0x624   : > { %v3640_v40 = vpop.f32.mrb[20].mxu1  ;;  %v5220_v50 = vpack.c.bf16 %v2826_v25, %v2825_v35  ;;  %v5222_v52 = vpack.c.bf16 %v2844_v48, %v2843_v47  ;;  %v2839_v25 = vld [vmem:[#allocation12 + $0x70] sm:$0xff]  ;;  %v2840_v47 = vld [vmem:[#allocation12 + $0x78] sm:$0xff] }
 0x625   : > { %v2462_v41 = vmul.f32 %v4226_v3, %v3640_v40  ;;  %2522 = vrot.lane.b32.xlu0 %v2459_v2, %s4488_s25  ;;  %v2422_v5 = vpop.f32.mrb[21].mxu1  ;;  %3855 = vmatpush1.bf16.msra.mxu1 %v5161_v44  ;;  %v2699_v3 = vld [vmem:[#allocation10 + $0x78] sm:$0xff]  ;;  %v3914_v48 = vpack.c.bf16 %v2840_v47, %v2839_v25 }
 0x626   : > { %v2461_v9 = vmul.f32 %v4230_v8, %v2422_v5  ;;  %3857 = vmatprep.subr.bf16.mxu1 %v5163_v26  ;;  %v5187_v40 = vpack.c.bf16 %v2699_v3, %v2697_v12  ;;  %v2698_v5 = vld [vmem:[#allocation10 + $0x70] sm:$0xff]  ;;  %v2703_v8 = vld [vmem:[#allocation10 + $0x98] sm:$0xff] }
 0x627   : > { %2524 = vrot.lane.b32.xlu1 %v2460_v0, %s4488_s25 }
 0x629   : > { %2511 = vrot.lane.b32.xlu0 %v2457_v7, %s4483_s19  ;;  %3859 = vmatpush1.bf16.msra.mxu1 %v5167_v58  ;;  %v2701_v7 = vld [vmem:[#allocation10 + $0x88] sm:$0xff] }
 0x62a   : > { %3861 = vmatprep.subr.bf16.mxu1 %v5170_v39 }
 0x62b   : > { %2513 = vrot.lane.b32.xlu1 %v2458_v61, %s4483_s19  ;;  %v2694_v61 = vld [vmem:[#allocation10 + $0x50] sm:$0xff]  ;;  %s5416_s19 = sld [smem:[#allocation21_spill]] }
 0x62c   : > { %v5173_v32 = vpack.c.bf16 %v2694_v61, %v2692_v60  ;;  %v2846_v60 = vld [vmem:[#allocation12 + $0xa8] sm:$0xff] }
 0x62d   : > { %2533 = vrot.lane.b32.xlu0 %v2461_v9, %s4485_s20  ;;  %v5193_v9 = vpack.c.bf16 %v2703_v8, %v2701_v7  ;;  %v5229_v61 = vpack.c.bf16 %v2846_v60, %v2845_v56  ;;  %v3308_v7 = vld [vmem:[%s5379_s7] ss:$0 sm:$0xff] }
 0x62e   : > { %3863 = vmatpush1.bf16.msra.mxu1 %v5173_v32 }
 0x62f   : > { %2535 = vrot.lane.b32.xlu1 %v2462_v41, %s4485_s20  ;;  %v2696_v41 = vld [vmem:[#allocation10 + $0x60] sm:$0xff]  ;;  %3865 = vmatprep.subr.bf16.mxu1 %v5187_v40  ;;  %s4399_s20 = sshll.u32 %s4490_s29, 4  ;;  %s4400_s20 = int_to_ptr.vmem [resolvable:$false] %s4399_s20 }
 0x630   : > { %v5189_v6 = vpack.c.bf16 %v2698_v5, %v2696_v41  ;;  %p4402_p12 = scmp.lt.s32.totalorder %s5322_s10, %s4400_s20 }
 0x632   : > { %3867 = vmatpush1.bf16.msra.mxu1 %v5189_v6 }
 0x633   : > { %3869 = vmatprep.subr.bf16.mxu1 %v5193_v9 }
 0x673   : > { %v2470_v10 = vpop.permute.xlu1 %2469 }
 0x674   : > { %2475 = vst.msk [vmem:[#allocation3 + $0x8] sm:$0xff] %vm2473_vm4, %v2470_v10  ;;  %v2468_v49 = vpop.permute.xlu0 %2467  ;;  %v2700_v10 = vld [vmem:[#allocation10 + $0x80] sm:$0xff] }
 0x675   : > { %2474 = vst.msk [vmem:[#allocation3] sm:$0xff] %vm2473_vm4, %v2468_v49  ;;  %v2702_v49 = vld [vmem:[#allocation10 + $0x90] sm:$0xff] }
 0x689   : > { %v2481_v11 = vpop.permute.xlu1 %2480 }
 0x68a   : > { %2486 = vst.msk [vmem:[#allocation3 + $0x8] sm:$0xff] %vm2484_vm5, %v2481_v11  ;;  %v5195_v11 = vpack.c.bf16 %v2702_v49, %v2700_v10  ;;  %v3309_v10 = vld [vmem:[%s5416_s19] ss:$0 sm:$0xff]  ;;  %s5327_s19 = scalar_lea.hbm %s5419_s3, %s3317_s12 }
 0x68c   : > { %3871 = vmatpush1.bf16.msra.mxu1 %v5195_v11 }
 0x68d   : > { %v2479_v51 = vpop.permute.xlu1 %2478 }
 0x68e   : > { %2485 = vst.msk [vmem:[#allocation3] sm:$0xff] %vm2484_vm5, %v2479_v51  ;;  %v2501_v46 = vpop.permute.xlu0 %2500  ;;  %v2705_v51 = vld [vmem:[#allocation10 + $0xa8] sm:$0xff] }
 0x691   : > { %v2503_v15 = vpop.permute.xlu1 %2502 }
 0x692   : > { %v2490_v16 = vpop.permute.xlu0 %2489 }
 0x693   : > { %2496 = vst.msk [vmem:[#allocation3] sm:$0xff] %vm2495_vm6, %v2490_v16  ;;  %v2704_v16 = vld [vmem:[#allocation10 + $0xa0] sm:$0xff] }
 0x694   : > { %2507 = vst.msk [vmem:[#allocation3] sm:$0xff] %vm2506_vm7, %v2501_v46  ;;  %v2707_v46 = vld [vmem:[#allocation10 + $0xb8] sm:$0xff] }
 0x695   : > { %v2492_v17 = vpop.permute.xlu1 %2491 }
 0x696   : > { %2497 = vst.msk [vmem:[#allocation3 + $0x8] sm:$0xff] %vm2495_vm6, %v2492_v17  ;;  %v2706_v17 = vld [vmem:[#allocation10 + $0xb0] sm:$0xff] }
 0x697   : > { %v2523_v57 = vpop.permute.xlu0 %2522  ;;  %2508 = vst.msk [vmem:[#allocation3 + $0x8] sm:$0xff] %vm2506_vm7, %v2503_v15  ;;  %v5199_v15 = vpack.c.bf16 %v2707_v46, %v2705_v51 }
 0x699   : > { %v2525_v18 = vpop.permute.xlu1 %2524  ;;  %3873 = vmatprep.subr.bf16.mxu1 %v5199_v15 }
 0x69b   : > { %v2512_v19 = vpop.permute.xlu0 %2511 }
 0x69c   : > { %2518 = vst.msk [vmem:[#allocation3] sm:$0xff] %vm2517_vm8, %v2512_v19  ;;  %v2711_v19 = vld [vmem:[#allocation10 + $0xd8] sm:$0xff] }
 0x69d   : > { %v2514_v59 = vpop.permute.xlu1 %2513  ;;  %2529 = vst.msk [vmem:[#allocation3] sm:$0xff] %vm2528_vm9, %v2523_v57  ;;  %v2709_v57 = vld [vmem:[#allocation10 + $0xc8] sm:$0xff] }
 0x69e   : > { %2519 = vst.msk [vmem:[#allocation3 + $0x8] sm:$0xff] %vm2517_vm8, %v2514_v59  ;;  %v2708_v59 = vld [vmem:[#allocation10 + $0xc0] sm:$0xff] }
 0x69f   : > { %v2534_v20 = vpop.permute.xlu0 %2533  ;;  %2530 = vst.msk [vmem:[#allocation3 + $0x8] sm:$0xff] %vm2528_vm9, %v2525_v18  ;;  %v5201_v18 = vpack.c.bf16 %v2706_v17, %v2704_v16 }
 0x6a0   : > { %2540 = vst.msk [vmem:[#allocation3] sm:$0xff] %vm2539_vm10, %v2534_v20  ;;  %v2710_v20 = vld [vmem:[#allocation10 + $0xd0] sm:$0xff] }
 0x6a1   : > { %v2536_v21 = vpop.permute.xlu1 %2535  ;;  %3875 = vmatpush1.bf16.msra.mxu1 %v5201_v18 }
 0x6a2   : > { %2541 = vst.msk [vmem:[#allocation3 + $0x8] sm:$0xff] %vm2539_vm10, %v2536_v21  ;;  %v5204_v21 = vpack.c.bf16 %v2711_v19, %v2709_v57  ;;  %v2852_v19 = vld [vmem:[#allocation12 + $0xd8] sm:$0xff] }
 0x6a4   : > { %3877 = vmatprep.subr.bf16.mxu1 %v5204_v21 }
 0x6a7   : > { %v2542_v22 = vld [vmem:[#allocation3] sm:$0xff] }
 0x6a8   : > { %3673 = vmatprep.mubr.f32.mxu0 %v2542_v22  ;;  %v2713_v22 = vld [vmem:[#allocation10 + $0xe8] sm:$0xff] }
 0x6a9   : > { %v2543_v14 = vld [vmem:[#allocation3 + $0x8] sm:$0xff] }
 0x6aa   : > { %3674 = vmatmul.mubr.f32.vlgmr.msra.gmra.mrb[16].mxu0 %v2543_v14  ;;  %v2715_v14 = vld [vmem:[#allocation10 + $0xf8] sm:$0xff] }
 0x77d   : > { %v3675_v24 = vpop.f32.mrb[16].mxu0 }
 0x77e   : > { %v2639_v43 = vadd.f32 %v3675_v24, %v3307_v23  ;;  %v2633_v27 = vpop.f32.mrb[17].mxu0  ;;  %v5210_v24 = vpack.c.bf16 %v2715_v14, %v2713_v22  ;;  %v2853_v14 = vld [vmem:[#allocation12 + $0xe0] sm:$0xff] }
 0x77f   : > { %v2634_v29 = vadd.f32 %v3307_v23, %v2633_v27  ;;  %v5207_v23 = vpack.c.bf16 %v2710_v20, %v2708_v59  ;;  %v2714_v27 = vld [vmem:[#allocation10 + $0xf0] sm:$0xff] }
 0x780   : > { %v5152_v31 = vadd.f32 %v4251_v30, %v2639_v43  ;;  %v2712_v43 = vld [vmem:[#allocation10 + $0xe0] sm:$0xff]  ;;  %v2835_v20 = vld [vmem:[#allocation12 + $0x50] sm:$0xff] }
 0x781   : > { %v5155_v34 = vadd.f32 %v4252_v33, %v2634_v29  ;;  %3879 = vmatpush1.bf16.msra.mxu1 %v5207_v23  ;;  %v5213_v29 = vpack.c.bf16 %v2714_v27, %v2712_v43  ;;  %v2841_v30 = vld [vmem:[#allocation12 + $0x80] sm:$0xff]  ;;  %v2842_v33 = vld [vmem:[#allocation12 + $0x88] sm:$0xff] }
 0x782   : > { %2648 = vadd.xlane.f32.xlu1 %v5152_v31  ;;  %3881 = vmatprep.subr.bf16.mxu1 %v5210_v24  ;;  %v5218_v36 = vpack.c.bf16 %v2842_v33, %v2841_v30  ;;  %v2837_v43 = vld [vmem:[#allocation12 + $0x60] sm:$0xff]  ;;  %v2838_v27 = vld [vmem:[#allocation12 + $0x68] sm:$0xff]  ;;  %v2855_v30 = vld [vmem:[#allocation12 + $0xf0] sm:$0xff] }
 0x783   : > { %2646 = vadd.xlane.f32.xlu0 %v5155_v34  ;;  %v2856_v33 = vld [vmem:[#allocation12 + $0xf8] sm:$0xff] }
 0x784   : > { %3885 = vmatprep.subr.bf16.mxu0 %v5218_v36  ;;  %v3912_v35 = vpack.c.bf16 %v2856_v33, %v2855_v30 }
 0x785   : > { %3883 = vmatpush1.bf16.msra.mxu1 %v5213_v29  ;;  %3887 = vmatpush3.bf16.msra.mxu0 %v5220_v50 }
 0x786   : > { %3917 = vmatprep.subr.bf16.mxu1 %v5159_v37  ;;  %v5226_v37 = vpack.c.bf16 %v2828_v55, %v2827_v45  ;;  %3889 = vmatprep.subr.bf16.mxu0 %v5222_v52  ;;  %v2716_v45 = vld [vmem:[%s5417_s23] sm:$0x3]  ;;  %s4401_s23 = scalar_lea.vmem %s4400_s20, 512 }
 0x787   : > { %v5288_v55 = vrot.slane %v2716_v45, %v612_v28  ;;  %v5292_v56 = vrot.slane %v2716_v45, %v616_v42  ;;  %p4403_p2 = scmp.lt.s32.totalorder %s4401_s23, %s4395_s17 }
 0x789   : > { %3891 = vmatpush3.bf16.msra.mxu0 %v5226_v37  ;;  %p4404_p1 = por %p4403_p2, %p4402_p12 }
 0x78a   : > { %3893 = vmatprep.subr.bf16.mxu0 %v5229_v61 }
 0x78b   : > { %p4405_p13 = pnand %p4404_p1, %p4398_p7 }
 0x80f   : > { %v2649_v13 = vpop.xlane.xlu1 %2648 }
 0x810   : > { %v2647_v62 = vpop.xlane.xlu0 %2646  ;;  %v2651_v63 = vmul.f32 0.0078125, %v2649_v13  ;;  %v2829_v13 = vld [vmem:[#allocation12 + $0x20] sm:$0xff] }
 0x811   : > { %v2650_v0 = vmul.f32 0.0078125, %v2647_v62  ;;  %v2830_v62 = vld [vmem:[#allocation12 + $0x28] sm:$0xff] }
 0x812   : > { %v5181_v53 = vsub.f32 %v5152_v31, %v2651_v63  ;;  %v5232_v63 = vpack.c.bf16 %v2830_v62, %v2829_v13 }
 0x813   : > { %v5178_v1 = vsub.f32 %v5155_v34, %v2650_v0 }
 0x814   : > { %v2655_v2 = vmul.f32 %v5181_v53, %v5181_v53  ;;  %3895 = vmatpush3.bf16.msra.mxu0 %v5232_v63 }
 0x815   : > { %v2654_v54 = vmul.f32 %v5178_v1, %v5178_v1 }
 0x817   : > { %2656 = vadd.xlane.f32.xlu0 %v2654_v54 }
 0x81b   : > { %2658 = vadd.xlane.f32.xlu0 %v2655_v2 }
 0x8a4   : > { %v2657_v0 = vpop.xlane.xlu0 %2656 }
 0x8a5   : > { %v2660_v54 = vmul.f32 0.0078125, %v2657_v0 }
 0x8a7   : > { %v2662_v2 = vadd.f32 1e-05, %v2660_v54 }
 0x8a8   : > { %v2659_v12 = vpop.xlane.xlu0 %2658 }
 0x8a9   : > { %4231 = vrsqrt.f32 %v2662_v2  ;;  %v2661_v3 = vmul.f32 0.0078125, %v2659_v12 }
 0x8ab   : > { %v2663_v41 = vadd.f32 1e-05, %v2661_v3 }
 0x8ad   : > { %4233 = vrsqrt.f32 %v2663_v41 }
 0x8b3   : > { %v4232_v5 = vpop.eup %4231 }
 0x8b4   : > { %v2666_v8 = vmul.f32 %v4232_v5, %v5178_v1 }
 0x8b6   : > { %v2674_v49 = vmul.f32 %v3308_v7, %v2666_v8 }
 0x8b7   : > { %v4234_v51 = vpop.eup %4233 }
 0x8b8   : > { %v2682_v46 = vadd.f32 %v3309_v10, %v2674_v49  ;;  %v2667_v16 = vmul.f32 %v4234_v51, %v5181_v53  ;;  %v2849_v53 = vld [vmem:[#allocation12 + $0xc0] sm:$0xff] }
 0x8ba   : > { %2793 = vmatmul.mubr.f32.vlgmr.msra.gmra.mrb[22].mxu1 %v2682_v46  ;;  %v2675_v17 = vmul.f32 %v3308_v7, %v2667_v16 }
 0x8bb   : > { %2798 = vmatprep.mubr.f32.mxu1 %v4482_v4  ;;  %3919 = vmatpush1.bf16.msra.mxu1 %v5161_v44  ;;  %v2847_v44 = vld [vmem:[#allocation12 + $0xb0] sm:$0xff] }
 0x8bc   : > { %v2683_v57 = vadd.f32 %v3309_v10, %v2675_v17  ;;  %3921 = vmatprep.subr.bf16.mxu1 %v5163_v26  ;;  %v2848_v26 = vld [vmem:[#allocation12 + $0xb8] sm:$0xff] }
 0x8be   : > { %2799 = vmatmul.mubr.f32.gmra.mrb[24].mxu1 %v2683_v57 }
 0x8bf   : > { %3923 = vmatpush1.bf16.msra.mxu1 %v5167_v58  ;;  %3003 = vmatprep.mubr.f32.mxu1 %v4482_v4  ;;  %v5261_v58 = vpack.c.bf16 %v2848_v26, %v2847_v44 }
 0x8c0   : > { %3925 = vmatprep.subr.bf16.mxu1 %v5170_v39  ;;  %v2831_v39 = vld [vmem:[#allocation12 + $0x30] sm:$0xff] }
 0x8c1   : > { %3897 = vmatprep.subr.bf16.mxu0 %v5261_v58 }
 0x8c3   : > { %3927 = vmatpush1.bf16.msra.mxu1 %v5173_v32  ;;  %v2832_v32 = vld [vmem:[#allocation12 + $0x38] sm:$0xff] }
 0x8c4   : > { %3929 = vmatprep.subr.bf16.mxu1 %v5187_v40  ;;  %v5263_v1 = vpack.c.bf16 %v2832_v32, %v2831_v39  ;;  %v2850_v40 = vld [vmem:[#allocation12 + $0xc8] sm:$0xff] }
 0x8c6   : > { %3899 = vmatpush3.bf16.msra.mxu0 %v5263_v1 }
 0x8c7   : > { %3931 = vmatpush1.bf16.msra.mxu1 %v5189_v6  ;;  %v5267_v6 = vpack.c.bf16 %v2850_v40, %v2849_v53 }
 0x8c8   : > { %3933 = vmatprep.subr.bf16.mxu1 %v5193_v9  ;;  %v2833_v9 = vld [vmem:[#allocation12 + $0x40] sm:$0xff] }
 0x8c9   : > { %3901 = vmatprep.subr.bf16.mxu0 %v5267_v6 }
 0x8cb   : > { %3935 = vmatpush1.bf16.msra.mxu1 %v5195_v11  ;;  %v2834_v11 = vld [vmem:[#allocation12 + $0x48] sm:$0xff] }
 0x8cc   : > { %3937 = vmatprep.subr.bf16.mxu1 %v5199_v15  ;;  %v5269_v15 = vpack.c.bf16 %v2834_v11, %v2833_v9 }
 0x8ce   : > { %3903 = vmatpush3.bf16.msra.mxu0 %v5269_v15 }
 0x8cf   : > { %3939 = vmatpush1.bf16.msra.mxu1 %v5201_v18  ;;  %v2851_v18 = vld [vmem:[#allocation12 + $0xd0] sm:$0xff] }
 0x8d0   : > { %3941 = vmatprep.subr.bf16.mxu1 %v5204_v21  ;;  %v5273_v59 = vpack.c.bf16 %v2852_v19, %v2851_v18  ;;  %v2836_v21 = vld [vmem:[#allocation12 + $0x58] sm:$0xff] }
 0x8d1   : > { %v5275_v22 = vpack.c.bf16 %v2836_v21, %v2835_v20 }
 0x8d2   : > { %3905 = vmatprep.subr.bf16.mxu0 %v5273_v59 }
 0x8d3   : > { %3943 = vmatpush1.bf16.msra.mxu1 %v5207_v23  ;;  %3907 = vmatpush3.bf16.msra.mxu0 %v5275_v22  ;;  %v2854_v23 = vld [vmem:[#allocation12 + $0xe8] sm:$0xff] }
 0x8d4   : > { %3945 = vmatprep.subr.bf16.mxu1 %v5210_v24  ;;  %v5279_v24 = vpack.c.bf16 %v2854_v23, %v2853_v14 }
 0x8d6   : > { %3909 = vmatprep.subr.bf16.mxu0 %v5279_v24 }
 0x8d7   : > { %3947 = vmatpush1.bf16.msra.mxu1 %v5213_v29  ;;  %v3910_v29 = vpack.c.bf16 %v2838_v27, %v2837_v43 }
 0x8d9   : > { %3911 = vmatpush3.bf16.msra.mxu0 %v3910_v29 }
 0x8da   : > { %3913 = vmatprep.subr.bf16.mxu0 %v3912_v35 }
 0x8dd   : > { %3915 = vmatpush3.bf16.msra.mxu0 %v3914_v48 }
 0x8de   : > { %3949 = vmatprep.subr.bf16.mxu0 %v5218_v36 }
 0x98d   : > { %v2794_v60 = vpop.f32.mrb[22].mxu1 }
 0x98e   : > { %v2795_v13 = vadd.f32 %v2794_v60, %v5288_v55  ;;  %v2796_v62 = vpop.f32.mrb[23].mxu1 }
 0x98f   : > { %v2797_v0 = vadd.f32 %v2796_v62, %v5292_v56 }
 0x990   : > { %v2809_v54 = vmul.f32 0.70710677, %v2795_v13  ;;  %v2805_v49 = vmul.f32 0.5, %v2795_v13 }
 0x991   : > { %v2810_v36 = vmul.f32 0.70710677, %v2797_v0  ;;  %v2800_v2 = vpop.f32.mrb[24].mxu1  ;;  %v2806_v8 = vmul.f32 0.5, %v2797_v0 }
 0x992   : > { %4235 = verf.f32 %v2809_v54  ;;  %v2801_v12 = vadd.f32 %v2800_v2, %v5288_v55  ;;  %v2802_v3 = vpop.f32.mrb[25].mxu1 }
 0x993   : > { %4237 = verf.f32 %v2810_v36  ;;  %v2803_v28 = vadd.f32 %v2802_v3, %v5292_v56 }
 0x994   : > { %v2811_v41 = vmul.f32 0.70710677, %v2801_v12  ;;  %v2807_v39 = vmul.f32 0.5, %v2801_v12 }
 0x995   : > { %v2812_v38 = vmul.f32 0.70710677, %v2803_v28  ;;  %v2808_v44 = vmul.f32 0.5, %v2803_v28 }
 0x996   : > { %4239 = verf.f32 %v2811_v41 }
 0x997   : > { %4241 = verf.f32 %v2812_v38 }
 0x99c   : > { %v4236_v42 = vpop.eup %4235 }
 0x99d   : > { %v4238_v5 = vpop.eup %4237  ;;  %v2817_v7 = vadd.f32 1.0, %v4236_v42 }
 0x99e   : > { %v2818_v10 = vadd.f32 1.0, %v4238_v5 }
 0x99f   : > { %v2821_v17 = vmul.f32 %v2817_v7, %v2805_v49 }
 0x9a0   : > { %v4240_v51 = vpop.eup %4239  ;;  %v2822_v46 = vmul.f32 %v2818_v10, %v2806_v8 }
 0x9a1   : > { %v4242_v16 = vpop.eup %4241  ;;  %v2819_v57 = vadd.f32 1.0, %v4240_v51 }
 0x9a2   : > { %v2820_v26 = vadd.f32 1.0, %v4242_v16  ;;  %2928 = vmatprep.mubr.f32.mxu0 %v2822_v46 }
 0x9a3   : > { %2929 = vmatmul.mubr.f32.vlgmr.msra.gmra.mrb[18].mxu0 %v2821_v17  ;;  %v2823_v53 = vmul.f32 %v2819_v57, %v2807_v39 }
 0x9a4   : > { %v2824_v32 = vmul.f32 %v2820_v26, %v2808_v44  ;;  %3951 = vmatpush3.bf16.msra.mxu0 %v5220_v50 }
 0x9a5   : > { %3953 = vmatprep.subr.bf16.mxu0 %v5222_v52  ;;  %v3310_v52 = vld [vmem:[%s5418_s14] ss:$0 sm:$0xff] }
 0x9a6   : > { %2933 = vmatprep.mubr.f32.mxu0 %v2824_v32 }
 0x9a7   : > { %2934 = vmatmul.mubr.f32.gmra.mrb[20].mxu0 %v2823_v53 }
 0x9a8   : > { %3955 = vmatpush3.bf16.msra.mxu0 %v5226_v37 }
 0x9a9   : > { %3957 = vmatprep.subr.bf16.mxu0 %v5229_v61 }
 0x9ac   : > { %3959 = vmatpush3.bf16.msra.mxu0 %v5232_v63 }
 0x9ad   : > { %3961 = vmatprep.subr.bf16.mxu0 %v5261_v58 }
 0x9b0   : > { %3963 = vmatpush3.bf16.msra.mxu0 %v5263_v1 }
 0x9b1   : > { %3965 = vmatprep.subr.bf16.mxu0 %v5267_v6 }
 0x9b4   : > { %3967 = vmatpush3.bf16.msra.mxu0 %v5269_v15 }
 0x9b5   : > { %3969 = vmatprep.subr.bf16.mxu0 %v5273_v59 }
 0x9b8   : > { %3971 = vmatpush3.bf16.msra.mxu0 %v5275_v22 }
 0x9b9   : > { %3973 = vmatprep.subr.bf16.mxu0 %v5279_v24 }
 0x9bc   : > { %3975 = vmatpush3.bf16.msra.mxu0 %v3910_v29 }
 0x9bd   : > { %3977 = vmatprep.subr.bf16.mxu0 %v3912_v35 }
 0x9c0   : > { %3979 = vmatpush3.bf16.msra.mxu0 %v3914_v48 }
 0xa76   : > { %v3450_v50 = vpop.f32.mrb[18].mxu0 }
 0xa77   : > { %v3451_v37 = vpop.f32.mrb[19].mxu0 }
 0xa78   : > { %v3452_v61 = vadd.f32 %v3451_v37, %v3450_v50 }
 0xa7a   : > { %v2931_v63 = vadd.f32 %v3452_v61, %v3310_v52  ;;  %v3453_v58 = vpop.f32.mrb[20].mxu0 }
 0xa7b   : > { %v3454_v1 = vpop.f32.mrb[21].mxu0 }
 0xa7c   : > { %v3455_v40 = vadd.f32 %v3454_v1, %v3453_v58  ;;  %3004 = vmatmul.mubr.f32.vlgmr.msra.gmra.mrb[26].mxu1 %v2931_v63 }
 0xa7d   : > { %3009 = vmatprep.mubr.f32.mxu1 %v4482_v4 }
 0xa7e   : > { %v2936_v6 = vadd.f32 %v3455_v40, %v3310_v52 }
 0xa80   : > { %3010 = vmatmul.mubr.f32.gmra.mrb[28].mxu1 %v2936_v6 }
 0xb4f   : > { %v3005_v9 = vpop.f32.mrb[26].mxu1 }
 0xb50   : > { %v3006_v11 = vadd.f32 %v3005_v9, %v5288_v55  ;;  %v3007_v15 = vpop.f32.mrb[27].mxu1 }
 0xb51   : > { %v3008_v18 = vadd.f32 %v3007_v15, %v5292_v56 }
 0xb52   : > { %v3020_v19 = vmul.f32 0.70710677, %v3006_v11  ;;  %v3016_v33 = vmul.f32 0.5, %v3006_v11 }
 0xb53   : > { %v3021_v59 = vmul.f32 0.70710677, %v3008_v18  ;;  %v3011_v20 = vpop.f32.mrb[28].mxu1  ;;  %v3017_v29 = vmul.f32 0.5, %v3008_v18 }
 0xb54   : > { %4243 = verf.f32 %v3020_v19  ;;  %v3012_v21 = vadd.f32 %v3011_v20, %v5288_v55  ;;  %v3013_v22 = vpop.f32.mrb[29].mxu1 }
 0xb55   : > { %4245 = verf.f32 %v3021_v59  ;;  %v3014_v14 = vadd.f32 %v3013_v22, %v5292_v56 }
 0xb56   : > { %v3022_v23 = vmul.f32 0.70710677, %v3012_v21  ;;  %v3018_v56 = vmul.f32 0.5, %v3012_v21 }
 0xb57   : > { %v3023_v4 = vmul.f32 0.70710677, %v3014_v14  ;;  %v3019_v55 = vmul.f32 0.5, %v3014_v14 }
 0xb58   : > { %4247 = verf.f32 %v3022_v23 }
 0xb59   : > { %4249 = verf.f32 %v3023_v4 }
 0xb5e   : > { %v4244_v24 = vpop.eup %4243 }
 0xb5f   : > { %v4246_v43 = vpop.eup %4245  ;;  %v3028_v27 = vadd.f32 1.0, %v4244_v24 }
 0xb60   : > { %v3029_v30 = vadd.f32 1.0, %v4246_v43 }
 0xb61   : > { %v3032_v48 = vmul.f32 %v3028_v27, %v3016_v33 }
 0xb62   : > { %v4248_v35 = vpop.eup %4247  ;;  %v3033_v25 = vmul.f32 %v3029_v30, %v3017_v29 }
 0xb63   : > { %v4250_v47 = vpop.eup %4249  ;;  %v3030_v45 = vadd.f32 1.0, %v4248_v35 }
 0xb64   : > { %v3031_v60 = vadd.f32 1.0, %v4250_v47  ;;  %3100 = vmatprep.mubr.f32.mxu0 %v3033_v25 }
 0xb65   : > { %3101 = vmatmul.mubr.f32.vlgmr.msra.gmra.mrb[22].mxu0 %v3032_v48  ;;  %v3034_v62 = vmul.f32 %v3030_v45, %v3018_v56 }
 0xb66   : > { %v3035_v13 = vmul.f32 %v3031_v60, %v3019_v55 }
 0xb68   : > { %3105 = vmatprep.mubr.f32.mxu0 %v3035_v13 }
 0xb69   : > { %3106 = vmatmul.mubr.f32.gmra.mrb[24].mxu0 %v3034_v62 }
 0xc38   : > { %v3488_v0 = vpop.f32.mrb[22].mxu0 }
 0xc39   : > { %v3489_v54 = vpop.f32.mrb[23].mxu0 }
 0xc3a   : > { %v3490_v36 = vadd.f32 %v3489_v54, %v3488_v0 }
 0xc3c   : > { %v3103_v2 = vadd.f32 %v3490_v36, %v3310_v52  ;;  %v3491_v12 = vpop.f32.mrb[24].mxu0 }
 0xc3d   : > { %v3492_v3 = vpop.f32.mrb[25].mxu0 }
 0xc3e   : > { %v3111_v28 = vadd.f32 %v3103_v2, %v5155_v34  ;;  %v3493_v41 = vadd.f32 %v3492_v3, %v3491_v12 }
 0xc40   : > { %3113 = vst [vmem:[%s516_s16] sm:$0xff] %v3111_v28  ;;  %v3108_v38 = vadd.f32 %v3493_v41, %v3310_v52 }
 0xc42   : > { %v3112_v42 = vadd.f32 %v3108_v38, %v5152_v31 }
 0xc44   : > { %3114 = vst [vmem:[%s516_s16 + $0x8] sm:$0xff] %v3112_v42 }
 0xc45   : > { %4408 = shalt.err (!%p4405_p13)
}
 0xc46   : > { %s4409_s18 = scalar_lea.hbm %s5327_s19, 256  ;;  %s4413_s16 = scalar_lea.hbm %s5419_s3, 512 }
 0xc47   : > { %p4410_p9 = scmp.ne.s32.totalorder %s5327_s19, %s4409_s18  ;;  %p4414_p4 = scmp.lt.u32.totalorder %s5327_s19, %s5419_s3 }
 0xc48   : > { %p4415_p8 = scmp.lt.u32.totalorder %s4413_s16, %s4409_s18  ;;  %p4417_p3 = scmp.lt.u32.totalorder %s4409_s18, %s5327_s19 }
 0xc49   : > { %p4411_p0 = pnand %p4410_p9, %p4725_p10 }
 0xc4a   : > { %p4416_p6 = por %p4415_p8, %p4414_p4 }
 0xc4b   : > { %p4412_p11 = pneg %p4411_p0 }
 0xc4c   : > { %p4418_p5 = por %p4417_p3, %p4416_p6 }
 0xc4e   : > { %p4419_p7 = pnand %p4418_p5, %p4412_p11 }
 0xc50   : > { %4422 = shalt.err (!%p4419_p7)
}
 0xc51   : > { %s4491_s21 = smov 128   ;;  %s4492_s17 = smov 8  }
 0xc52   : > { %3998 = dma.vmem_to_hbm [thread:$0]  (%p4725_p10), %s5322_s10, 256, %s5327_s19, %s3116_s22, %s4491_s21, %s4491_s21, %s4492_s17  }
 0xc53 PF: > { %s5420_s29 = sld [smem:[#allocation18_spill]]  ;;  %s5421_s20 = sld [smem:[#allocation19_spill]] }
 0xc54   : > { %p5423_p2 = scmp.ge.s32.totalorder %s4469_s28, 2 }
 0xc59   : > { %s3144_s23 = sand.u32 1, %s5420_s29   ;;  %p5422_p12 = scmp.ne.s32.totalorder %s5421_s20, 0 }
 0xc5a   : > { %s3145_s18 = scalar_lea.sflag [#allocation6], %s3144_s23 }
 0xc5b   : > { %p4018_p1 = pnand %p5423_p2, %p5422_p12 }
 0xc5d   : > { %4452 = dma.done.wait (!%p4018_p1), %s3145_s18, 256  }
 0xc5e   : > { %4454 = vsyncadd (!%p4018_p1), %s3145_s18, 4294967040  ;;  %p28_p13 = scmp.ge.s32.totalorder %s4715_s15, 4   ;;  %s5424_s25 = smov %s4461_s26 }
 0xc5f   : > { %s5425_s26 = smov %s4465_s27  ;;  %s5426_s27 = smov %s4731_s30 }
 0xc60   : > { %s5427_s28 = smov %s4715_s15  ;;  %30 = sbr.rel (!%p28_p13) target bundleno = 13 (0xd), region = 140 }
 0xc67   :  { %3150 = vsyncpa [#allocation5], 1 }
 0xc68   :  { %3152 = vsyncpa [#allocation5 + $0x1], 1 }
 0xc69   :  { %3153 = vsyncpa [#allocation8], 1 }
 0xc6a   :  { %3154 = vsyncpa [#allocation11], 1 }
 0xc6b   :  { %3155 = vsyncpa [#allocation6], 1 }
 0xc6c   :  { %3157 = vsyncpa [#allocation6 + $0x1], 1 }

// kernel: tpu_custom_call.1
= control target key start
LH: loop header
LB: loop body
LE: loop exit
PB: predicated region body
PF: predicated region fallthrough
CT: control target
= control target key end

     0   :  { %s5372_s0 = inlined_call_operand.hbm [shape: f32[2,16,128], index: 0, kind: input, shape index: {}]   ;;  %s5373_s1 = inlined_call_operand.vmem [shape: f32[1,128], index: 1, kind: input, shape index: {}]   ;;  %s5374_s2 = inlined_call_operand.vmem [shape: f32[1,128], index: 2, kind: input, shape index: {}]   ;;  %s5375_s3 = inlined_call_operand.hbm [shape: f32[128,384], index: 3, kind: input, shape index: {}]   ;;  %s5376_s4 = inlined_call_operand.vmem [shape: f32[1,384], index: 4, kind: input, shape index: {}]   ;;  %s5377_s5 = inlined_call_operand.hbm [shape: f32[128,128], index: 5, kind: input, shape index: {}]   ;;  %s5378_s6 = inlined_call_operand.vmem [shape: f32[1,128], index: 6, kind: input, shape index: {}]   ;;  %s5379_s7 = inlined_call_operand.vmem [shape: f32[1,128], index: 7, kind: input, shape index: {}]   ;;  %s5380_s8 = inlined_call_operand.vmem [shape: f32[1,128], index: 8, kind: input, shape index: {}]   ;;  %s5381_s9 = inlined_call_operand.hbm [shape: f32[128,256], index: 9, kind: input, shape index: {}]   ;;  %s5382_s10 = inlined_call_operand.vmem [shape: f32[1,256], index: 10, kind: input, shape index: {}]   ;;  %s5383_s11 = inlined_call_operand.hbm [shape: f32[256,128], index: 11, kind: input, shape index: {}]   ;;  %s5384_s12 = inlined_call_operand.vmem [shape: f32[1,128], index: 12, kind: input, shape index: {}]   ;;  %s5385_s13 = inlined_call_operand.hbm [shape: f32[2,16,128], index: 13, kind: output, shape index: {}]  }
   0x1   :  { %5392 = sst [smem:[#allocation20_spill]] %s5375_s3 }
   0x2   :  { %5393 = sst [smem:[#allocation21_spill]] %s5380_s8 }
   0x3   :  { %5394 = sst [smem:[#allocation22_spill]] %s5382_s10 }
   0x4   :  { %5395 = sst [smem:[#allocation23_spill]] %s5384_s12 }
   0x5   :  { %5396 = sst [smem:[#allocation24_spill]] %s5385_s13 }
   0x6   :  { %18 = vsyncpa [#allocation5], 0 }
   0x7   :  { %20 = vsyncpa [#allocation5 + $0x1], 0 }
   0x8   :  { %21 = vsyncpa [#allocation8], 0 }
   0x9   :  { %22 = vsyncpa [#allocation11], 0 }
   0xa   :  { %23 = vsyncpa [#allocation6], 0 }
   0xb   :  { %25 = vsyncpa [#allocation6 + $0x1], 0  ;;  %s4563_s25 = smov 0   ;;  %s4565_s26 = smov 0  }
   0xc   :  { %s4567_s27 = smov 0   ;;  %s4569_s28 = smov 0  }
   0xd LB: > { %5397 = sst [smem:[#allocation18_spill]] %s4457_s25  ;;  %s4584_s29 = sadd.s32 4294967295, %s4469_s28   ;;  %s4469_s28 = sphi %s4569_s28, %s5427_s28   ;;  %s4465_s27 = sphi %s4567_s27, %s5426_s27   ;;  %s4461_s26 = sphi %s4565_s26, %s5425_s26   ;;  %s4457_s25 = sphi %s4563_s25, %s5424_s25  }
   0xe   : > { %s3240_s30 = sadd.s32 4294967294, %s4469_s28   ;;  %p51_p0 = scmp.ne.s32.totalorder %s4461_s26, %s4457_s25 }
   0xf   : > { %p5388_p1 = scmp.eq.s32.totalorder %s4584_s29, 0  ;;  %p333_p3 = scmp.eq.s32.totalorder %s3240_s30, 1 }
  0x10   : > { %p3241_p5 = scmp.ge.s32.totalorder %s4469_s28, 1  ;;  %p340_p7 = scmp.lt.s32.totalorder %s4469_s28, 3 }
  0x11   : > { %p4593_p4 = por %p5388_p1, %p51_p0  ;;  %p4598_p6 = por %p333_p3, %p51_p0 }
  0x12   : > { %p4603_p8 = pnand %p3241_p5, %p340_p7  ;;  %s4471_s17 = smov [#allocation7]  }
  0x13   : > { %s5398_s14 = scalar_select %p4593_p4, 1, 0 }
  0x14   : > { %s5399_s15 = scalar_select %p4598_p6, 1, 0 }
  0x15   : > { %s5401_s16 = scalar_select %p4603_p8, 1, 0 }
  0x16   : > { %5400 = sst [smem:[#allocation19_spill]] %s5399_s15  ;;  %s358_s18 = sshll.u32 %s4471_s17, 4  ;;  %s4607_s18 = int_to_ptr.vmem [resolvable:$true] %s358_s18 }
  0x17   : > { %p4000_p9 = pneg %p4603_p8  ;;  %s4472_s20 = smov [#allocation10]  }
  0x18   : > { %s396_s21 = sshll.u32 %s4472_s20, 4  ;;  %s5403_s3 = sld [smem:[#allocation20_spill]]  ;;  %s4618_s21 = int_to_ptr.vmem [resolvable:$true] %s396_s21 }
  0x19   : > { %p4614_p11 = pnand %p4000_p9, %p5388_p1 }
  0x1b   : > { %p4628_p13 = pneg %p4614_p11 }
  0x1e   : > { %s4253_s24 = scalar_lea.hbm %s5403_s3, 6144 }
  0x1f   : > { %p4254_p12 = scmp.ne.s32.totalorder %s5403_s3, %s4253_s24  ;;  %p4260_p5 = scmp.lt.u32.totalorder %s4253_s24, %s5403_s3 }
  0x21   : > { %p4256_p0 = pnand %p4628_p13, %p4254_p12 }
  0x23   : > { %p4257_p3 = pneg %p4256_p0 }
  0x25   : > { %p4262_p7 = pnand %p4260_p5, %p4257_p3 }
  0x27   : > { %4265 = shalt.err (!%p4262_p7)
}
  0x28   : > { %s4266_s22 = scalar_lea.vmem %s4607_s18, 6144  ;;  %p4274_p2 = scmp.lt.s32.totalorder %s4607_s18, %s4607_s18 }
  0x29   : > { %p4267_p9 = scmp.ne.s32.totalorder %s4607_s18, %s4266_s22  ;;  %p4275_p6 = scmp.lt.s32.totalorder %s4266_s22, %s4266_s22 }
  0x2b   : > { %p4269_p10 = pnand %p4267_p9, %p4628_p13  ;;  %p4276_p12 = por %p4275_p6, %p4274_p2 }
  0x2d   : > { %p4270_p1 = pneg %p4269_p10 }
  0x2f   : > { %p4277_p0 = pnand %p4276_p12, %p4270_p1 }
  0x31   : > { %4280 = shalt.err (!%p4277_p0)
}
  0x32   : > { %s4473_s23 = smov 384   ;;  %s4474_s25 = smov 24  }
  0x33   : > { %4003 = dma.hbm_to_vmem [thread:$0]  (!%p4614_p11), %s5403_s3, 6144, %s4607_s18, [#allocation8], %s4473_s23, %s4473_s23, %s4474_s25  }
  0x34   : > { %s4281_s13 = scalar_lea.hbm %s5381_s9, 4096 }
  0x35   : > { %p4282_p2 = scmp.ne.s32.totalorder %s5381_s9, %s4281_s13  ;;  %p4288_p10 = scmp.lt.u32.totalorder %s4281_s13, %s5381_s9 }
  0x37   : > { %p4284_p1 = pnand %p4282_p2, %p4628_p13 }
  0x39   : > { %p4285_p6 = pneg %p4284_p1 }
  0x3b   : > { %p4290_p3 = pnand %p4288_p10, %p4285_p6 }
  0x3d   : > { %4293 = shalt.err (!%p4290_p3)
}
  0x3e   : > { %s4294_s18 = scalar_lea.vmem %s4618_s21, 4096  ;;  %p4302_p12 = scmp.lt.s32.totalorder %s4618_s21, %s4618_s21 }
  0x3f   : > { %p4295_p5 = scmp.ne.s32.totalorder %s4618_s21, %s4294_s18  ;;  %p4303_p0 = scmp.lt.s32.totalorder %s4294_s18, %s4294_s18 }
  0x41   : > { %p4297_p7 = pnand %p4295_p5, %p4628_p13  ;;  %p4304_p2 = por %p4303_p0, %p4302_p12 }
  0x43   : > { %p4298_p9 = pneg %p4297_p7 }
  0x45   : > { %p4305_p1 = pnand %p4304_p2, %p4298_p9 }
  0x47   : > { %4308 = shalt.err (!%p4305_p1)
}
  0x48   : > { %s4475_s10 = smov 256   ;;  %s4476_s8 = smov 16  }
  0x49   : > { %4009 = dma.hbm_to_vmem [thread:$0]  (!%p4614_p11), %s5381_s9, 4096, %s4618_s21, [#allocation11], %s4475_s10, %s4475_s10, %s4476_s8  }
  0x4a   : > { %s4477_s23 = smov [#allocation9]   ;;  %s4309_s17 = scalar_lea.hbm %s5377_s5, 2048 }
  0x4b   : > { %s374_s25 = sshll.u32 %s4477_s23, 4  ;;  %p4310_p6 = scmp.ne.s32.totalorder %s5377_s5, %s4309_s17  ;;  %s375_s25 = int_to_ptr.vmem [resolvable:$true] %s374_s25 }
  0x4c   : > { %p4316_p5 = scmp.lt.u32.totalorder %s4309_s17, %s5377_s5 }
  0x4d   : > { %p4312_p10 = pnand %p4310_p6, %p4628_p13 }
  0x4f   : > { %p4313_p3 = pneg %p4312_p10 }
  0x51   : > { %p4318_p7 = pnand %p4316_p5, %p4313_p3 }
  0x53   : > { %4321 = shalt.err (!%p4318_p7)
}
  0x54   : > { %s4322_s21 = scalar_lea.vmem %s375_s25, 2048  ;;  %p4330_p2 = scmp.lt.s32.totalorder %s375_s25, %s375_s25 }
  0x55   : > { %p4323_p9 = scmp.ne.s32.totalorder %s375_s25, %s4322_s21  ;;  %p4331_p1 = scmp.lt.s32.totalorder %s4322_s21, %s4322_s21 }
  0x57   : > { %p4325_p12 = pnand %p4323_p9, %p4628_p13  ;;  %p4332_p4 = por %p4331_p1, %p4330_p2 }
  0x59   : > { %p4326_p0 = pneg %p4325_p12 }
  0x5b   : > { %p4333_p8 = pnand %p4332_p4, %p4326_p0 }
  0x5d   : > { %4336 = shalt.err (!%p4333_p8)
}
  0x5e   : > { %s4478_s10 = smov 128   ;;  %s4479_s8 = smov 8  }
  0x5f   : > { %4006 = dma.hbm_to_vmem [thread:$0]  (!%p4614_p11), %s5377_s5, 2048, %s375_s25, [#allocation8], %s4478_s10, %s4478_s10, %s4479_s8  }
  0x60   : > { %s4480_s13 = smov [#allocation12]   ;;  %s4337_s17 = scalar_lea.hbm %s5383_s11, 4096 }
  0x61   : > { %s412_s23 = sshll.u32 %s4480_s13, 4  ;;  %p4338_p4 = scmp.ne.s32.totalorder %s5383_s11, %s4337_s17  ;;  %s413_s23 = int_to_ptr.vmem [resolvable:$true] %s412_s23 }
  0x62   : > { %p4344_p10 = scmp.lt.u32.totalorder %s4337_s17, %s5383_s11 }
  0x63   : > { %p4340_p8 = pnand %p4338_p4, %p4628_p13 }
  0x65   : > { %p4341_p6 = pneg %p4340_p8 }
  0x67   : > { %p4346_p3 = pnand %p4344_p10, %p4341_p6 }
  0x69   : > { %4349 = shalt.err (!%p4346_p3)
}
  0x6a   : > { %s4350_s25 = scalar_lea.vmem %s413_s23, 4096  ;;  %p4358_p12 = scmp.lt.s32.totalorder %s413_s23, %s413_s23 }
  0x6b   : > { %p4351_p5 = scmp.ne.s32.totalorder %s413_s23, %s4350_s25  ;;  %p4359_p0 = scmp.lt.s32.totalorder %s4350_s25, %s4350_s25 }
  0x6d   : > { %p4353_p7 = pnand %p4351_p5, %p4628_p13  ;;  %p4360_p2 = por %p4359_p0, %p4358_p12 }
  0x6f   : > { %p4354_p9 = pneg %p4353_p7 }
  0x71   : > { %p4361_p1 = pnand %p4360_p2, %p4354_p9 }
  0x73   : > { %4364 = shalt.err (!%p4361_p1)
}
  0x74   : > { %4012 = dma.hbm_to_vmem [thread:$0]  (!%p4614_p11), %s5383_s11, 4096, %s413_s23, [#allocation11], %s4478_s10, %s4478_s10, %s4479_s8  }
  0x75   : > { %s4715_s15 = sadd.s32 1, %s4469_s28   ;;  %s38_s19 = sadd.s32 1, %s4465_s27 }
  0x76   : > { %s35_s13 = ssub.s32 %s4469_s28, %s4715_s15  ;;  %p45_p13 = scmp.ne.s32.totalorder %s4465_s27, %s4461_s26 }
  0x77   : > { %p36_p4 = scmp.eq.s32.totalorder %s35_s13, 0  ;;  %p46_p8 = scmp.eq.s32.totalorder %s4469_s28, 0 }
  0x78   : > { %p5405_p6 = scmp.eq.s32.totalorder %s4584_s29, 1  ;;  %p4025_p3 = scmp.lt.s32.totalorder %s4469_s28, 2 }
  0x79   : > { %s4731_s30 = scalar_select %p36_p4, %s4465_s27, %s38_s19  }
  0x7a   : > { %p4725_p10 = por %p5405_p6, %p45_p13  ;;  %p47_p5 = por %p46_p8, %p45_p13 }
  0x7b   : > { %s429_s17 = sand.u32 1, %s4465_s27   ;;  %s3316_s23 = sshll.u32 %s4469_s28, 8 }
  0x7c   : > { %s3247_s20 = sshll.u32 %s429_s17, 4  ;;  %s4738_s21 = scalar_lea.hbm %s5372_s0, %s3316_s23 }
  0x7d   : > { %s433_s25 = scalar_lea.vmem [#allocation4], %s3247_s20  ;;  %p4742_p11 = pnand %p4025_p3, %p47_p5 }
  0x7e   : > { %s440_s3 = sshll.u32 %s433_s25, 4  ;;  %s4746_s19 = scalar_lea.sflag [#allocation5], %s429_s17  ;;  %s4740_s3 = int_to_ptr.vmem [resolvable:$true] %s440_s3 }
  0x7f   : > { %s4365_s13 = scalar_lea.hbm %s4738_s21, 256  ;;  %p4367_p9 = pneg %p4742_p11 }
  0x80   : > { %p4366_p7 = scmp.ne.s32.totalorder %s4738_s21, %s4365_s13  ;;  %s4370_s22 = scalar_lea.hbm %s5372_s0, 512 }
  0x81   : > { %p4371_p2 = scmp.lt.u32.totalorder %s4738_s21, %s5372_s0  ;;  %p4372_p1 = scmp.lt.u32.totalorder %s4370_s22, %s4365_s13 }
  0x82   : > { %p4368_p12 = pnand %p4367_p9, %p4366_p7  ;;  %p4374_p4 = scmp.lt.u32.totalorder %s4365_s13, %s4738_s21 }
  0x83   : > { %p4373_p13 = por %p4372_p1, %p4371_p2 }
  0x84   : > { %p4369_p0 = pneg %p4368_p12 }
  0x85   : > { %p4375_p8 = por %p4374_p4, %p4373_p13 }
  0x87   : > { %p4376_p6 = pnand %p4375_p8, %p4369_p0 }
  0x89   : > { %4379 = shalt.err (!%p4376_p6)
}
  0x8a   : > { %s4380_s17 = scalar_lea.vmem %s4740_s3, 256  ;;  %s4481_s20 = smov [#allocation4]  }
  0x8b   : > { %p4381_p3 = scmp.ne.s32.totalorder %s4740_s3, %s4380_s17  ;;  %s4385_s23 = sshll.u32 %s4481_s20, 4  ;;  %s4386_s23 = int_to_ptr.vmem [resolvable:$false] %s4385_s23 }
  0x8c   : > { %s4387_s18 = scalar_lea.vmem %s4386_s23, 512  ;;  %p4388_p12 = scmp.lt.s32.totalorder %s4740_s3, %s4386_s23 }
  0x8d   : > { %p4383_p5 = pnand %p4381_p3, %p4367_p9  ;;  %p4389_p2 = scmp.lt.s32.totalorder %s4387_s18, %s4380_s17 }
  0x8f   : > { %p4384_p7 = pneg %p4383_p5  ;;  %p4390_p1 = por %p4389_p2, %p4388_p12 }
  0x91   : > { %p4391_p13 = pnand %p4390_p1, %p4384_p7 }
  0x93   : > { %4394 = shalt.err (!%p4391_p13)
}
  0x94   : > { %4016 = dma.hbm_to_vmem [thread:$0]  (!%p4742_p11), %s4738_s21, 256, %s4740_s3, %s4746_s19, %s4478_s10, %s4478_s10, %s4479_s8  }
  0x95   : > { %p5408_p9 = scmp.ne.s32.totalorder %s5401_s16, 0 }
  0x96   : > { %s4780_s13 = sand.u32 (!%p5408_p9), 1, %s4461_s26   ;;  %p5409_p0 = scmp.ne.s32.totalorder (!%p5408_p9), %s5398_s14, 0 }
  0x97   : > { %452 = sbr.rel (%p5408_p9) target bundleno = 3155 (0xc53), region = 72  ;;  %s3251_s22 = sshll.u32 (!%p5408_p9), %s4780_s13, 4 }
  0x98   : > { %s455_s25 = scalar_lea.sflag (!%p5408_p9), [#allocation5], %s4780_s13  ;;  %s4786_s12 = scalar_lea.vmem (!%p5408_p9), [#allocation4], %s3251_s22 }
  0x9e   : > { %4440 = dma.done.wait (%p5409_p0), %s455_s25, 256  }
  0x9f   : > { %4442 = vsyncadd (%p5409_p0), %s455_s25, 4294967040  ;;  %p5410_p11 = scmp.eq.s32.totalorder %s4584_s29, 0 }
  0xa1   : > { %4444 = dma.done.wait (%p5410_p11), [#allocation8], 8192   ;;  %p5411_p4 = pmov %p5410_p11 }
  0xa3   : > { %4446 = vsyncadd (%p5411_p4), [#allocation8], 4294959104  ;;  %p5412_p8 = pmov %p5411_p4 }
  0xa4   : > { %p5413_p6 = pmov %p5411_p4 }
  0xa5   : > { %4448 = dma.done.wait (%p5412_p8), [#allocation11], 8192  }
  0xa6   : > { %4450 = vsyncadd (%p5413_p6), [#allocation11], 4294959104  ;;  %v517_v0 = vld [vmem:[%s4786_s12] sm:$0xff]  ;;  %v518_v1 = vld [vmem:[%s4786_s12 + $0x8] sm:$0xff]  ;;  %vm777_vm0 = vcmask 392192   ;;  %s4483_s19 = smov 80  }
  0xa7   : > { %521 = vadd.xlane.f32.xlu0 %v517_v0  ;;  %v561_v2 = vld [vmem:[#allocation7 + $0x8] sm:$0xff]  ;;  %v564_v3 = vld [vmem:[#allocation7 + $0x20] sm:$0xff]  ;;  %v563_v6 = vld [vmem:[#allocation7 + $0x18] sm:$0xff]  ;;  %s4484_s17 = smov 32   ;;  %vm837_vm1 = vcmask 130048   ;;  %s4485_s20 = smov 112  }
  0xa8   : > { %v560_v4 = vld [vmem:[#allocation7] sm:$0xff]  ;;  %v3676_v5 = vpack.c.bf16 %v564_v3, %v561_v2  ;;  %v567_v7 = vld [vmem:[#allocation7 + $0x38] sm:$0xff]  ;;  %v570_v8 = vld [vmem:[#allocation7 + $0x50] sm:$0xff]  ;;  %s4486_s23 = smov 64   ;;  %s4487_s18 = smov 16   ;;  %vm801_vm2 = vcmask 261120  }
  0xa9   : > { %v3678_v9 = vpack.c.bf16 %v563_v6, %v560_v4  ;;  %v3680_v10 = vpack.c.bf16 %v570_v8, %v567_v7  ;;  %v562_v11 = vld [vmem:[#allocation7 + $0x10] sm:$0xff]  ;;  %v565_v12 = vld [vmem:[#allocation7 + $0x28] sm:$0xff]  ;;  %v576_v17 = vld [vmem:[#allocation7 + $0x80] sm:$0xff]  ;;  %v4482_v4 = vmov 0.0   ;;  %s4488_s25 = smov 96   ;;  %s4489_s14 = smov 48  }
  0xaa   : > { %v566_v13 = vld [vmem:[#allocation7 + $0x30] sm:$0xff]  ;;  %3677 = vmatprep.subr.bf16.mxu0 %v3676_v5  ;;  %v3708_v14 = vpack.c.bf16 %v565_v12, %v562_v11  ;;  %v569_v15 = vld [vmem:[#allocation7 + $0x48] sm:$0xff]  ;;  %v568_v19 = vld [vmem:[#allocation7 + $0x40] sm:$0xff]  ;;  %689 = vmatprep.mubr.f32.mxu0 %v4482_v4  ;;  %vm2473_vm4 = vcmask 261248   ;;  %vm2484_vm5 = vcmask 392448   ;;  %vm2495_vm6 = vcmask 523648  }
  0xab   : > { %523 = vadd.xlane.f32.xlu0 %v518_v1  ;;  %v573_v16 = vld [vmem:[#allocation7 + $0x68] sm:$0xff]  ;;  %3679 = vmatpush1.bf16.msra.mxu0 %v3678_v9  ;;  %v3682_v18 = vpack.c.bf16 %v569_v15, %v566_v13  ;;  %v571_v20 = vld [vmem:[#allocation7 + $0x58] sm:$0xff]  ;;  %v572_v23 = vld [vmem:[#allocation7 + $0x60] sm:$0xff]  ;;  %vm2506_vm7 = vcmask 654848   ;;  %vm2517_vm8 = vcmask 786048   ;;  %vm2528_vm9 = vcmask 917248  }
  0xac   : > { %3681 = vmatprep.subr.bf16.mxu0 %v3680_v10  ;;  %3709 = vmatprep.subr.bf16.mxu1 %v3708_v14  ;;  %v3684_v21 = vpack.c.bf16 %v576_v17, %v573_v16  ;;  %v3712_v22 = vpack.c.bf16 %v571_v20, %v568_v19  ;;  %v575_v24 = vld [vmem:[#allocation7 + $0x78] sm:$0xff]  ;;  %v582_v35 = vld [vmem:[#allocation7 + $0xb0] sm:$0xff]  ;;  %v577_v38 = vld [vmem:[#allocation7 + $0x88] sm:$0xff]  ;;  %vm2539_vm10 = vcmask 1048448   ;;  %s516_s16 = scalar_lea.vmem [#allocation13], %s3251_s22  ;;  %s5419_s3 = sld [smem:[#allocation24_spill]] }
  0xad   : > { %3711 = vmatpush3.bf16.msra.mxu1 %v3708_v14  ;;  %v3686_v25 = vpack.c.bf16 %v575_v24, %v572_v23  ;;  %v579_v34 = vld [vmem:[#allocation7 + $0x98] sm:$0xff]  ;;  %v574_v36 = vld [vmem:[#allocation7 + $0x70] sm:$0xff]  ;;  %v581_v40 = vld [vmem:[#allocation7 + $0xa8] sm:$0xff]  ;;  %s3129_s10 = sshll.u32 %s516_s16, 4  ;;  %s3116_s22 = scalar_lea.sflag [#allocation6], %s4780_s13  ;;  %s5322_s10 = int_to_ptr.vmem [resolvable:$true] %s3129_s10 }
  0xae   : > { %3713 = vmatprep.subr.bf16.mxu1 %v3712_v22  ;;  %v3688_v37 = vpack.c.bf16 %v582_v35, %v579_v34  ;;  %v578_v39 = vld [vmem:[#allocation7 + $0x90] sm:$0xff]  ;;  %v3716_v41 = vpack.c.bf16 %v577_v38, %v574_v36  ;;  %v585_v43 = vld [vmem:[#allocation7 + $0xc8] sm:$0xff]  ;;  %v588_v44 = vld [vmem:[#allocation7 + $0xe0] sm:$0xff] }
  0xaf   : > { %3683 = vmatpush1.bf16.msra.mxu0 %v3682_v18  ;;  %v3690_v42 = vpack.c.bf16 %v581_v40, %v578_v39  ;;  %v580_v45 = vld [vmem:[#allocation7 + $0xa0] sm:$0xff]  ;;  %v3692_v46 = vpack.c.bf16 %v588_v44, %v585_v43  ;;  %v583_v47 = vld [vmem:[#allocation7 + $0xb8] sm:$0xff]  ;;  %v594_v53 = vld [vmem:[#allocation7 + $0x110] sm:$0xff] }
  0xb0   : > { %3685 = vmatprep.subr.bf16.mxu0 %v3684_v21  ;;  %v584_v48 = vld [vmem:[#allocation7 + $0xc0] sm:$0xff]  ;;  %v587_v49 = vld [vmem:[#allocation7 + $0xd8] sm:$0xff]  ;;  %v3720_v50 = vpack.c.bf16 %v583_v47, %v580_v45  ;;  %v586_v54 = vld [vmem:[#allocation7 + $0xd0] sm:$0xff] }
  0xb1   : > { %3715 = vmatpush3.bf16.msra.mxu1 %v3712_v22  ;;  %v3694_v51 = vpack.c.bf16 %v587_v49, %v584_v48  ;;  %v591_v52 = vld [vmem:[#allocation7 + $0xf8] sm:$0xff]  ;;  %v589_v56 = vld [vmem:[#allocation7 + $0xe8] sm:$0xff]  ;;  %v590_v57 = vld [vmem:[#allocation7 + $0xf0] sm:$0xff] }
  0xb2   : > { %3717 = vmatprep.subr.bf16.mxu1 %v3716_v41  ;;  %v3696_v55 = vpack.c.bf16 %v594_v53, %v591_v52  ;;  %v593_v58 = vld [vmem:[#allocation7 + $0x108] sm:$0xff]  ;;  %v3724_v59 = vpack.c.bf16 %v589_v56, %v586_v54  ;;  %v600_v62 = vld [vmem:[#allocation7 + $0x140] sm:$0xff]  ;;  %v599_v3 = vld [vmem:[#allocation7 + $0x138] sm:$0xff] }
  0xb3   : > { %3687 = vmatpush1.bf16.msra.mxu0 %v3686_v25  ;;  %v3698_v60 = vpack.c.bf16 %v593_v58, %v590_v57  ;;  %v597_v61 = vld [vmem:[#allocation7 + $0x128] sm:$0xff]  ;;  %v592_v63 = vld [vmem:[#allocation7 + $0x100] sm:$0xff]  ;;  %v603_v7 = vld [vmem:[#allocation7 + $0x158] sm:$0xff] }
  0xb4   : > { %3689 = vmatprep.subr.bf16.mxu0 %v3688_v37  ;;  %v596_v2 = vld [vmem:[#allocation7 + $0x120] sm:$0xff]  ;;  %v606_v8 = vld [vmem:[#allocation7 + $0x170] sm:$0xff]  ;;  %v601_v11 = vld [vmem:[#allocation7 + $0x148] sm:$0xff]  ;;  %v610_v37 = vlaneseq }
  0xb5   : > { %3719 = vmatpush3.bf16.msra.mxu1 %v3716_v41  ;;  %v3702_v6 = vpack.c.bf16 %v599_v3, %v596_v2  ;;  %v598_v9 = vld [vmem:[#allocation7 + $0x130] sm:$0xff]  ;;  %v3704_v10 = vpack.c.bf16 %v606_v8, %v603_v7  ;;  %v605_v13 = vld [vmem:[#allocation7 + $0x168] sm:$0xff]  ;;  %v604_v16 = vld [vmem:[#allocation7 + $0x160] sm:$0xff] }
  0xb6   : > { %3721 = vmatprep.subr.bf16.mxu1 %v3720_v50  ;;  %v602_v12 = vld [vmem:[#allocation7 + $0x150] sm:$0xff]  ;;  %v3732_v14 = vpack.c.bf16 %v601_v11, %v598_v9  ;;  %v607_v17 = vld [vmem:[#allocation7 + $0x178] sm:$0xff]  ;;  %v4820_v38 = vshrl.u32 %v610_v37, 7  ;;  %vm4896_vm3 = vmpackc.low %vm837_vm1, %vm837_vm1 }
  0xb7   : > { %3691 = vmatpush1.bf16.msra.mxu0 %v3690_v42  ;;  %v3706_v15 = vpack.c.bf16 %v605_v13, %v602_v12  ;;  %v3736_v18 = vpack.c.bf16 %v607_v17, %v604_v16  ;;  %v608_v39 = vld [vmem:[%s5376_s4] sm:$0x7] }
  0xb8   : > { %3693 = vmatprep.subr.bf16.mxu0 %v3692_v46  ;;  %v616_v42 = vsub.s32 1, %v4820_v38 }
  0xb9   : > { %3723 = vmatpush3.bf16.msra.mxu1 %v3720_v50 }
  0xba   : > { %3725 = vmatprep.subr.bf16.mxu1 %v3724_v59  ;;  %v617_v46 = vrot.slane %v608_v39, %v616_v42 }
  0xbb   : > { %3695 = vmatpush1.bf16.msra.mxu0 %v3694_v51  ;;  %v620_v51 = vsub.s32 2, %v4820_v38 }
  0xbc   : > { %3697 = vmatprep.subr.bf16.mxu0 %v3696_v55 }
  0xbd   : > { %3727 = vmatpush3.bf16.msra.mxu1 %v3724_v59  ;;  %v621_v53 = vrot.slane %v608_v39, %v620_v51 }
  0xbf   : > { %3699 = vmatpush1.bf16.msra.mxu0 %v3698_v60 }
 0x134   : > { %v522_v26 = vpop.xlane.xlu0 %521 }
 0x135   : > { %v526_v27 = vmul.f32 0.0078125, %v522_v26  ;;  %v3257_v26 = vld [vmem:[%s5373_s1] ss:$0 sm:$0xff] }
 0x137   : > { %v4802_v28 = vsub.f32 %v517_v0, %v526_v27  ;;  %v3700_v0 = vpack.c.bf16 %v600_v62, %v597_v61 }
 0x138   : > { %v524_v29 = vpop.xlane.xlu0 %523 }
 0x139   : > { %v527_v30 = vmul.f32 0.0078125, %v524_v29  ;;  %v530_v31 = vmul.f32 %v4802_v28, %v4802_v28  ;;  %3701 = vmatprep.subr.bf16.mxu0 %v3700_v0  ;;  %v3258_v29 = vld [vmem:[%s5374_s2] ss:$0 sm:$0xff] }
 0x13a   : > { %3703 = vmatpush1.bf16.msra.mxu0 %v3702_v6 }
 0x13b   : > { %v4806_v32 = vsub.f32 %v518_v1, %v527_v30  ;;  %532 = vadd.xlane.f32.xlu1 %v530_v31  ;;  %v595_v1 = vld [vmem:[#allocation7 + $0x118] sm:$0xff]  ;;  %3705 = vmatprep.subr.bf16.mxu0 %v3704_v10 }
 0x13c   : > { %v3728_v5 = vpack.c.bf16 %v595_v1, %v592_v63 }
 0x13d   : > { %v531_v33 = vmul.f32 %v4806_v32, %v4806_v32 }
 0x13e   : > { %3729 = vmatprep.subr.bf16.mxu1 %v3728_v5  ;;  %3707 = vmatpush1.bf16.msra.mxu0 %v3706_v15 }
 0x13f   : > { %534 = vadd.xlane.f32.xlu1 %v531_v33  ;;  %3731 = vmatpush3.bf16.msra.mxu1 %v3728_v5 }
 0x140   : > { %3733 = vmatprep.subr.bf16.mxu1 %v3732_v14 }
 0x143   : > { %3735 = vmatpush3.bf16.msra.mxu1 %v3732_v14 }
 0x144   : > { %3737 = vmatprep.subr.bf16.mxu1 %v3736_v18 }
 0x147   : > { %3739 = vmatpush3.bf16.msra.mxu1 %v3736_v18 }
 0x1c8   : > { %v533_v19 = vpop.xlane.xlu1 %532 }
 0x1c9   : > { %v536_v20 = vmul.f32 0.0078125, %v533_v19 }
 0x1cb   : > { %v538_v21 = vadd.f32 1e-05, %v536_v20 }
 0x1cc   : > { %v535_v22 = vpop.xlane.xlu1 %534 }
 0x1cd   : > { %4163 = vrsqrt.f32 %v538_v21  ;;  %v537_v23 = vmul.f32 0.0078125, %v535_v22 }
 0x1cf   : > { %v539_v24 = vadd.f32 1e-05, %v537_v23 }
 0x1d1   : > { %4165 = vrsqrt.f32 %v539_v24 }
 0x1d7   : > { %v4164_v25 = vpop.eup %4163 }
 0x1d8   : > { %v542_v27 = vmul.f32 %v4164_v25, %v4802_v28  ;;  %v612_v28 = vsub.s32 0, %v4820_v38 }
 0x1da   : > { %v550_v30 = vmul.f32 %v3257_v26, %v542_v27 }
 0x1db   : > { %v4166_v31 = vpop.eup %4165 }
 0x1dc   : > { %v558_v33 = vadd.f32 %v3258_v29, %v550_v30  ;;  %v543_v34 = vmul.f32 %v4166_v31, %v4806_v32  ;;  %v613_v32 = vrot.slane %v608_v39, %v612_v28 }
 0x1de   : > { %690 = vmatmul.mubr.f32.vlgmr.msra.gmra.mrb[0].mxu0 %v558_v33  ;;  %3526 = vmatprep.mubr.f32.mxu1 %v558_v33  ;;  %v551_v35 = vmul.f32 %v3257_v26, %v543_v34 }
 0x1df   : > { %695 = vmatprep.mubr.f32.mxu0 %v4482_v4 }
 0x1e0   : > { %v559_v36 = vadd.f32 %v3258_v29, %v551_v35 }
 0x1e2   : > { %696 = vmatmul.mubr.f32.gmra.mrb[2].mxu0 %v559_v36  ;;  %3527 = vmatmul.mubr.f32.vlgmr.msra.gmra.mrb[0].mxu1 %v559_v36 }
 0x2b1   : > { %v691_v40 = vpop.f32.mrb[0].mxu0 }
 0x2b2   : > { %v692_v41 = vadd.f32 %v691_v40, %v613_v32  ;;  %v693_v43 = vpop.f32.mrb[1].mxu0 }
 0x2b3   : > { %v694_v50 = vadd.f32 %v693_v43, %v617_v46 }
 0x2b4   : > { %778 = vst.msk [vmem:[#allocation2] sm:$0xff] %vm777_vm0, %v692_v41  ;;  %782 = vrot.lane.b32.xlu0 %v692_v41, %s4483_s19  ;;  %793 = vrot.lane.b32.xlu1 %v692_v41, %s4484_s17 }
 0x2b5   : > { %v697_v44 = vpop.f32.mrb[2].mxu0  ;;  %v3528_v45 = vpop.f32.mrb[0].mxu1 }
 0x2b6   : > { %v698_v47 = vadd.f32 %v697_v44, %v613_v32  ;;  %v699_v48 = vpop.f32.mrb[3].mxu0  ;;  %v768_v49 = vpop.f32.mrb[1].mxu1  ;;  %v774_v56 = vadd.f32 %v3528_v45, %v621_v53 }
 0x2b7   : > { %v700_v54 = vadd.f32 %v699_v48, %v617_v46  ;;  %v769_v55 = vadd.f32 %v768_v49, %v621_v53 }
 0x2b8   : > { %779 = vst.msk [vmem:[#allocation2 + $0x8] sm:$0xff] %vm777_vm0, %v698_v47  ;;  %797 = vrot.lane.b32.xlu0 %v698_v47, %s4484_s17  ;;  %784 = vrot.lane.b32.xlu1 %v698_v47, %s4483_s19 }
 0x2bb   : > { %v863_v52 = vld [vmem:[#allocation2] sm:$0xff] }
 0x2bc   : > { %3533 = vmatprep.mubr.msk.f32.mxu1 %vm837_vm1, %v863_v52  ;;  %809 = vrot.lane.b32.xlu0 %v694_v50, %s4485_s20 }
 0x2bd   : > { %795 = vrot.lane.b32.xlu1 %v694_v50, %s4484_s17 }
 0x2bf   : > { %v4849_v57 = vld [vmem:[#allocation2 + $0x8] sm:$0xff] }
 0x2c0   : > { %818 = vrot.lane.b32.xlu0 %v694_v50, %s4486_s23  ;;  %v4854_v58 = vpack.i.bf16 %v4849_v57, %v863_v52 }
 0x2c1   : > { %799 = vrot.lane.b32.xlu1 %v700_v54, %s4484_s17 }
 0x2c4   : > { %829 = vrot.lane.b32.xlu0 %v694_v50, %s4487_s18 }
 0x2c5   : > { %831 = vrot.lane.b32.xlu1 %v769_v55, %s4487_s18 }
 0x2c8   : > { %833 = vrot.lane.b32.xlu0 %v700_v54, %s4487_s18 }
 0x2c9   : > { %811 = vrot.lane.b32.xlu1 %v700_v54, %s4485_s20 }
 0x2cc   : > { %845 = vrot.lane.b32.xlu0 %v769_v55, %s4488_s25 }
 0x2cd   : > { %820 = vrot.lane.b32.xlu1 %v700_v54, %s4486_s23 }
 0x2d0   : > { %854 = vrot.lane.b32.xlu0 %v769_v55, %s4489_s14 }
 0x2d1   : > { %835 = vrot.lane.b32.xlu1 %v774_v56, %s4487_s18 }
 0x2d4   : > { %4084 = vrot.lane.b32.xlu0 %v4854_v58, %s4485_s20 }
 0x2d5   : > { %847 = vrot.lane.b32.xlu1 %v774_v56, %s4488_s25 }
 0x2d9   : > { %856 = vrot.lane.b32.xlu1 %v774_v56, %s4489_s14 }
 0x326   : > { %v794_v59 = vpop.permute.xlu1 %793  ;;  %v783_v60 = vpop.permute.xlu0 %782 }
 0x327   : > { %789 = vst.msk [vmem:[#allocation2 + $0x10] sm:$0xff] %vm777_vm0, %v783_v60 }
 0x32a   : > { %v785_v61 = vpop.permute.xlu1 %784  ;;  %v798_v62 = vpop.permute.xlu0 %797 }
 0x32b   : > { %790 = vst.msk [vmem:[#allocation2 + $0x18] sm:$0xff] %vm777_vm0, %v785_v61 }
 0x32e   : > { %v810_v63 = vpop.permute.xlu0 %809  ;;  %v865_v3 = vld [vmem:[#allocation2 + $0x10] sm:$0xff] }
 0x32f   : > { %v796_v0 = vpop.permute.xlu1 %795  ;;  %816 = vst.msk [vmem:[#allocation2 + $0x30] sm:$0xff] %vm777_vm0, %v810_v63 }
 0x330   : > { %v802_v1 = vsel %vm801_vm2, %v794_v59, %v796_v0 }
 0x331   : > { %807 = vst.msk [vmem:[#allocation2 + $0x20] sm:$0xff] %vm777_vm0, %v802_v1 }
 0x332   : > { %v819_v2 = vpop.permute.xlu0 %818  ;;  %v4864_v5 = vld [vmem:[#allocation2 + $0x18] sm:$0xff] }
 0x333   : > { %v800_v6 = vpop.permute.xlu1 %799  ;;  %825 = vst.msk [vmem:[#allocation2 + $0x40] sm:$0xff] %vm777_vm0, %v819_v2  ;;  %v4088_v7 = vpack.i.bf16 %v4864_v5, %v865_v3 }
 0x334   : > { %v803_v8 = vsel %vm801_vm2, %v798_v62, %v800_v6 }
 0x335   : > { %808 = vst.msk [vmem:[#allocation2 + $0x28] sm:$0xff] %vm777_vm0, %v803_v8  ;;  %4089 = vrot.lane.b32.xlu1 %v4088_v7, %s4485_s20 }
 0x336   : > { %v830_v9 = vpop.permute.xlu0 %829  ;;  %v4881_v22 = vld [vmem:[#allocation2 + $0x30] sm:$0xff] }
 0x337   : > { %v832_v10 = vpop.permute.xlu1 %831 }
 0x338   : > { %v838_v11 = vsel %vm837_vm1, %v830_v9, %v832_v10  ;;  %v867_v15 = vld [vmem:[#allocation2 + $0x20] sm:$0xff] }
 0x339   : > { %843 = vst.msk [vmem:[#allocation2 + $0x50] sm:$0xff] %vm777_vm0, %v838_v11 }
 0x33a   : > { %v834_v12 = vpop.permute.xlu0 %833  ;;  %v871_v13 = vld [vmem:[#allocation2 + $0x40] sm:$0xff] }
 0x33b   : > { %v812_v14 = vpop.permute.xlu1 %811  ;;  %3561 = vmatprep.mubr.msk.f32.mxu0 %vm837_vm1, %v871_v13 }
 0x33c   : > { %817 = vst.msk [vmem:[#allocation2 + $0x38] sm:$0xff] %vm777_vm0, %v812_v14  ;;  %v4874_v16 = vld [vmem:[#allocation2 + $0x28] sm:$0xff] }
 0x33d   : > { %v4093_v17 = vpack.i.bf16 %v4874_v16, %v867_v15 }
 0x33e   : > { %v846_v18 = vpop.permute.xlu0 %845 }
 0x33f   : > { %v821_v19 = vpop.permute.xlu1 %820  ;;  %4094 = vrot.lane.b32.xlu0 %v4093_v17, %s4485_s20  ;;  %852 = vst.msk [vmem:[#allocation2 + $0x60] sm:$0xff] %vm777_vm0, %v846_v18 }
 0x340   : > { %826 = vst.msk [vmem:[#allocation2 + $0x48] sm:$0xff] %vm777_vm0, %v821_v19  ;;  %v873_v37 = vld [vmem:[#allocation2 + $0x50] sm:$0xff] }
 0x342   : > { %v855_v20 = vpop.permute.xlu0 %854 }
 0x343   : > { %v836_v21 = vpop.permute.xlu1 %835  ;;  %861 = vst.msk [vmem:[#allocation2 + $0x70] sm:$0xff] %vm777_vm0, %v855_v20  ;;  %v4883_v23 = vld [vmem:[#allocation2 + $0x38] sm:$0xff] }
 0x344   : > { %v839_v24 = vsel %vm837_vm1, %v834_v12, %v836_v21  ;;  %v4098_v25 = vpack.i.bf16 %v4883_v23, %v4881_v22 }
 0x345   : > { %844 = vst.msk [vmem:[#allocation2 + $0x58] sm:$0xff] %vm777_vm0, %v839_v24 }
 0x346   : > { %4099 = vrot.lane.b32.xlu1 %v4098_v25, %s4485_s20  ;;  %v4085_v26 = vpop.permute.xlu0 %4084  ;;  %v4910_v40 = vld [vmem:[#allocation2 + $0x60] sm:$0xff] }
 0x347   : > { %v848_v27 = vpop.permute.xlu1 %847  ;;  %v4087_v29 = vunpack.i.h.bf16 %v4085_v26  ;;  %v4086_v30 = vunpack.i.l.bf16 %v4085_v26  ;;  %v4890_v31 = vld [vmem:[#allocation2 + $0x48] sm:$0xff] }
 0x348   : > { %853 = vst.msk [vmem:[#allocation2 + $0x68] sm:$0xff] %vm777_vm0, %v848_v27  ;;  %v4103_v33 = vpack.i.bf16 %v4890_v31, %v871_v13 }
 0x349   : > { %v3740_v35 = vpack.c.bf16 %v4087_v29, %v4086_v30 }
 0x34a   : > { %4104 = vrot.lane.b32.xlu0 %v4103_v33, %s4485_s20  ;;  %v4922_v44 = vld [vmem:[#allocation2 + $0x70] sm:$0xff] }
 0x34b   : > { %v857_v36 = vpop.permute.xlu1 %856  ;;  %3742 = vmatprep.subr.msk.bf16.mxu1 %vm4896_vm3, %v3740_v35 }
 0x34c   : > { %862 = vst.msk [vmem:[#allocation2 + $0x78] sm:$0xff] %vm777_vm0, %v857_v36  ;;  %3745 = vmatpush3.bf16.xpose.msk.msra.mxu1 %vm4896_vm3, %v3740_v35  ;;  %v4906_v39 = vld [vmem:[#allocation2 + $0x58] sm:$0xff] }
 0x34d   : > { %v4108_v32 = vpack.i.bf16 %v4906_v39, %v873_v37 }
 0x34f   : > { %4109 = vrot.lane.b32.xlu1 %v4108_v32, %s4485_s20  ;;  %v4912_v41 = vld [vmem:[#allocation2 + $0x68] sm:$0xff] }
 0x350   : > { %v4916_v43 = vpack.i.bf16 %v4912_v41, %v4910_v40 }
 0x352   : > { %4114 = vrot.lane.b32.xlu0 %v4916_v43, %s4485_s20 }
 0x353   : > { %3534 = vmatmul.mubr.msk.f32.vlgmr.msra.gmra.mrb[2].mxu1 %vm837_vm1, %v4849_v57  ;;  %v4924_v45 = vld [vmem:[#allocation2 + $0x78] sm:$0xff] }
 0x354   : > { %3540 = vmatprep.mubr.msk.f32.mxu1 %vm837_vm1, %v865_v3  ;;  %v4929_v46 = vpack.i.bf16 %v4924_v45, %v4922_v44 }
 0x356   : > { %4124 = vrot.lane.b32.xlu0 %v4854_v58, %s4488_s25  ;;  %4119 = vrot.lane.b32.xlu1 %v4929_v46, %s4485_s20 }
 0x35a   : > { %4139 = vrot.lane.b32.xlu0 %v4103_v33, %s4488_s25  ;;  %4129 = vrot.lane.b32.xlu1 %v4088_v7, %s4488_s25 }
 0x35e   : > { %4134 = vrot.lane.b32.xlu1 %v4098_v25, %s4488_s25 }
 0x362   : > { %4144 = vrot.lane.b32.xlu1 %v4093_v17, %s4488_s25 }
 0x366   : > { %4149 = vrot.lane.b32.xlu1 %v4108_v32, %s4488_s25 }
 0x3a7   : > { %v4090_v47 = vpop.permute.xlu1 %4089 }
 0x3a8   : > { %v4092_v48 = vunpack.i.h.bf16 %v4090_v47  ;;  %v4091_v49 = vunpack.i.l.bf16 %v4090_v47 }
 0x3aa   : > { %v3746_v50 = vpack.c.bf16 %v4092_v48, %v4091_v49 }
 0x3ac   : > { %3748 = vmatprep.subr.msk.bf16.mxu1 %vm4896_vm3, %v3746_v50 }
 0x3ad   : > { %3751 = vmatpush3.bf16.xpose.msk.msra.mxu1 %vm4896_vm3, %v3746_v50 }
 0x3b1   : > { %v4095_v51 = vpop.permute.xlu0 %4094 }
 0x3b2   : > { %v4097_v52 = vunpack.i.h.bf16 %v4095_v51  ;;  %v4096_v53 = vunpack.i.l.bf16 %v4095_v51 }
 0x3b4   : > { %v3752_v54 = vpack.c.bf16 %v4097_v52, %v4096_v53  ;;  %3541 = vmatmul.mubr.msk.f32.vlgmr.msra.gmra.mrb[4].mxu1 %vm837_vm1, %v4864_v5 }
 0x3b5   : > { %3547 = vmatprep.mubr.msk.f32.mxu1 %vm837_vm1, %v867_v15 }
 0x3b6   : > { %3754 = vmatprep.subr.msk.bf16.mxu1 %vm4896_vm3, %v3752_v54 }
 0x3b7   : > { %3757 = vmatpush3.bf16.xpose.msk.msra.mxu1 %vm4896_vm3, %v3752_v54 }
 0x3b8   : > { %v4100_v55 = vpop.permute.xlu1 %4099 }
 0x3b9   : > { %v4102_v56 = vunpack.i.h.bf16 %v4100_v55  ;;  %v4101_v57 = vunpack.i.l.bf16 %v4100_v55 }
 0x3bb   : > { %v3758_v58 = vpack.c.bf16 %v4102_v56, %v4101_v57 }
 0x3bc   : > { %v4105_v59 = vpop.permute.xlu0 %4104 }
 0x3bd   : > { %v4107_v60 = vunpack.i.h.bf16 %v4105_v59  ;;  %v4106_v61 = vunpack.i.l.bf16 %v4105_v59  ;;  %3760 = vmatprep.subr.msk.bf16.mxu1 %vm4896_vm3, %v3758_v58 }
 0x3be   : > { %3548 = vmatmul.mubr.msk.f32.vlgmr.msra.gmra.mrb[6].mxu1 %vm837_vm1, %v4874_v16 }
 0x3bf   : > { %v3764_v62 = vpack.c.bf16 %v4107_v60, %v4106_v61  ;;  %3763 = vmatpush3.bf16.xpose.msk.msra.mxu1 %vm4896_vm3, %v3758_v58  ;;  %3554 = vmatprep.mubr.msk.f32.mxu1 %vm837_vm1, %v4881_v22 }
 0x3c1   : > { %v4110_v63 = vpop.permute.xlu1 %4109  ;;  %3766 = vmatprep.subr.msk.bf16.mxu0 %vm4896_vm3, %v3764_v62 }
 0x3c2   : > { %v4112_v0 = vunpack.i.h.bf16 %v4110_v63  ;;  %v4111_v1 = vunpack.i.l.bf16 %v4110_v63  ;;  %3769 = vmatpush3.bf16.xpose.msk.msra.mxu0 %vm4896_vm3, %v3764_v62 }
 0x3c4   : > { %v3770_v2 = vpack.c.bf16 %v4112_v0, %v4111_v1  ;;  %v4115_v3 = vpop.permute.xlu0 %4114 }
 0x3c5   : > { %v4117_v5 = vunpack.i.h.bf16 %v4115_v3  ;;  %v4116_v6 = vunpack.i.l.bf16 %v4115_v3 }
 0x3c6   : > { %3555 = vmatmul.mubr.msk.f32.vlgmr.msra.gmra.mrb[8].mxu1 %vm837_vm1, %v4883_v23  ;;  %3772 = vmatprep.subr.msk.bf16.mxu1 %vm4896_vm3, %v3770_v2 }
 0x3c7   : > { %v3776_v7 = vpack.c.bf16 %v4117_v5, %v4116_v6  ;;  %3775 = vmatpush3.bf16.xpose.msk.msra.mxu1 %vm4896_vm3, %v3770_v2  ;;  %3568 = vmatprep.mubr.msk.f32.mxu1 %vm837_vm1, %v873_v37 }
 0x3c8   : > { %v4120_v8 = vpop.permute.xlu1 %4119  ;;  %v4125_v9 = vpop.permute.xlu0 %4124 }
 0x3c9   : > { %v4122_v10 = vunpack.i.h.bf16 %v4120_v8  ;;  %v4121_v11 = vunpack.i.l.bf16 %v4120_v8  ;;  %v4127_v12 = vunpack.i.h.bf16 %v4125_v9  ;;  %v4126_v13 = vunpack.i.l.bf16 %v4125_v9  ;;  %3562 = vmatmul.mubr.msk.f32.vlgmr.msra.gmra.mrb[4].mxu0 %vm837_vm1, %v4890_v31  ;;  %3778 = vmatprep.subr.msk.bf16.mxu0 %vm4896_vm3, %v3776_v7 }
 0x3ca   : > { %3781 = vmatpush3.bf16.xpose.msk.msra.mxu0 %vm4896_vm3, %v3776_v7  ;;  %3575 = vmatprep.mubr.msk.f32.mxu0 %vm837_vm1, %v4910_v40 }
 0x3cb   : > { %v3782_v14 = vpack.c.bf16 %v4122_v10, %v4121_v11  ;;  %v3788_v15 = vpack.c.bf16 %v4127_v12, %v4126_v13 }
 0x3cc   : > { %v4130_v16 = vpop.permute.xlu1 %4129  ;;  %v4140_v1 = vpop.permute.xlu0 %4139 }
 0x3cd   : > { %v4132_v17 = vunpack.i.h.bf16 %v4130_v16  ;;  %v4131_v18 = vunpack.i.l.bf16 %v4130_v16  ;;  %3784 = vmatprep.subr.msk.bf16.mxu1 %vm4896_vm3, %v3782_v14  ;;  %3789 = vmatprep.subr.bf16.mxu0 %v3788_v15  ;;  %v4142_v10 = vunpack.i.h.bf16 %v4140_v1  ;;  %v4141_v11 = vunpack.i.l.bf16 %v4140_v1 }
 0x3ce   : > { %3569 = vmatmul.mubr.msk.f32.vlgmr.msra.gmra.mrb[10].mxu1 %vm837_vm1, %v4906_v39 }
 0x3cf   : > { %v3792_v19 = vpack.c.bf16 %v4132_v17, %v4131_v18  ;;  %3787 = vmatpush3.bf16.xpose.msk.msra.mxu1 %vm4896_vm3, %v3782_v14  ;;  %3582 = vmatprep.mubr.msk.f32.mxu1 %vm837_vm1, %v4922_v44  ;;  %v5062_v14 = vpack.c.bf16 %v4142_v10, %v4141_v11 }
 0x3d0   : > { %v4135_v20 = vpop.permute.xlu1 %4134 }
 0x3d1   : > { %3576 = vmatmul.mubr.msk.f32.vlgmr.msra.gmra.mrb[6].mxu0 %vm837_vm1, %v4912_v41  ;;  %3793 = vmatprep.subr.bf16.mxu1 %v3792_v19  ;;  %v4137_v21 = vunpack.i.h.bf16 %v4135_v20  ;;  %v4136_v22 = vunpack.i.l.bf16 %v4135_v20 }
 0x3d2   : > { %3791 = vmatpush3.bf16.msra.mxu0 %v3788_v15 }
 0x3d3   : > { %v4988_v26 = vpack.c.bf16 %v4137_v21, %v4136_v22 }
 0x3d4   : > { %v4145_v23 = vpop.permute.xlu1 %4144 }
 0x3d5   : > { %v4147_v24 = vunpack.i.h.bf16 %v4145_v23  ;;  %v4146_v25 = vunpack.i.l.bf16 %v4145_v23 }
 0x3d6   : > { %3583 = vmatmul.mubr.msk.f32.vlgmr.msra.gmra.mrb[12].mxu1 %vm837_vm1, %v4924_v45 }
 0x3d7   : > { %v4992_v27 = vpack.c.bf16 %v4147_v24, %v4146_v25  ;;  %3795 = vmatpush3.bf16.msra.mxu1 %v3792_v19 }
 0x3d8   : > { %3801 = vmatprep.subr.bf16.mxu1 %v4988_v26  ;;  %v4150_v63 = vpop.permute.xlu1 %4149 }
 0x3d9   : > { %3797 = vmatprep.subr.bf16.mxu0 %v4992_v27  ;;  %v4152_v22 = vunpack.i.h.bf16 %v4150_v63  ;;  %v4151_v23 = vunpack.i.l.bf16 %v4150_v63 }
 0x3db   : > { %v5075_v25 = vpack.c.bf16 %v4152_v22, %v4151_v23 }
 0x426   : > { %v3535_v29 = vpop.f32.mrb[2].mxu1 }
 0x427   : > { %v959_v30 = vpop.f32.mrb[3].mxu1  ;;  %v1594_v31 = vsel %vm837_vm1, %v3535_v29, -inf }
 0x428   : > { %1595 = vmax.xlane.f32.xlu1 %v1594_v31  ;;  %v1591_v33 = vsel %vm837_vm1, %v959_v30, -inf }
 0x429   : > { %1592 = vmax.xlane.f32.xlu0 %v1591_v33 }
 0x487   : > { %v4998_v34 = vpop.f32.mrb[4].mxu1 }
 0x488   : > { %v5000_v35 = vpop.f32.mrb[5].mxu1  ;;  %v1600_v36 = vsel %vm837_vm1, %v4998_v34, -inf }
 0x489   : > { %1601 = vmax.xlane.f32.xlu0 %v1600_v36  ;;  %v1597_v37 = vsel %vm837_vm1, %v5000_v35, -inf }
 0x48d   : > { %1598 = vmax.xlane.f32.xlu0 %v1597_v37 }
 0x491   : > { %v5006_v39 = vpop.f32.mrb[6].mxu1 }
 0x492   : > { %v5008_v32 = vpop.f32.mrb[7].mxu1  ;;  %v1606_v50 = vsel %vm837_vm1, %v5006_v39, -inf }
 0x493   : > { %v1603_v52 = vsel %vm837_vm1, %v5008_v32, -inf }
 0x499   : > { %v5010_v40 = vpop.f32.mrb[8].mxu1 }
 0x49a   : > { %v5012_v41 = vpop.f32.mrb[9].mxu1  ;;  %v1612_v58 = vsel %vm837_vm1, %v5010_v40, -inf }
 0x49b   : > { %v1609_v60 = vsel %vm837_vm1, %v5012_v41, -inf }
 0x49c   : > { %v5014_v44 = vpop.f32.mrb[4].mxu0 }
 0x49d   : > { %v5016_v45 = vpop.f32.mrb[5].mxu0  ;;  %v1618_v47 = vsel %vm837_vm1, %v5014_v44, -inf }
 0x49e   : > { %1619 = vmax.xlane.f32.xlu1 %v1618_v47  ;;  %v1615_v48 = vsel %vm837_vm1, %v5016_v45, -inf }
 0x49f   : > { %1616 = vmax.xlane.f32.xlu0 %v1615_v48 }
 0x4a1   : > { %v5022_v49 = vpop.f32.mrb[10].mxu1 }
 0x4a2   : > { %1607 = vmax.xlane.f32.xlu1 %v1606_v50  ;;  %v5026_v51 = vpop.f32.mrb[11].mxu1  ;;  %v1624_v61 = vsel %vm837_vm1, %v5022_v49, -inf }
 0x4a3   : > { %1604 = vmax.xlane.f32.xlu0 %v1603_v52  ;;  %v1621_v62 = vsel %vm837_vm1, %v5026_v51, -inf }
 0x4a4   : > { %v5030_v53 = vpop.f32.mrb[6].mxu0 }
 0x4a5   : > { %v5032_v54 = vpop.f32.mrb[7].mxu0  ;;  %v1630_v55 = vsel %vm837_vm1, %v5030_v53, -inf }
 0x4a6   : > { %1631 = vmax.xlane.f32.xlu1 %v1630_v55  ;;  %v1627_v56 = vsel %vm837_vm1, %v5032_v54, -inf }
 0x4a7   : > { %1628 = vmax.xlane.f32.xlu0 %v1627_v56 }
 0x4a9   : > { %v5038_v57 = vpop.f32.mrb[12].mxu1 }
 0x4aa   : > { %1613 = vmax.xlane.f32.xlu1 %v1612_v58  ;;  %v5042_v59 = vpop.f32.mrb[13].mxu1  ;;  %v1636_v0 = vsel %vm837_vm1, %v5038_v57, -inf }
 0x4ab   : > { %1610 = vmax.xlane.f32.xlu0 %v1609_v60  ;;  %v1633_v2 = vsel %vm837_vm1, %v5042_v59, -inf }
 0x4ae   : > { %1625 = vmax.xlane.f32.xlu1 %v1624_v61 }
 0x4af   : > { %1622 = vmax.xlane.f32.xlu0 %v1621_v62 }
 0x4b2   : > { %1637 = vmax.xlane.f32.xlu1 %v1636_v0 }
 0x4b3   : > { %1634 = vmax.xlane.f32.xlu0 %v1633_v2 }
 0x4b5   : > { %v1596_v3 = vpop.xlane.xlu1 %1595 }
 0x4b6   : > { %v1640_v5 = vsub.f32 %v3535_v29, %v1596_v3  ;;  %v1593_v6 = vpop.xlane.xlu0 %1592 }
 0x4b7   : > { %v1639_v7 = vsub.f32 %v959_v30, %v1593_v6 }
 0x4b8   : > { %v1657_v8 = vmul.f32 1.442695, %v1640_v5 }
 0x4b9   : > { %v1655_v9 = vmul.f32 1.442695, %v1639_v7 }
 0x4bb   : > { %4167 = vpow2.f32 %v1655_v9 }
 0x4bc   : > { %4169 = vpow2.f32 %v1657_v8 }
 0x4c3   : > { %4159 = vrot.lane.b32.xlu1 %v4929_v46, %s4488_s25 }
 0x4c5   : > { %v5056_v12 = vpop.eup %4167 }
 0x4c6   : > { %v5058_v13 = vpop.eup %4169  ;;  %3589 = vmatprep.mubr.msk.f32.mxu0 %vm837_vm1, %v5056_v12 }
 0x4c7   : > { %3590 = vmatmul.mubr.msk.f32.vlgmr.msra.gmra.mrb[8].mxu0 %vm837_vm1, %v5058_v13 }
 0x4c8   : > { %3799 = vmatpush3.bf16.msra.mxu0 %v4992_v27 }
 0x4c9   : > { %3805 = vmatprep.subr.bf16.mxu0 %v5062_v14  ;;  %4154 = vrot.lane.b32.xlu0 %v4916_v43, %s4488_s25 }
 0x516   : > { %v1602_v46 = vpop.xlane.xlu0 %1601 }
 0x517   : > { %v1642_v15 = vsub.f32 %v4998_v34, %v1602_v46 }
 0x519   : > { %v1661_v16 = vmul.f32 1.442695, %v1642_v15 }
 0x51a   : > { %v1599_v17 = vpop.xlane.xlu0 %1598 }
 0x51b   : > { %4171 = vpow2.f32 %v1661_v16  ;;  %v1641_v18 = vsub.f32 %v5000_v35, %v1599_v17 }
 0x51d   : > { %v1659_v19 = vmul.f32 1.442695, %v1641_v18 }
 0x51f   : > { %4173 = vpow2.f32 %v1659_v19 }
 0x525   : > { %v4172_v20 = vpop.eup %4171 }
 0x526   : > { %v1696_v21 = vsel %vm837_vm1, %v4172_v20, 0.0 }
 0x527   : > { %1697 = vadd.xlane.f32.xlu1 %v1696_v21 }
 0x529   : > { %v4174_v24 = vpop.eup %4173 }
 0x52a   : > { %3596 = vmatprep.mubr.msk.f32.mxu1 %vm837_vm1, %v4174_v24  ;;  %v1693_v43 = vsel %vm837_vm1, %v4174_v24, 0.0 }
 0x52b   : > { %v1620_v27 = vpop.xlane.xlu1 %1619  ;;  %3597 = vmatmul.mubr.msk.f32.vlgmr.msra.gmra.mrb[14].mxu1 %vm837_vm1, %v4172_v20  ;;  %1694 = vadd.xlane.f32.xlu0 %v1693_v43 }
 0x52c   : > { %v1648_v29 = vsub.f32 %v5014_v44, %v1620_v27  ;;  %3803 = vmatpush3.bf16.msra.mxu1 %v4988_v26  ;;  %v1617_v30 = vpop.xlane.xlu0 %1616 }
 0x52d   : > { %v1647_v31 = vsub.f32 %v5016_v45, %v1617_v30  ;;  %3809 = vmatprep.subr.bf16.mxu1 %v5075_v25 }
 0x52e   : > { %v1673_v33 = vmul.f32 1.442695, %v1648_v29 }
 0x52f   : > { %v1671_v34 = vmul.f32 1.442695, %v1647_v31  ;;  %v1608_v35 = vpop.xlane.xlu1 %1607 }
 0x530   : > { %4175 = vpow2.f32 %v1673_v33  ;;  %v1644_v36 = vsub.f32 %v5006_v39, %v1608_v35  ;;  %v1605_v37 = vpop.xlane.xlu0 %1604 }
 0x531   : > { %4177 = vpow2.f32 %v1671_v34  ;;  %v1643_v47 = vsub.f32 %v5008_v32, %v1605_v37 }
 0x532   : > { %v1665_v48 = vmul.f32 1.442695, %v1644_v36 }
 0x533   : > { %v1663_v50 = vmul.f32 1.442695, %v1643_v47  ;;  %v1632_v44 = vpop.xlane.xlu1 %1631  ;;  %v1690_v47 = vsel %vm837_vm1, %v5058_v13, 0.0 }
 0x534   : > { %4179 = vpow2.f32 %v1665_v48  ;;  %v1652_v26 = vsub.f32 %v5030_v53, %v1632_v44  ;;  %v1629_v52 = vpop.xlane.xlu0 %1628 }
 0x535   : > { %4181 = vpow2.f32 %v1663_v50  ;;  %v1651_v45 = vsub.f32 %v5032_v54, %v1629_v52  ;;  %v1687_v50 = vsel %vm837_vm1, %v5056_v12, 0.0 }
 0x536   : > { %v1681_v55 = vmul.f32 1.442695, %v1652_v26 }
 0x537   : > { %v1679_v56 = vmul.f32 1.442695, %v1651_v45  ;;  %v1614_v58 = vpop.xlane.xlu1 %1613 }
 0x538   : > { %4183 = vpow2.f32 %v1681_v55  ;;  %v1646_v39 = vsub.f32 %v5010_v40, %v1614_v58  ;;  %v1611_v60 = vpop.xlane.xlu0 %1610 }
 0x539   : > { %v1645_v61 = vsub.f32 %v5012_v41, %v1611_v60  ;;  %4185 = vpow2.f32 %v1679_v56 }
 0x53a   : > { %v4176_v32 = vpop.eup %4175  ;;  %v1669_v62 = vmul.f32 1.442695, %v1646_v39 }
 0x53b   : > { %v4178_v63 = vpop.eup %4177  ;;  %v1667_v0 = vmul.f32 1.442695, %v1645_v61  ;;  %v1626_v1 = vpop.xlane.xlu1 %1625  ;;  %v1714_v53 = vsel %vm837_vm1, %v4176_v32, 0.0 }
 0x53c   : > { %4187 = vpow2.f32 %v1669_v62  ;;  %v1650_v54 = vsub.f32 %v5022_v49, %v1626_v1  ;;  %v1623_v2 = vpop.xlane.xlu0 %1622  ;;  %1715 = vadd.xlane.f32.xlu1 %v1714_v53  ;;  %v1711_v3 = vsel %vm837_vm1, %v4178_v63, 0.0 }
 0x53d   : > { %4189 = vpow2.f32 %v1667_v0  ;;  %v1649_v40 = vsub.f32 %v5026_v51, %v1623_v2  ;;  %1712 = vadd.xlane.f32.xlu0 %v1711_v3 }
 0x53e   : > { %v4180_v41 = vpop.eup %4179  ;;  %v1677_v5 = vmul.f32 1.442695, %v1650_v54 }
 0x53f   : > { %v4182_v6 = vpop.eup %4181  ;;  %v1675_v7 = vmul.f32 1.442695, %v1649_v40  ;;  %v1638_v8 = vpop.xlane.xlu1 %1637  ;;  %v1702_v9 = vsel %vm837_vm1, %v4180_v41, 0.0 }
 0x540   : > { %4191 = vpow2.f32 %v1677_v5  ;;  %v1654_v10 = vsub.f32 %v5038_v57, %v1638_v8  ;;  %3603 = vmatprep.mubr.msk.f32.mxu0 %vm837_vm1, %v4182_v6  ;;  %v1635_v49 = vpop.xlane.xlu0 %1634  ;;  %v1699_v19 = vsel %vm837_vm1, %v4182_v6, 0.0 }
 0x541   : > { %4193 = vpow2.f32 %v1675_v7  ;;  %v1653_v11 = vsub.f32 %v5042_v59, %v1635_v49  ;;  %3604 = vmatmul.mubr.msk.f32.vlgmr.msra.gmra.mrb[10].mxu0 %vm837_vm1, %v4180_v41  ;;  %1703 = vadd.xlane.f32.xlu0 %v1702_v9  ;;  %v2545_v49 = vld [vmem:[#allocation9 + $0x8] sm:$0xff] }
 0x542   : > { %v4184_v51 = vpop.eup %4183  ;;  %v1685_v46 = vmul.f32 1.442695, %v1654_v10  ;;  %3807 = vmatpush3.bf16.msra.mxu0 %v5062_v14  ;;  %3617 = vmatprep.mubr.msk.f32.mxu0 %vm837_vm1, %v4178_v63  ;;  %v2544_v10 = vld [vmem:[#allocation9] sm:$0xff] }
 0x543   : > { %v1683_v15 = vmul.f32 1.442695, %v1653_v11  ;;  %v4160_v16 = vpop.permute.xlu1 %4159  ;;  %v1726_v17 = vsel %vm837_vm1, %v4184_v51, 0.0  ;;  %v4186_v59 = vpop.eup %4185  ;;  %v3820_v11 = vpack.c.bf16 %v2545_v49, %v2544_v10 }
 0x544   : > { %4195 = vpow2.f32 %v1685_v46  ;;  %v4162_v57 = vunpack.i.h.bf16 %v4160_v16  ;;  %1727 = vadd.xlane.f32.xlu1 %v1726_v17  ;;  %v4155_v18 = vpop.permute.xlu0 %4154  ;;  %v4161_v20 = vunpack.i.l.bf16 %v4160_v16  ;;  %v1723_v27 = vsel %vm837_vm1, %v4186_v59, 0.0  ;;  %v2547_v46 = vld [vmem:[#allocation9 + $0x18] sm:$0xff]  ;;  %v2548_v16 = vld [vmem:[#allocation9 + $0x20] sm:$0xff]  ;;  %v2549_v17 = vld [vmem:[#allocation9 + $0x28] sm:$0xff] }
 0x545   : > { %4197 = vpow2.f32 %v1683_v15  ;;  %v4157_v21 = vunpack.i.h.bf16 %v4155_v18  ;;  %v4156_v22 = vunpack.i.l.bf16 %v4155_v18  ;;  %3618 = vmatmul.mubr.msk.f32.vlgmr.msra.gmra.mrb[12].mxu0 %vm837_vm1, %v4176_v32  ;;  %1700 = vadd.xlane.f32.xlu0 %v1699_v19 }
 0x546   : > { %v4188_v14 = vpop.eup %4187  ;;  %3631 = vmatprep.mubr.msk.f32.mxu0 %vm837_vm1, %v4186_v59  ;;  %v3816_v29 = vpack.c.bf16 %v4162_v57, %v4161_v20  ;;  %v3828_v57 = vpack.c.bf16 %v2549_v17, %v2548_v16  ;;  %v2550_v59 = vld [vmem:[#allocation9 + $0x30] sm:$0xff]  ;;  %v2551_v20 = vld [vmem:[#allocation9 + $0x38] sm:$0xff] }
 0x547   : > { %v4190_v23 = vpop.eup %4189  ;;  %v3812_v24 = vpack.c.bf16 %v4157_v21, %v4156_v22  ;;  %v1708_v43 = vsel %vm837_vm1, %v4188_v14, 0.0 }
 0x548   : > { %3610 = vmatprep.mubr.msk.f32.mxu1 %vm837_vm1, %v4190_v23  ;;  %1709 = vadd.xlane.f32.xlu1 %v1708_v43  ;;  %v1705_v34 = vsel %vm837_vm1, %v4190_v23, 0.0 }
 0x549   : > { %3611 = vmatmul.mubr.msk.f32.vlgmr.msra.gmra.mrb[16].mxu1 %vm837_vm1, %v4188_v14  ;;  %1724 = vadd.xlane.f32.xlu0 %v1723_v27  ;;  %v3832_v14 = vpack.c.bf16 %v2551_v20, %v2550_v59  ;;  %v2552_v27 = vld [vmem:[#allocation9 + $0x40] sm:$0xff] }
 0x54a   : > { %v4192_v30 = vpop.eup %4191  ;;  %3811 = vmatpush3.bf16.msra.mxu1 %v5075_v25  ;;  %3813 = vmatprep.subr.bf16.mxu0 %v3812_v24 }
 0x54b   : > { %v4194_v31 = vpop.eup %4193  ;;  %3815 = vmatpush3.bf16.msra.mxu0 %v3812_v24  ;;  %3817 = vmatprep.subr.bf16.mxu1 %v3816_v29  ;;  %v1720_v33 = vsel %vm837_vm1, %v4192_v30, 0.0 }
 0x54c   : > { %3624 = vmatprep.mubr.msk.f32.mxu1 %vm837_vm1, %v4194_v31  ;;  %1721 = vadd.xlane.f32.xlu1 %v1720_v33  ;;  %v1717_v37 = vsel %vm837_vm1, %v4194_v31, 0.0 }
 0x54d   : > { %3625 = vmatmul.mubr.msk.f32.vlgmr.msra.gmra.mrb[18].mxu1 %vm837_vm1, %v4192_v30  ;;  %1706 = vadd.xlane.f32.xlu0 %v1705_v34 }
 0x54e   : > { %v4196_v35 = vpop.eup %4195  ;;  %3819 = vmatpush3.bf16.msra.mxu1 %v3816_v29  ;;  %3632 = vmatmul.mubr.msk.f32.vlgmr.msra.gmra.mrb[14].mxu0 %vm837_vm1, %v4184_v51  ;;  %v2546_v51 = vld [vmem:[#allocation9 + $0x10] sm:$0xff]  ;;  %v2553_v29 = vld [vmem:[#allocation9 + $0x48] sm:$0xff] }
 0x54f   : > { %v4198_v36 = vpop.eup %4197  ;;  %v1732_v25 = vsel %vm837_vm1, %v4196_v35, 0.0  ;;  %3821 = vmatprep.subr.bf16.mxu0 %v3820_v11  ;;  %v3824_v15 = vpack.c.bf16 %v2547_v46, %v2546_v51 }
 0x550   : > { %1733 = vadd.xlane.f32.xlu1 %v1732_v25  ;;  %3638 = vmatprep.mubr.msk.f32.mxu1 %vm837_vm1, %v4198_v36  ;;  %v1729_v48 = vsel %vm837_vm1, %v4198_v36, 0.0 }
 0x551   : > { %1718 = vadd.xlane.f32.xlu0 %v1717_v37  ;;  %3639 = vmatmul.mubr.msk.f32.vlgmr.msra.gmra.mrb[20].mxu1 %vm837_vm1, %v4196_v35  ;;  %v3836_v35 = vpack.c.bf16 %v2553_v29, %v2552_v27 }
 0x552   : > { %2792 = vmatprep.mubr.f32.mxu1 %v4482_v4  ;;  %3823 = vmatpush3.bf16.msra.mxu0 %v3820_v11 }
 0x553   : > { %3825 = vmatprep.subr.bf16.mxu0 %v3824_v15 }
 0x554   : > { %1691 = vadd.xlane.f32.xlu1 %v1690_v47  ;;  %v2554_v47 = vld [vmem:[#allocation9 + $0x50] sm:$0xff] }
 0x555   : > { %1730 = vadd.xlane.f32.xlu0 %v1729_v48  ;;  %v2555_v48 = vld [vmem:[#allocation9 + $0x58] sm:$0xff] }
 0x556   : > { %3827 = vmatpush3.bf16.msra.mxu0 %v3824_v15 }
 0x557   : > { %3829 = vmatprep.subr.bf16.mxu0 %v3828_v57 }
 0x559   : > { %1688 = vadd.xlane.f32.xlu0 %v1687_v50 }
 0x55a   : > { %3831 = vmatpush3.bf16.msra.mxu0 %v3828_v57 }
 0x55b   : > { %3833 = vmatprep.subr.bf16.mxu0 %v3832_v14 }
 0x55e   : > { %3835 = vmatpush3.bf16.msra.mxu0 %v3832_v14 }
 0x55f   : > { %3837 = vmatprep.subr.bf16.mxu0 %v3836_v35 }
 0x562   : > { %3839 = vmatpush3.bf16.msra.mxu0 %v3836_v35  ;;  %v2685_v35 = vld [vmem:[#allocation10 + $0x8] sm:$0xff] }
 0x59a   : > { %v3591_v44 = vpop.f32.mrb[8].mxu0 }
 0x59b   : > { %v1813_v26 = vpop.f32.mrb[9].mxu0 }
 0x5b4   : > { %v1698_v45 = vpop.xlane.xlu1 %1697 }
 0x5b8   : > { %v1695_v52 = vpop.xlane.xlu0 %1694 }
 0x5c9   : > { %v1716_v56 = vpop.xlane.xlu1 %1715 }
 0x5ca   : > { %v1713_v55 = vpop.xlane.xlu0 %1712 }
 0x5ce   : > { %v1704_v58 = vpop.xlane.xlu0 %1703 }
 0x5d1   : > { %v1728_v39 = vpop.xlane.xlu1 %1727 }
 0x5d2   : > { %v1701_v60 = vpop.xlane.xlu0 %1700 }
 0x5d5   : > { %v1710_v61 = vpop.xlane.xlu1 %1709 }
 0x5d6   : > { %v1725_v32 = vpop.xlane.xlu0 %1724 }
 0x5d9   : > { %v1722_v13 = vpop.xlane.xlu1 %1721 }
 0x5da   : > { %v1707_v62 = vpop.xlane.xlu0 %1706 }
 0x5dd   : > { %v5123_v63 = vpop.xlane.xlu1 %1733 }
 0x5de   : > { %v5125_v0 = vpop.xlane.xlu0 %1718 }
 0x5e1   : > { %v1692_v1 = vpop.xlane.xlu1 %1691 }
 0x5e2   : > { %4199 = vrcp.f32 %v1692_v1  ;;  %v5127_v12 = vpop.xlane.xlu0 %1730 }
 0x5e6   : > { %v1689_v53 = vpop.xlane.xlu0 %1688 }
 0x5e7   : > { %4201 = vrcp.f32 %v1689_v53  ;;  %v2558_v53 = vld [vmem:[#allocation9 + $0x70] sm:$0xff] }
 0x5e8   : > { %4203 = vrcp.f32 %v1698_v45 }
 0x5e9   : > { %4205 = vrcp.f32 %v1695_v52  ;;  %v3840_v52 = vpack.c.bf16 %v2555_v48, %v2554_v47  ;;  %v2686_v47 = vld [vmem:[#allocation10 + $0x10] sm:$0xff]  ;;  %v2689_v48 = vld [vmem:[#allocation10 + $0x28] sm:$0xff] }
 0x5ea   : > { %4207 = vrcp.f32 %v1704_v58  ;;  %v2556_v58 = vld [vmem:[#allocation9 + $0x60] sm:$0xff] }
 0x5eb   : > { %4209 = vrcp.f32 %v1716_v56  ;;  %3841 = vmatprep.subr.bf16.mxu0 %v3840_v52 }
 0x5ec   : > { %v4200_v54 = vpop.eup %4199  ;;  %4211 = vrcp.f32 %v1701_v60  ;;  %3843 = vmatpush3.bf16.msra.mxu0 %v3840_v52  ;;  %v2688_v52 = vld [vmem:[#allocation10 + $0x20] sm:$0xff] }
 0x5ed   : > { %v2448_v2 = vmul.f32 %v4200_v54, %v3591_v44  ;;  %4213 = vrcp.f32 %v1713_v55  ;;  %v2559_v54 = vld [vmem:[#allocation9 + $0x78] sm:$0xff] }
 0x5ee   : > { %4215 = vrcp.f32 %v1710_v61 }
 0x5ef   : > { %2464 = vst.msk [vmem:[#allocation3 + $0x8] sm:$0xff] %vm837_vm1, %v2448_v2  ;;  %4217 = vrcp.f32 %v1707_v62 }
 0x5f0   : > { %4219 = vrcp.f32 %v1722_v13 }
 0x5f1   : > { %v4202_v3 = vpop.eup %4201  ;;  %4221 = vrcp.f32 %v1728_v39  ;;  %v2557_v39 = vld [vmem:[#allocation9 + $0x68] sm:$0xff] }
 0x5f2   : > { %v2447_v40 = vmul.f32 %v4202_v3, %v1813_v26  ;;  %v4204_v41 = vpop.eup %4203  ;;  %4223 = vrcp.f32 %v1725_v32  ;;  %v3844_v62 = vpack.c.bf16 %v2557_v39, %v2556_v58 }
 0x5f3   : > { %v4206_v6 = vpop.eup %4205  ;;  %4225 = vrcp.f32 %v5123_v63 }
 0x5f4   : > { %2463 = vst.msk [vmem:[#allocation3] sm:$0xff] %vm837_vm1, %v2447_v40  ;;  %v4208_v18 = vpop.eup %4207  ;;  %4227 = vrcp.f32 %v5125_v0  ;;  %3845 = vmatprep.subr.bf16.mxu0 %v3844_v62 }
 0x5f5   : > { %v4210_v23 = vpop.eup %4209  ;;  %4229 = vrcp.f32 %v5127_v12  ;;  %v3848_v12 = vpack.c.bf16 %v2559_v54, %v2558_v53  ;;  %3847 = vmatpush3.bf16.msra.mxu0 %v3844_v62 }
 0x5f6   : > { %v4212_v24 = vpop.eup %4211 }
 0x5f7   : > { %v4214_v30 = vpop.eup %4213  ;;  %3849 = vmatprep.subr.bf16.mxu0 %v3848_v12 }
 0x5f8   : > { %v4216_v25 = vpop.eup %4215 }
 0x5f9   : > { %v4218_v50 = vpop.eup %4217  ;;  %3851 = vmatpush3.bf16.msra.mxu0 %v3848_v12  ;;  %v2697_v12 = vld [vmem:[#allocation10 + $0x68] sm:$0xff] }
 0x5fa   : > { %v4220_v55 = vpop.eup %4219 }
 0x5fb   : > { %v4222_v60 = vpop.eup %4221 }
 0x5fc   : > { %v4224_v63 = vpop.eup %4223 }
 0x5fd   : > { %v4226_v3 = vpop.eup %4225 }
 0x5fe   : > { %v3598_v5 = vpop.f32.mrb[14].mxu1 }
 0x5ff   : > { %v2450_v7 = vmul.f32 %v4204_v41, %v3598_v5  ;;  %v1900_v8 = vpop.f32.mrb[15].mxu1 }
 0x600   : > { %v2449_v9 = vmul.f32 %v4206_v6, %v1900_v8  ;;  %v4228_v6 = vpop.eup %4227 }
 0x601   : > { %2469 = vrot.lane.b32.xlu1 %v2450_v7, %s4487_s18  ;;  %v4230_v8 = vpop.eup %4229 }
 0x602   : > { %2467 = vrot.lane.b32.xlu0 %v2449_v9, %s4487_s18 }
 0x614   : > { %v3605_v19 = vpop.f32.mrb[10].mxu0 }
 0x615   : > { %v2452_v21 = vmul.f32 %v4208_v18, %v3605_v19  ;;  %v1987_v22 = vpop.f32.mrb[11].mxu0 }
 0x616   : > { %v2451_v31 = vmul.f32 %v4212_v24, %v1987_v22 }
 0x617   : > { %2480 = vrot.lane.b32.xlu1 %v2452_v21, %s4484_s17 }
 0x618   : > { %v3619_v43 = vpop.f32.mrb[12].mxu0 }
 0x619   : > { %v2456_v33 = vmul.f32 %v4210_v23, %v3619_v43  ;;  %v2161_v34 = vpop.f32.mrb[13].mxu0  ;;  %v3307_v23 = vld [vmem:[%s5378_s6] ss:$0 sm:$0xff] }
 0x61a   : > { %v2455_v36 = vmul.f32 %v4214_v30, %v2161_v34  ;;  %v4251_v30 = vld [vmem:[%s4786_s12 + $0x8] sm:$0xff] }
 0x61b   : > { %2478 = vrot.lane.b32.xlu1 %v2451_v31, %s4484_s17  ;;  %s4395_s17 = scalar_lea.vmem %s5322_s10, 256 }
 0x61c   : > { %v3612_v37 = vpop.f32.mrb[16].mxu1  ;;  %2500 = vrot.lane.b32.xlu0 %v2455_v36, %s4486_s23  ;;  %v2687_v36 = vld [vmem:[#allocation10 + $0x18] sm:$0xff]  ;;  %p4396_p3 = scmp.ne.s32.totalorder %s5322_s10, %s4395_s17 }
 0x61d   : > { %v2454_v44 = vmul.f32 %v4216_v25, %v3612_v37  ;;  %v2074_v26 = vpop.f32.mrb[17].mxu1  ;;  %v2684_v25 = vld [vmem:[#allocation10] sm:$0xff]  ;;  %v5159_v37 = vpack.c.bf16 %v2687_v36, %v2685_v35 }
 0x61e   : > { %v2453_v45 = vmul.f32 %v4218_v50, %v2074_v26  ;;  %v2691_v50 = vld [vmem:[#allocation10 + $0x38] sm:$0xff]  ;;  %v2825_v35 = vld [vmem:[#allocation12] sm:$0xff]  ;;  %p4397_p5 = pnand %p4396_p3, %p4725_p10 }
 0x61f   : > { %2502 = vrot.lane.b32.xlu1 %v2456_v33, %s4486_s23  ;;  %v4252_v33 = vld [vmem:[%s4786_s12] sm:$0xff]  ;;  %v5163_v26 = vpack.c.bf16 %v2691_v50, %v2689_v48  ;;  %3853 = vmatprep.subr.bf16.mxu1 %v5159_v37  ;;  %v2844_v48 = vld [vmem:[#allocation12 + $0x98] sm:$0xff]  ;;  %s5417_s23 = sld [smem:[#allocation22_spill]]  ;;  %s3317_s12 = sshll.u32 %s4584_s29, 8 }
 0x620   : > { %v3626_v56 = vpop.f32.mrb[18].mxu1  ;;  %2489 = vrot.lane.b32.xlu0 %v2453_v45, %s4489_s14  ;;  %v2690_v45 = vld [vmem:[#allocation10 + $0x30] sm:$0xff]  ;;  %p4398_p7 = pneg %p4397_p5  ;;  %s4490_s29 = smov [#allocation13]  }
 0x621   : > { %v2458_v61 = vmul.f32 %v4220_v55, %v3626_v56  ;;  %v3633_v32 = vpop.f32.mrb[14].mxu0  ;;  %v2248_v13 = vpop.f32.mrb[19].mxu1  ;;  %v2693_v55 = vld [vmem:[#allocation10 + $0x48] sm:$0xff]  ;;  %v2695_v56 = vld [vmem:[#allocation10 + $0x58] sm:$0xff]  ;;  %v5167_v58 = vpack.c.bf16 %v2690_v45, %v2688_v52  ;;  %v2827_v45 = vld [vmem:[#allocation12 + $0x10] sm:$0xff] }
 0x622   : > { %v2460_v0 = vmul.f32 %v4222_v60, %v3633_v32  ;;  %v2335_v1 = vpop.f32.mrb[15].mxu0  ;;  %v2457_v7 = vmul.f32 %v4228_v6, %v2248_v13  ;;  %v5170_v39 = vpack.c.bf16 %v2695_v56, %v2693_v55  ;;  %v2692_v60 = vld [vmem:[#allocation10 + $0x40] sm:$0xff]  ;;  %v2828_v55 = vld [vmem:[#allocation12 + $0x18] sm:$0xff] }
 0x623   : > { %v2459_v2 = vmul.f32 %v4224_v63, %v2335_v1  ;;  %2491 = vrot.lane.b32.xlu1 %v2454_v44, %s4489_s14  ;;  %v5161_v44 = vpack.c.bf16 %v2686_v47, %v2684_v25  ;;  %v2826_v25 = vld [vmem:[#allocation12 + $0x8] sm:$0xff]  ;;  %v2843_v47 = vld [vmem:[#allocation12 + $0x90] sm:$0xff]  ;;  %v2845_v56 = vld [vmem:[#allocation12 + $0xa0] sm:$0xff]  ;;  %s5418_s14 = sld [smem:[#allocation23_spill]] }
 0x624   : > { %v3640_v40 = vpop.f32.mrb[20].mxu1  ;;  %v5220_v50 = vpack.c.bf16 %v2826_v25, %v2825_v35  ;;  %v5222_v52 = vpack.c.bf16 %v2844_v48, %v2843_v47  ;;  %v2839_v25 = vld [vmem:[#allocation12 + $0x70] sm:$0xff]  ;;  %v2840_v47 = vld [vmem:[#allocation12 + $0x78] sm:$0xff] }
 0x625   : > { %v2462_v41 = vmul.f32 %v4226_v3, %v3640_v40  ;;  %2522 = vrot.lane.b32.xlu0 %v2459_v2, %s4488_s25  ;;  %v2422_v5 = vpop.f32.mrb[21].mxu1  ;;  %3855 = vmatpush1.bf16.msra.mxu1 %v5161_v44  ;;  %v2699_v3 = vld [vmem:[#allocation10 + $0x78] sm:$0xff]  ;;  %v3914_v48 = vpack.c.bf16 %v2840_v47, %v2839_v25 }
 0x626   : > { %v2461_v9 = vmul.f32 %v4230_v8, %v2422_v5  ;;  %3857 = vmatprep.subr.bf16.mxu1 %v5163_v26  ;;  %v5187_v40 = vpack.c.bf16 %v2699_v3, %v2697_v12  ;;  %v2698_v5 = vld [vmem:[#allocation10 + $0x70] sm:$0xff]  ;;  %v2703_v8 = vld [vmem:[#allocation10 + $0x98] sm:$0xff] }
 0x627   : > { %2524 = vrot.lane.b32.xlu1 %v2460_v0, %s4488_s25 }
 0x629   : > { %2511 = vrot.lane.b32.xlu0 %v2457_v7, %s4483_s19  ;;  %3859 = vmatpush1.bf16.msra.mxu1 %v5167_v58  ;;  %v2701_v7 = vld [vmem:[#allocation10 + $0x88] sm:$0xff] }
 0x62a   : > { %3861 = vmatprep.subr.bf16.mxu1 %v5170_v39 }
 0x62b   : > { %2513 = vrot.lane.b32.xlu1 %v2458_v61, %s4483_s19  ;;  %v2694_v61 = vld [vmem:[#allocation10 + $0x50] sm:$0xff]  ;;  %s5416_s19 = sld [smem:[#allocation21_spill]] }
 0x62c   : > { %v5173_v32 = vpack.c.bf16 %v2694_v61, %v2692_v60  ;;  %v2846_v60 = vld [vmem:[#allocation12 + $0xa8] sm:$0xff] }
 0x62d   : > { %2533 = vrot.lane.b32.xlu0 %v2461_v9, %s4485_s20  ;;  %v5193_v9 = vpack.c.bf16 %v2703_v8, %v2701_v7  ;;  %v5229_v61 = vpack.c.bf16 %v2846_v60, %v2845_v56  ;;  %v3308_v7 = vld [vmem:[%s5379_s7] ss:$0 sm:$0xff] }
 0x62e   : > { %3863 = vmatpush1.bf16.msra.mxu1 %v5173_v32 }
 0x62f   : > { %2535 = vrot.lane.b32.xlu1 %v2462_v41, %s4485_s20  ;;  %v2696_v41 = vld [vmem:[#allocation10 + $0x60] sm:$0xff]  ;;  %3865 = vmatprep.subr.bf16.mxu1 %v5187_v40  ;;  %s4399_s20 = sshll.u32 %s4490_s29, 4  ;;  %s4400_s20 = int_to_ptr.vmem [resolvable:$false] %s4399_s20 }
 0x630   : > { %v5189_v6 = vpack.c.bf16 %v2698_v5, %v2696_v41  ;;  %p4402_p12 = scmp.lt.s32.totalorder %s5322_s10, %s4400_s20 }
 0x632   : > { %3867 = vmatpush1.bf16.msra.mxu1 %v5189_v6 }
 0x633   : > { %3869 = vmatprep.subr.bf16.mxu1 %v5193_v9 }
 0x673   : > { %v2470_v10 = vpop.permute.xlu1 %2469 }
 0x674   : > { %2475 = vst.msk [vmem:[#allocation3 + $0x8] sm:$0xff] %vm2473_vm4, %v2470_v10  ;;  %v2468_v49 = vpop.permute.xlu0 %2467  ;;  %v2700_v10 = vld [vmem:[#allocation10 + $0x80] sm:$0xff] }
 0x675   : > { %2474 = vst.msk [vmem:[#allocation3] sm:$0xff] %vm2473_vm4, %v2468_v49  ;;  %v2702_v49 = vld [vmem:[#allocation10 + $0x90] sm:$0xff] }
 0x689   : > { %v2481_v11 = vpop.permute.xlu1 %2480 }
 0x68a   : > { %2486 = vst.msk [vmem:[#allocation3 + $0x8] sm:$0xff] %vm2484_vm5, %v2481_v11  ;;  %v5195_v11 = vpack.c.bf16 %v2702_v49, %v2700_v10  ;;  %v3309_v10 = vld [vmem:[%s5416_s19] ss:$0 sm:$0xff]  ;;  %s5327_s19 = scalar_lea.hbm %s5419_s3, %s3317_s12 }
 0x68c   : > { %3871 = vmatpush1.bf16.msra.mxu1 %v5195_v11 }
 0x68d   : > { %v2479_v51 = vpop.permute.xlu1 %2478 }
 0x68e   : > { %2485 = vst.msk [vmem:[#allocation3] sm:$0xff] %vm2484_vm5, %v2479_v51  ;;  %v2501_v46 = vpop.permute.xlu0 %2500  ;;  %v2705_v51 = vld [vmem:[#allocation10 + $0xa8] sm:$0xff] }
 0x691   : > { %v2503_v15 = vpop.permute.xlu1 %2502 }
 0x692   : > { %v2490_v16 = vpop.permute.xlu0 %2489 }
 0x693   : > { %2496 = vst.msk [vmem:[#allocation3] sm:$0xff] %vm2495_vm6, %v2490_v16  ;;  %v2704_v16 = vld [vmem:[#allocation10 + $0xa0] sm:$0xff] }
 0x694   : > { %2507 = vst.msk [vmem:[#allocation3] sm:$0xff] %vm2506_vm7, %v2501_v46  ;;  %v2707_v46 = vld [vmem:[#allocation10 + $0xb8] sm:$0xff] }
 0x695   : > { %v2492_v17 = vpop.permute.xlu1 %2491 }
 0x696   : > { %2497 = vst.msk [vmem:[#allocation3 + $0x8] sm:$0xff] %vm2495_vm6, %v2492_v17  ;;  %v2706_v17 = vld [vmem:[#allocation10 + $0xb0] sm:$0xff] }
 0x697   : > { %v2523_v57 = vpop.permute.xlu0 %2522  ;;  %2508 = vst.msk [vmem:[#allocation3 + $0x8] sm:$0xff] %vm2506_vm7, %v2503_v15  ;;  %v5199_v15 = vpack.c.bf16 %v2707_v46, %v2705_v51 }
 0x699   : > { %v2525_v18 = vpop.permute.xlu1 %2524  ;;  %3873 = vmatprep.subr.bf16.mxu1 %v5199_v15 }
 0x69b   : > { %v2512_v19 = vpop.permute.xlu0 %2511 }
 0x69c   : > { %2518 = vst.msk [vmem:[#allocation3] sm:$0xff] %vm2517_vm8, %v2512_v19  ;;  %v2711_v19 = vld [vmem:[#allocation10 + $0xd8] sm:$0xff] }
 0x69d   : > { %v2514_v59 = vpop.permute.xlu1 %2513  ;;  %2529 = vst.msk [vmem:[#allocation3] sm:$0xff] %vm2528_vm9, %v2523_v57  ;;  %v2709_v57 = vld [vmem:[#allocation10 + $0xc8] sm:$0xff] }
 0x69e   : > { %2519 = vst.msk [vmem:[#allocation3 + $0x8] sm:$0xff] %vm2517_vm8, %v2514_v59  ;;  %v2708_v59 = vld [vmem:[#allocation10 + $0xc0] sm:$0xff] }
 0x69f   : > { %v2534_v20 = vpop.permute.xlu0 %2533  ;;  %2530 = vst.msk [vmem:[#allocation3 + $0x8] sm:$0xff] %vm2528_vm9, %v2525_v18  ;;  %v5201_v18 = vpack.c.bf16 %v2706_v17, %v2704_v16 }
 0x6a0   : > { %2540 = vst.msk [vmem:[#allocation3] sm:$0xff] %vm2539_vm10, %v2534_v20  ;;  %v2710_v20 = vld [vmem:[#allocation10 + $0xd0] sm:$0xff] }
 0x6a1   : > { %v2536_v21 = vpop.permute.xlu1 %2535  ;;  %3875 = vmatpush1.bf16.msra.mxu1 %v5201_v18 }
 0x6a2   : > { %2541 = vst.msk [vmem:[#allocation3 + $0x8] sm:$0xff] %vm2539_vm10, %v2536_v21  ;;  %v5204_v21 = vpack.c.bf16 %v2711_v19, %v2709_v57  ;;  %v2852_v19 = vld [vmem:[#allocation12 + $0xd8] sm:$0xff] }
 0x6a4   : > { %3877 = vmatprep.subr.bf16.mxu1 %v5204_v21 }
 0x6a7   : > { %v2542_v22 = vld [vmem:[#allocation3] sm:$0xff] }
 0x6a8   : > { %3673 = vmatprep.mubr.f32.mxu0 %v2542_v22  ;;  %v2713_v22 = vld [vmem:[#allocation10 + $0xe8] sm:$0xff] }
 0x6a9   : > { %v2543_v14 = vld [vmem:[#allocation3 + $0x8] sm:$0xff] }
 0x6aa   : > { %3674 = vmatmul.mubr.f32.vlgmr.msra.gmra.mrb[16].mxu0 %v2543_v14  ;;  %v2715_v14 = vld [vmem:[#allocation10 + $0xf8] sm:$0xff] }
 0x77d   : > { %v3675_v24 = vpop.f32.mrb[16].mxu0 }
 0x77e   : > { %v2639_v43 = vadd.f32 %v3675_v24, %v3307_v23  ;;  %v2633_v27 = vpop.f32.mrb[17].mxu0  ;;  %v5210_v24 = vpack.c.bf16 %v2715_v14, %v2713_v22  ;;  %v2853_v14 = vld [vmem:[#allocation12 + $0xe0] sm:$0xff] }
 0x77f   : > { %v2634_v29 = vadd.f32 %v3307_v23, %v2633_v27  ;;  %v5207_v23 = vpack.c.bf16 %v2710_v20, %v2708_v59  ;;  %v2714_v27 = vld [vmem:[#allocation10 + $0xf0] sm:$0xff] }
 0x780   : > { %v5152_v31 = vadd.f32 %v4251_v30, %v2639_v43  ;;  %v2712_v43 = vld [vmem:[#allocation10 + $0xe0] sm:$0xff]  ;;  %v2835_v20 = vld [vmem:[#allocation12 + $0x50] sm:$0xff] }
 0x781   : > { %v5155_v34 = vadd.f32 %v4252_v33, %v2634_v29  ;;  %3879 = vmatpush1.bf16.msra.mxu1 %v5207_v23  ;;  %v5213_v29 = vpack.c.bf16 %v2714_v27, %v2712_v43  ;;  %v2841_v30 = vld [vmem:[#allocation12 + $0x80] sm:$0xff]  ;;  %v2842_v33 = vld [vmem:[#allocation12 + $0x88] sm:$0xff] }
 0x782   : > { %2648 = vadd.xlane.f32.xlu1 %v5152_v31  ;;  %3881 = vmatprep.subr.bf16.mxu1 %v5210_v24  ;;  %v5218_v36 = vpack.c.bf16 %v2842_v33, %v2841_v30  ;;  %v2837_v43 = vld [vmem:[#allocation12 + $0x60] sm:$0xff]  ;;  %v2838_v27 = vld [vmem:[#allocation12 + $0x68] sm:$0xff]  ;;  %v2855_v30 = vld [vmem:[#allocation12 + $0xf0] sm:$0xff] }
 0x783   : > { %2646 = vadd.xlane.f32.xlu0 %v5155_v34  ;;  %v2856_v33 = vld [vmem:[#allocation12 + $0xf8] sm:$0xff] }
 0x784   : > { %3885 = vmatprep.subr.bf16.mxu0 %v5218_v36  ;;  %v3912_v35 = vpack.c.bf16 %v2856_v33, %v2855_v30 }
 0x785   : > { %3883 = vmatpush1.bf16.msra.mxu1 %v5213_v29  ;;  %3887 = vmatpush3.bf16.msra.mxu0 %v5220_v50 }
 0x786   : > { %3917 = vmatprep.subr.bf16.mxu1 %v5159_v37  ;;  %v5226_v37 = vpack.c.bf16 %v2828_v55, %v2827_v45  ;;  %3889 = vmatprep.subr.bf16.mxu0 %v5222_v52  ;;  %v2716_v45 = vld [vmem:[%s5417_s23] sm:$0x3]  ;;  %s4401_s23 = scalar_lea.vmem %s4400_s20, 512 }
 0x787   : > { %v5288_v55 = vrot.slane %v2716_v45, %v612_v28  ;;  %v5292_v56 = vrot.slane %v2716_v45, %v616_v42  ;;  %p4403_p2 = scmp.lt.s32.totalorder %s4401_s23, %s4395_s17 }
 0x789   : > { %3891 = vmatpush3.bf16.msra.mxu0 %v5226_v37  ;;  %p4404_p1 = por %p4403_p2, %p4402_p12 }
 0x78a   : > { %3893 = vmatprep.subr.bf16.mxu0 %v5229_v61 }
 0x78b   : > { %p4405_p13 = pnand %p4404_p1, %p4398_p7 }
 0x80f   : > { %v2649_v13 = vpop.xlane.xlu1 %2648 }
 0x810   : > { %v2647_v62 = vpop.xlane.xlu0 %2646  ;;  %v2651_v63 = vmul.f32 0.0078125, %v2649_v13  ;;  %v2829_v13 = vld [vmem:[#allocation12 + $0x20] sm:$0xff] }
 0x811   : > { %v2650_v0 = vmul.f32 0.0078125, %v2647_v62  ;;  %v2830_v62 = vld [vmem:[#allocation12 + $0x28] sm:$0xff] }
 0x812   : > { %v5181_v53 = vsub.f32 %v5152_v31, %v2651_v63  ;;  %v5232_v63 = vpack.c.bf16 %v2830_v62, %v2829_v13 }
 0x813   : > { %v5178_v1 = vsub.f32 %v5155_v34, %v2650_v0 }
 0x814   : > { %v2655_v2 = vmul.f32 %v5181_v53, %v5181_v53  ;;  %3895 = vmatpush3.bf16.msra.mxu0 %v5232_v63 }
 0x815   : > { %v2654_v54 = vmul.f32 %v5178_v1, %v5178_v1 }
 0x817   : > { %2656 = vadd.xlane.f32.xlu0 %v2654_v54 }
 0x81b   : > { %2658 = vadd.xlane.f32.xlu0 %v2655_v2 }
 0x8a4   : > { %v2657_v0 = vpop.xlane.xlu0 %2656 }
 0x8a5   : > { %v2660_v54 = vmul.f32 0.0078125, %v2657_v0 }
 0x8a7   : > { %v2662_v2 = vadd.f32 1e-05, %v2660_v54 }
 0x8a8   : > { %v2659_v12 = vpop.xlane.xlu0 %2658 }
 0x8a9   : > { %4231 = vrsqrt.f32 %v2662_v2  ;;  %v2661_v3 = vmul.f32 0.0078125, %v2659_v12 }
 0x8ab   : > { %v2663_v41 = vadd.f32 1e-05, %v2661_v3 }
 0x8ad   : > { %4233 = vrsqrt.f32 %v2663_v41 }
 0x8b3   : > { %v4232_v5 = vpop.eup %4231 }
 0x8b4   : > { %v2666_v8 = vmul.f32 %v4232_v5, %v5178_v1 }
 0x8b6   : > { %v2674_v49 = vmul.f32 %v3308_v7, %v2666_v8 }
 0x8b7   : > { %v4234_v51 = vpop.eup %4233 }
 0x8b8   : > { %v2682_v46 = vadd.f32 %v3309_v10, %v2674_v49  ;;  %v2667_v16 = vmul.f32 %v4234_v51, %v5181_v53  ;;  %v2849_v53 = vld [vmem:[#allocation12 + $0xc0] sm:$0xff] }
 0x8ba   : > { %2793 = vmatmul.mubr.f32.vlgmr.msra.gmra.mrb[22].mxu1 %v2682_v46  ;;  %v2675_v17 = vmul.f32 %v3308_v7, %v2667_v16 }
 0x8bb   : > { %2798 = vmatprep.mubr.f32.mxu1 %v4482_v4  ;;  %3919 = vmatpush1.bf16.msra.mxu1 %v5161_v44  ;;  %v2847_v44 = vld [vmem:[#allocation12 + $0xb0] sm:$0xff] }
 0x8bc   : > { %v2683_v57 = vadd.f32 %v3309_v10, %v2675_v17  ;;  %3921 = vmatprep.subr.bf16.mxu1 %v5163_v26  ;;  %v2848_v26 = vld [vmem:[#allocation12 + $0xb8] sm:$0xff] }
 0x8be   : > { %2799 = vmatmul.mubr.f32.gmra.mrb[24].mxu1 %v2683_v57 }
 0x8bf   : > { %3923 = vmatpush1.bf16.msra.mxu1 %v5167_v58  ;;  %3003 = vmatprep.mubr.f32.mxu1 %v4482_v4  ;;  %v5261_v58 = vpack.c.bf16 %v2848_v26, %v2847_v44 }
 0x8c0   : > { %3925 = vmatprep.subr.bf16.mxu1 %v5170_v39  ;;  %v2831_v39 = vld [vmem:[#allocation12 + $0x30] sm:$0xff] }
 0x8c1   : > { %3897 = vmatprep.subr.bf16.mxu0 %v5261_v58 }
 0x8c3   : > { %3927 = vmatpush1.bf16.msra.mxu1 %v5173_v32  ;;  %v2832_v32 = vld [vmem:[#allocation12 + $0x38] sm:$0xff] }
 0x8c4   : > { %3929 = vmatprep.subr.bf16.mxu1 %v5187_v40  ;;  %v5263_v1 = vpack.c.bf16 %v2832_v32, %v2831_v39  ;;  %v2850_v40 = vld [vmem:[#allocation12 + $0xc8] sm:$0xff] }
 0x8c6   : > { %3899 = vmatpush3.bf16.msra.mxu0 %v5263_v1 }
 0x8c7   : > { %3931 = vmatpush1.bf16.msra.mxu1 %v5189_v6  ;;  %v5267_v6 = vpack.c.bf16 %v2850_v40, %v2849_v53 }
 0x8c8   : > { %3933 = vmatprep.subr.bf16.mxu1 %v5193_v9  ;;  %v2833_v9 = vld [vmem:[#allocation12 + $0x40] sm:$0xff] }
 0x8c9   : > { %3901 = vmatprep.subr.bf16.mxu0 %v5267_v6 }
 0x8cb   : > { %3935 = vmatpush1.bf16.msra.mxu1 %v5195_v11  ;;  %v2834_v11 = vld [vmem:[#allocation12 + $0x48] sm:$0xff] }
 0x8cc   : > { %3937 = vmatprep.subr.bf16.mxu1 %v5199_v15  ;;  %v5269_v15 = vpack.c.bf16 %v2834_v11, %v2833_v9 }
 0x8ce   : > { %3903 = vmatpush3.bf16.msra.mxu0 %v5269_v15 }
 0x8cf   : > { %3939 = vmatpush1.bf16.msra.mxu1 %v5201_v18  ;;  %v2851_v18 = vld [vmem:[#allocation12 + $0xd0] sm:$0xff] }
 0x8d0   : > { %3941 = vmatprep.subr.bf16.mxu1 %v5204_v21  ;;  %v5273_v59 = vpack.c.bf16 %v2852_v19, %v2851_v18  ;;  %v2836_v21 = vld [vmem:[#allocation12 + $0x58] sm:$0xff] }
 0x8d1   : > { %v5275_v22 = vpack.c.bf16 %v2836_v21, %v2835_v20 }
 0x8d2   : > { %3905 = vmatprep.subr.bf16.mxu0 %v5273_v59 }
 0x8d3   : > { %3943 = vmatpush1.bf16.msra.mxu1 %v5207_v23  ;;  %3907 = vmatpush3.bf16.msra.mxu0 %v5275_v22  ;;  %v2854_v23 = vld [vmem:[#allocation12 + $0xe8] sm:$0xff] }
 0x8d4   : > { %3945 = vmatprep.subr.bf16.mxu1 %v5210_v24  ;;  %v5279_v24 = vpack.c.bf16 %v2854_v23, %v2853_v14 }
 0x8d6   : > { %3909 = vmatprep.subr.bf16.mxu0 %v5279_v24 }
 0x8d7   : > { %3947 = vmatpush1.bf16.msra.mxu1 %v5213_v29  ;;  %v3910_v29 = vpack.c.bf16 %v2838_v27, %v2837_v43 }
 0x8d9   : > { %3911 = vmatpush3.bf16.msra.mxu0 %v3910_v29 }
 0x8da   : > { %3913 = vmatprep.subr.bf16.mxu0 %v3912_v35 }
 0x8dd   : > { %3915 = vmatpush3.bf16.msra.mxu0 %v3914_v48 }
 0x8de   : > { %3949 = vmatprep.subr.bf16.mxu0 %v5218_v36 }
 0x98d   : > { %v2794_v60 = vpop.f32.mrb[22].mxu1 }
 0x98e   : > { %v2795_v13 = vadd.f32 %v2794_v60, %v5288_v55  ;;  %v2796_v62 = vpop.f32.mrb[23].mxu1 }
 0x98f   : > { %v2797_v0 = vadd.f32 %v2796_v62, %v5292_v56 }
 0x990   : > { %v2809_v54 = vmul.f32 0.70710677, %v2795_v13  ;;  %v2805_v49 = vmul.f32 0.5, %v2795_v13 }
 0x991   : > { %v2810_v36 = vmul.f32 0.70710677, %v2797_v0  ;;  %v2800_v2 = vpop.f32.mrb[24].mxu1  ;;  %v2806_v8 = vmul.f32 0.5, %v2797_v0 }
 0x992   : > { %4235 = verf.f32 %v2809_v54  ;;  %v2801_v12 = vadd.f32 %v2800_v2, %v5288_v55  ;;  %v2802_v3 = vpop.f32.mrb[25].mxu1 }
 0x993   : > { %4237 = verf.f32 %v2810_v36  ;;  %v2803_v28 = vadd.f32 %v2802_v3, %v5292_v56 }
 0x994   : > { %v2811_v41 = vmul.f32 0.70710677, %v2801_v12  ;;  %v2807_v39 = vmul.f32 0.5, %v2801_v12 }
 0x995   : > { %v2812_v38 = vmul.f32 0.70710677, %v2803_v28  ;;  %v2808_v44 = vmul.f32 0.5, %v2803_v28 }
 0x996   : > { %4239 = verf.f32 %v2811_v41 }
 0x997   : > { %4241 = verf.f32 %v2812_v38 }
 0x99c   : > { %v4236_v42 = vpop.eup %4235 }
 0x99d   : > { %v4238_v5 = vpop.eup %4237  ;;  %v2817_v7 = vadd.f32 1.0, %v4236_v42 }
 0x99e   : > { %v2818_v10 = vadd.f32 1.0, %v4238_v5 }
 0x99f   : > { %v2821_v17 = vmul.f32 %v2817_v7, %v2805_v49 }
 0x9a0   : > { %v4240_v51 = vpop.eup %4239  ;;  %v2822_v46 = vmul.f32 %v2818_v10, %v2806_v8 }
 0x9a1   : > { %v4242_v16 = vpop.eup %4241  ;;  %v2819_v57 = vadd.f32 1.0, %v4240_v51 }
 0x9a2   : > { %v2820_v26 = vadd.f32 1.0, %v4242_v16  ;;  %2928 = vmatprep.mubr.f32.mxu0 %v2822_v46 }
 0x9a3   : > { %2929 = vmatmul.mubr.f32.vlgmr.msra.gmra.mrb[18].mxu0 %v2821_v17  ;;  %v2823_v53 = vmul.f32 %v2819_v57, %v2807_v39 }
 0x9a4   : > { %v2824_v32 = vmul.f32 %v2820_v26, %v2808_v44  ;;  %3951 = vmatpush3.bf16.msra.mxu0 %v5220_v50 }
 0x9a5   : > { %3953 = vmatprep.subr.bf16.mxu0 %v5222_v52  ;;  %v3310_v52 = vld [vmem:[%s5418_s14] ss:$0 sm:$0xff] }
 0x9a6   : > { %2933 = vmatprep.mubr.f32.mxu0 %v2824_v32 }
 0x9a7   : > { %2934 = vmatmul.mubr.f32.gmra.mrb[20].mxu0 %v2823_v53 }
 0x9a8   : > { %3955 = vmatpush3.bf16.msra.mxu0 %v5226_v37 }
 0x9a9   : > { %3957 = vmatprep.subr.bf16.mxu0 %v5229_v61 }
 0x9ac   : > { %3959 = vmatpush3.bf16.msra.mxu0 %v5232_v63 }
 0x9ad   : > { %3961 = vmatprep.subr.bf16.mxu0 %v5261_v58 }
 0x9b0   : > { %3963 = vmatpush3.bf16.msra.mxu0 %v5263_v1 }
 0x9b1   : > { %3965 = vmatprep.subr.bf16.mxu0 %v5267_v6 }
 0x9b4   : > { %3967 = vmatpush3.bf16.msra.mxu0 %v5269_v15 }
 0x9b5   : > { %3969 = vmatprep.subr.bf16.mxu0 %v5273_v59 }
 0x9b8   : > { %3971 = vmatpush3.bf16.msra.mxu0 %v5275_v22 }
 0x9b9   : > { %3973 = vmatprep.subr.bf16.mxu0 %v5279_v24 }
 0x9bc   : > { %3975 = vmatpush3.bf16.msra.mxu0 %v3910_v29 }
 0x9bd   : > { %3977 = vmatprep.subr.bf16.mxu0 %v3912_v35 }
 0x9c0   : > { %3979 = vmatpush3.bf16.msra.mxu0 %v3914_v48 }
 0xa76   : > { %v3450_v50 = vpop.f32.mrb[18].mxu0 }
 0xa77   : > { %v3451_v37 = vpop.f32.mrb[19].mxu0 }
 0xa78   : > { %v3452_v61 = vadd.f32 %v3451_v37, %v3450_v50 }
 0xa7a   : > { %v2931_v63 = vadd.f32 %v3452_v61, %v3310_v52  ;;  %v3453_v58 = vpop.f32.mrb[20].mxu0 }
 0xa7b   : > { %v3454_v1 = vpop.f32.mrb[21].mxu0 }
 0xa7c   : > { %v3455_v40 = vadd.f32 %v3454_v1, %v3453_v58  ;;  %3004 = vmatmul.mubr.f32.vlgmr.msra.gmra.mrb[26].mxu1 %v2931_v63 }
 0xa7d   : > { %3009 = vmatprep.mubr.f32.mxu1 %v4482_v4 }
 0xa7e   : > { %v2936_v6 = vadd.f32 %v3455_v40, %v3310_v52 }
 0xa80   : > { %3010 = vmatmul.mubr.f32.gmra.mrb[28].mxu1 %v2936_v6 }
 0xb4f   : > { %v3005_v9 = vpop.f32.mrb[26].mxu1 }
 0xb50   : > { %v3006_v11 = vadd.f32 %v3005_v9, %v5288_v55  ;;  %v3007_v15 = vpop.f32.mrb[27].mxu1 }
 0xb51   : > { %v3008_v18 = vadd.f32 %v3007_v15, %v5292_v56 }
 0xb52   : > { %v3020_v19 = vmul.f32 0.70710677, %v3006_v11  ;;  %v3016_v33 = vmul.f32 0.5, %v3006_v11 }
 0xb53   : > { %v3021_v59 = vmul.f32 0.70710677, %v3008_v18  ;;  %v3011_v20 = vpop.f32.mrb[28].mxu1  ;;  %v3017_v29 = vmul.f32 0.5, %v3008_v18 }
 0xb54   : > { %4243 = verf.f32 %v3020_v19  ;;  %v3012_v21 = vadd.f32 %v3011_v20, %v5288_v55  ;;  %v3013_v22 = vpop.f32.mrb[29].mxu1 }
 0xb55   : > { %4245 = verf.f32 %v3021_v59  ;;  %v3014_v14 = vadd.f32 %v3013_v22, %v5292_v56 }
 0xb56   : > { %v3022_v23 = vmul.f32 0.70710677, %v3012_v21  ;;  %v3018_v56 = vmul.f32 0.5, %v3012_v21 }
 0xb57   : > { %v3023_v4 = vmul.f32 0.70710677, %v3014_v14  ;;  %v3019_v55 = vmul.f32 0.5, %v3014_v14 }
 0xb58   : > { %4247 = verf.f32 %v3022_v23 }
 0xb59   : > { %4249 = verf.f32 %v3023_v4 }
 0xb5e   : > { %v4244_v24 = vpop.eup %4243 }
 0xb5f   : > { %v4246_v43 = vpop.eup %4245  ;;  %v3028_v27 = vadd.f32 1.0, %v4244_v24 }
 0xb60   : > { %v3029_v30 = vadd.f32 1.0, %v4246_v43 }
 0xb61   : > { %v3032_v48 = vmul.f32 %v3028_v27, %v3016_v33 }
 0xb62   : > { %v4248_v35 = vpop.eup %4247  ;;  %v3033_v25 = vmul.f32 %v3029_v30, %v3017_v29 }
 0xb63   : > { %v4250_v47 = vpop.eup %4249  ;;  %v3030_v45 = vadd.f32 1.0, %v4248_v35 }
 0xb64   : > { %v3031_v60 = vadd.f32 1.0, %v4250_v47  ;;  %3100 = vmatprep.mubr.f32.mxu0 %v3033_v25 }
 0xb65   : > { %3101 = vmatmul.mubr.f32.vlgmr.msra.gmra.mrb[22].mxu0 %v3032_v48  ;;  %v3034_v62 = vmul.f32 %v3030_v45, %v3018_v56 }
 0xb66   : > { %v3035_v13 = vmul.f32 %v3031_v60, %v3019_v55 }
 0xb68   : > { %3105 = vmatprep.mubr.f32.mxu0 %v3035_v13 }
 0xb69   : > { %3106 = vmatmul.mubr.f32.gmra.mrb[24].mxu0 %v3034_v62 }
 0xc38   : > { %v3488_v0 = vpop.f32.mrb[22].mxu0 }
 0xc39   : > { %v3489_v54 = vpop.f32.mrb[23].mxu0 }
 0xc3a   : > { %v3490_v36 = vadd.f32 %v3489_v54, %v3488_v0 }
 0xc3c   : > { %v3103_v2 = vadd.f32 %v3490_v36, %v3310_v52  ;;  %v3491_v12 = vpop.f32.mrb[24].mxu0 }
 0xc3d   : > { %v3492_v3 = vpop.f32.mrb[25].mxu0 }
 0xc3e   : > { %v3111_v28 = vadd.f32 %v3103_v2, %v5155_v34  ;;  %v3493_v41 = vadd.f32 %v3492_v3, %v3491_v12 }
 0xc40   : > { %3113 = vst [vmem:[%s516_s16] sm:$0xff] %v3111_v28  ;;  %v3108_v38 = vadd.f32 %v3493_v41, %v3310_v52 }
 0xc42   : > { %v3112_v42 = vadd.f32 %v3108_v38, %v5152_v31 }
 0xc44   : > { %3114 = vst [vmem:[%s516_s16 + $0x8] sm:$0xff] %v3112_v42 }
 0xc45   : > { %4408 = shalt.err (!%p4405_p13)
}
 0xc46   : > { %s4409_s18 = scalar_lea.hbm %s5327_s19, 256  ;;  %s4413_s16 = scalar_lea.hbm %s5419_s3, 512 }
 0xc47   : > { %p4410_p9 = scmp.ne.s32.totalorder %s5327_s19, %s4409_s18  ;;  %p4414_p4 = scmp.lt.u32.totalorder %s5327_s19, %s5419_s3 }
 0xc48   : > { %p4415_p8 = scmp.lt.u32.totalorder %s4413_s16, %s4409_s18  ;;  %p4417_p3 = scmp.lt.u32.totalorder %s4409_s18, %s5327_s19 }
 0xc49   : > { %p4411_p0 = pnand %p4410_p9, %p4725_p10 }
 0xc4a   : > { %p4416_p6 = por %p4415_p8, %p4414_p4 }
 0xc4b   : > { %p4412_p11 = pneg %p4411_p0 }
 0xc4c   : > { %p4418_p5 = por %p4417_p3, %p4416_p6 }
 0xc4e   : > { %p4419_p7 = pnand %p4418_p5, %p4412_p11 }
 0xc50   : > { %4422 = shalt.err (!%p4419_p7)
}
 0xc51   : > { %s4491_s21 = smov 128   ;;  %s4492_s17 = smov 8  }
 0xc52   : > { %3998 = dma.vmem_to_hbm [thread:$0]  (%p4725_p10), %s5322_s10, 256, %s5327_s19, %s3116_s22, %s4491_s21, %s4491_s21, %s4492_s17  }
 0xc53 PF: > { %s5420_s29 = sld [smem:[#allocation18_spill]]  ;;  %s5421_s20 = sld [smem:[#allocation19_spill]] }
 0xc54   : > { %p5423_p2 = scmp.ge.s32.totalorder %s4469_s28, 2 }
 0xc59   : > { %s3144_s23 = sand.u32 1, %s5420_s29   ;;  %p5422_p12 = scmp.ne.s32.totalorder %s5421_s20, 0 }
 0xc5a   : > { %s3145_s18 = scalar_lea.sflag [#allocation6], %s3144_s23 }
 0xc5b   : > { %p4018_p1 = pnand %p5423_p2, %p5422_p12 }
 0xc5d   : > { %4452 = dma.done.wait (!%p4018_p1), %s3145_s18, 256  }
 0xc5e   : > { %4454 = vsyncadd (!%p4018_p1), %s3145_s18, 4294967040  ;;  %p28_p13 = scmp.ge.s32.totalorder %s4715_s15, 4   ;;  %s5424_s25 = smov %s4461_s26 }
 0xc5f   : > { %s5425_s26 = smov %s4465_s27  ;;  %s5426_s27 = smov %s4731_s30 }
 0xc60   : > { %s5427_s28 = smov %s4715_s15  ;;  %30 = sbr.rel (!%p28_p13) target bundleno = 13 (0xd), region = 140 }
 0xc67   :  { %3150 = vsyncpa [#allocation5], 1 }
 0xc68   :  { %3152 = vsyncpa [#allocation5 + $0x1], 1 }
 0xc69   :  { %3153 = vsyncpa [#allocation8], 1 }
 0xc6a   :  { %3154 = vsyncpa [#allocation11], 1 }
 0xc6b   :  { %3155 = vsyncpa [#allocation6], 1 }
 0xc6c   :  { %3157 = vsyncpa [#allocation6 + $0x1], 1 }

</bundles_post_ra>
